<compile_context>
chip_gen: v7x
topology: tpu7x:2x2x1
jax: 0.10.0
libtpu: 0.0.40
codegen_flags: <defaults>
</compile_context>

<pallas_src>
import functools

import jax
import jax.numpy as jnp
from jax import lax
from jax.experimental import pallas as pl
from jax.experimental.pallas import tpu as pltpu

EPS = 1e-5          # PyTorch BatchNorm2d default eps
NUM_LAYERS = 13     # 6 encoder convs + 7 decoder convs


# ----------------------------------------------------------------------------
# Fused kernel: whole network in one invocation (no grid).
# ----------------------------------------------------------------------------
def _fused_encoder_decoder_kernel(w_ref, p_ref, x_ref, o_ref, *, batch):
    """w_ref : (13*9,) SMEM  -- conv weights, row-major 3x3 per layer
       p_ref : (13*2,) SMEM  -- per layer [bn_scale, bn_shift (conv bias folded)]
       x_ref : (H+2, B*(W+2)) VMEM -- zero-padded, batch lane-packed input slab
       o_ref : (H,   B*(W+2)) VMEM -- batch lane-packed output slab
    """
    B = batch
    Hp, Wp_full = x_ref.shape
    H = Hp - 2
    W = Wp_full // B - 2
    f32 = jnp.float32

    def mm(a, b):
        # Every matmul multiplies activations by a constant 0/1 selection
        # matrix; in-kernel f32 dots are lowered at full f32 precision by
        # Mosaic, so the pass-through of activation values is exact.
        return jnp.dot(a, b, preferred_element_type=f32)

    # Constant selection matrices, built from iota once per distinct spatial
    # size (memoized during tracing) and shared across layers.
    cache = {}

    def _mat(kind, size, shape, fn):
        key = (kind, size)
        if key not in cache:
            r = lax.broadcasted_iota(jnp.int32, shape, 0)
            c = lax.broadcasted_iota(jnp.int32, shape, 1)
            cache[key] = fn(r, c).astype(f32)
        return cache[key]

    def valid_cols(w):
        # (1, B*(w+2)) bool: per-batch valid (non-seam) column positions.
        key = ("valid", w)
        if key not in cache:
            c = lax.broadcasted_iota(jnp.int32, (1, B * (w + 2)), 1)
            cond = None
            for b in range(B):
                jc = c - b * (w + 2)
                cb = (jc >= 1) & (jc <= w)
                cond = cb if cond is None else (cond | cb)
            cache[key] = cond
        return cache[key]

    def col_mask(w):
        key = ("cmask", w)
        if key not in cache:
            cache[key] = valid_cols(w).astype(f32)
        return cache[key]

    def shift_mat(w, dj):
        # (B*(w+2), B*(w+2)) constant: +/-1 column shift of the padded slab,
        # restricted to valid output columns (block-diagonal over the batch).
        key = ("shift", w, dj)
        if key not in cache:
            n = B * (w + 2)
            r = lax.broadcasted_iota(jnp.int32, (n, n), 0)
            c = lax.broadcasted_iota(jnp.int32, (n, n), 1)
            rel = (r == c - 1) if dj == 0 else (r == c + 1)
            cache[key] = (rel & valid_cols(w)).astype(f32)
        return cache[key]

    def conv_bn_relu(xp, h, w, li):
        """3x3 'same' conv + folded BN affine + ReLU.
        xp : (h+2, B*(w+2)) zero-ring padded slab
        out: (h,   B*(w+2)) row-compact slab (valid cols 1..w per batch)."""
        # Horizontal (dj) taps: two constant shift matmuls on the otherwise
        # idle MXU instead of nine lane-rotating slices on the XLU.
        xs = (mm(xp, shift_mat(w, 0)),   # xs[0][:, J] = xp[:, J-1]
              xp,                        # xs[1][:, J] = xp[:, J]
              mm(xp, shift_mat(w, 2)))   # xs[2][:, J] = xp[:, J+1]
        # Vertical (di) taps via sublane-offset slices; three independent
        # per-row partial sums, tree-added (short dependent VALU chain).
        parts = []
        for di in range(3):
            t0 = w_ref[9 * li + 3 * di + 0] * xs[0][di:di + h, :]
            t1 = w_ref[9 * li + 3 * di + 1] * xs[1][di:di + h, :]
            t2 = w_ref[9 * li + 3 * di + 2] * xs[2][di:di + h, :]
            parts.append((t0 + t1) + t2)
        acc = (parts[0] + parts[1]) + parts[2]
        return jnp.maximum(acc * p_ref[2 * li] + p_ref[2 * li + 1], 0.0)

    def pool_pad(c, h, w):
        """2x2/stride-2 max-pool fused with the next conv's zero padding.
        (h, B*(w+2)) -> (h//2+2, B*(w//2+2)) padded slab."""
        hh, ww = h // 2, w // 2
        n_in = B * (w + 2)
        # Adjacent-row / adjacent-column max on the VPU (slices, no matmul).
        rmax = jnp.maximum(c[:h - 1, :], c[1:h, :])
        a_sel = _mat("poolA", h, (hh + 2, h - 1), lambda r, cc: cc == 2 * r - 2)
        rows = mm(a_sel, rmax)                        # even rows + zero pad rows
        cmax = jnp.maximum(rows[:, :n_in - 1], rows[:, 1:])

        def bfn(r, cc):
            cond = None
            for b in range(B):
                jc = cc - b * (ww + 2)
                cb = (jc >= 1) & (jc <= ww) & (r == b * (w + 2) + 2 * jc - 1)
                cond = cb if cond is None else (cond | cb)
            return cond
        b_sel = _mat("poolB", w, (n_in - 1, B * (ww + 2)), bfn)
        return mm(cmax, b_sel)                        # even cols + zero seam cols

    def upsample_pad(c, h, w):
        """Nearest 2x upsample fused with the next conv's zero padding.
        (h, B*(w+2)) -> (2h+2, B*(2w+2)) padded slab."""
        uh = _mat("upH", h, (2 * h + 2, h),
                  lambda r, cc: (r == 2 * cc + 1) | (r == 2 * cc + 2))

        def ufn(r, cc):
            cond = None
            for b in range(B):
                jr = r - b * (w + 2)
                jc = cc - b * (2 * w + 2)
                cb = ((jr >= 1) & (jr <= w)
                      & ((jc == 2 * jr - 1) | (jc == 2 * jr)))
                cond = cb if cond is None else (cond | cb)
            return cond
        uw = _mat("upW", w, (B * (w + 2), B * (2 * w + 2)), ufn)
        return mm(mm(uh, c), uw)

    def pad_only(c, h, w):
        """Zero-ring pad with no resize: (h, B*(w+2)) -> (h+2, B*(w+2))."""
        pd = _mat("padR", h, (h + 2, h), lambda r, cc: r == cc + 1)
        # The BN shift + ReLU leaves relu(shift) in the seam columns; re-zero
        # them so the next conv sees an exact zero ring.
        return mm(pd, c * col_mask(w))

    # ------------------------------ network ------------------------------
    xp = x_ref[...]                                  # padded input slab
    h, w, li = H, W, 0
    for _ in range(5):                               # encoder: conv+bn+relu+pool
        c = conv_bn_relu(xp, h, w, li); li += 1
        xp = pool_pad(c, h, w)
        h //= 2; w //= 2
    c = conv_bn_relu(xp, h, w, li); li += 1          # encoder bottleneck conv
    xp = pad_only(c, h, w)
    for _ in range(5):                               # decoder: conv+bn+relu+up
        c = conv_bn_relu(xp, h, w, li); li += 1
        xp = upsample_pad(c, h, w)
        h *= 2; w *= 2
    c = conv_bn_relu(xp, h, w, li); li += 1          # decoder conv (no resize)
    xp = pad_only(c, h, w)
    c = conv_bn_relu(xp, h, w, li); li += 1          # final decoder conv

    # Epilogue: x / x.max() over the whole batch.  Seam columns are zeroed so
    # they cannot contaminate the max (post-ReLU values are >= 0); scalar
    # reciprocal + a single broadcast multiply.
    y = c * col_mask(w)
    gmax = jnp.max(y)
    o_ref[...] = y * (1.0 / gmax)


def fused_forward(x_slab, w_all, p_all, batch):
    """x_slab: (H+2, B*(W+2)) f32; w_all: (117,) f32; p_all: (26,) f32."""
    Hp, Wp = x_slab.shape
    kernel = functools.partial(_fused_encoder_decoder_kernel, batch=batch)
    return pl.pallas_call(
        kernel,
        out_shape=jax.ShapeDtypeStruct((Hp - 2, Wp), jnp.float32),
        in_specs=[
            pl.BlockSpec(memory_space=pltpu.MemorySpace.SMEM),   # conv weights
            pl.BlockSpec(memory_space=pltpu.MemorySpace.SMEM),   # BN scale/shift
            pl.BlockSpec(memory_space=pltpu.MemorySpace.VMEM),   # input slab
        ],
        out_specs=pl.BlockSpec(memory_space=pltpu.MemorySpace.VMEM),
    )(w_all, p_all, x_slab)


# ----------------------------------------------------------------------------
# Parameters & forward
# ----------------------------------------------------------------------------
def init_layer(key):
    kw, kb = jax.random.split(key)
    bound = 1.0 / 3.0  # 1/sqrt(fan_in), fan_in = 1 * 3 * 3 (PyTorch default)
    w = jax.random.uniform(kw, (3, 3), jnp.float32, -bound, bound)
    # deterministic synthetic init; positive bias keeps the 13-layer ReLU chain
    # from collapsing to all-zeros (which would make x / x.max() NaN).
    b = jax.random.uniform(kb, (), jnp.float32, 0.01, bound)
    return dict(w=w, b=b,
                gamma=jnp.float32(1.0), beta=jnp.float32(0.0),
                mean=jnp.float32(0.0), var=jnp.float32(1.0))


def pack_params(enc_params, dec_params):
    """Fold BN (eval) + conv bias into per-layer (scale, shift) and flatten
    everything into two small 1-D SMEM tables."""
    params = list(enc_params) + list(dec_params)
    assert len(params) == NUM_LAYERS
    w_all = jnp.concatenate(
        [p["w"].reshape(-1).astype(jnp.float32) for p in params])      # (117,)
    folded = []
    for p in params:
        scale = p["gamma"] / jnp.sqrt(p["var"] + EPS)
        shift = p["beta"] - p["mean"] * scale + scale * p["b"]
        folded.append(jnp.stack([scale, shift]).astype(jnp.float32))
    p_all = jnp.concatenate(folded)                                     # (26,)
    return w_all, p_all


def forward(x_nchw, enc_params, dec_params):
    """x_nchw: (B, 1, H, W) NCHW input with C == 1 (matches the PyTorch module)."""
    w_all, p_all = pack_params(enc_params, dec_params)
    x = x_nchw[:, 0].astype(jnp.float32)              # (B, H, W)
    B, H, W = x.shape
    assert H % 32 == 0 and W % 32 == 0, "five 2x2 max-pools need spatial % 32 == 0"
    # Free layout plumbing (wrapper side): zero-pad the 3x3 conv ring and
    # lane-pack the batch so every in-kernel vector op covers all B images.
    xp = jnp.pad(x, ((0, 0), (1, 1), (1, 1)))         # (B, H+2, W+2)
    slab = xp.transpose(1, 0, 2).reshape(H + 2, B * (W + 2))
    out = fused_forward(slab, w_all, p_all, B)        # (H, B*(W+2))
    out = out.reshape(H, B, W + 2)[:, :, 1:W + 1].transpose(1, 0, 2)
    return out[:, None, :, :]                         # restore NCHW


if __name__ == "__main__":
    key = jax.random.PRNGKey(0)
    k_in, k_params = jax.random.split(key)
    layer_keys = jax.random.split(k_params, NUM_LAYERS)
    enc_params = [init_layer(layer_keys[i]) for i in range(6)]
    dec_params = [init_layer(layer_keys[6 + i]) for i in range(7)]

    # Spatial must be divisible by 32 (five 2x2 maxpools, then five 2x upsamples).
    x = jax.random.uniform(k_in, (2, 1, 32, 32), jnp.float32)

    fwd = jax.jit(forward)
    out = fwd(x, enc_params, dec_params)
    jax.block_until_ready(out)
    assert out.shape == (2, 1, 32, 32)
    print("KERNEL_OK")
</pallas_src>

<mosaic_0001>
module attributes {stable_mosaic.version = 11 : i64} {
  func.func @_fused_encoder_decoder_kernel(%arg0: memref<117xf32, #tpu.memory_space<smem>>, %arg1: memref<26xf32, #tpu.memory_space<smem>>, %arg2: memref<34x68xf32, #tpu.memory_space<vmem>>, %arg3: memref<32x68xf32, #tpu.memory_space<vmem>>) attributes {dimension_semantics = [], scalar_prefetch = 0 : i64, scratch_operands = 0 : i64, tpu.core_type = #tpu.core_type<tc>} {
    %c0 = arith.constant 0 : index
    %c0_0 = arith.constant 0 : index
    %0 = vector.load %arg2[%c0, %c0_0] : memref<34x68xf32, #tpu.memory_space<vmem>>, vector<34x68xf32>
    %1 = tpu.iota {dimensions = array<i32: 0>} : vector<68x68xi32>
    %2 = tpu.iota {dimensions = array<i32: 1>} : vector<68x68xi32>
    %c1_i32 = arith.constant 1 : i32
    %3 = vector.broadcast %c1_i32 : i32 to vector<68x68xi32>
    %4 = arith.subi %2, %3 : vector<68x68xi32>
    %5 = arith.cmpi eq, %1, %4 : vector<68x68xi32>
    %6 = tpu.iota {dimensions = array<i32: 1>} : vector<1x68xi32>
    %c0_i32 = arith.constant 0 : i32
    %7 = vector.broadcast %c0_i32 : i32 to vector<1x68xi32>
    %8 = arith.subi %6, %7 : vector<1x68xi32>
    %c1_i32_1 = arith.constant 1 : i32
    %9 = vector.broadcast %c1_i32_1 : i32 to vector<1x68xi32>
    %10 = arith.cmpi sge, %8, %9 : vector<1x68xi32>
    %c32_i32 = arith.constant 32 : i32
    %11 = vector.broadcast %c32_i32 : i32 to vector<1x68xi32>
    %12 = arith.cmpi sle, %8, %11 : vector<1x68xi32>
    %13 = arith.andi %10, %12 : vector<1x68xi1>
    %c34_i32 = arith.constant 34 : i32
    %14 = vector.broadcast %c34_i32 : i32 to vector<1x68xi32>
    %15 = arith.subi %6, %14 : vector<1x68xi32>
    %c1_i32_2 = arith.constant 1 : i32
    %16 = vector.broadcast %c1_i32_2 : i32 to vector<1x68xi32>
    %17 = arith.cmpi sge, %15, %16 : vector<1x68xi32>
    %c32_i32_3 = arith.constant 32 : i32
    %18 = vector.broadcast %c32_i32_3 : i32 to vector<1x68xi32>
    %19 = arith.cmpi sle, %15, %18 : vector<1x68xi32>
    %20 = arith.andi %17, %19 : vector<1x68xi1>
    %21 = arith.ori %13, %20 : vector<1x68xi1>
    %22 = vector.broadcast %21 : vector<1x68xi1> to vector<68x68xi1>
    %23 = arith.andi %5, %22 : vector<68x68xi1>
    %24 = arith.extui %23 : vector<68x68xi1> to vector<68x68xi32>
    %25 = arith.sitofp %24 : vector<68x68xi32> to vector<68x68xf32>
    %cst = arith.constant dense<0.000000e+00> : vector<34x68xf32>
    %26 = tpu.matmul %0, %25, %cst {dimension_numbers = #tpu.dot_dimension_numbers<[1], [0], [0], [1], [0, 0, 1, 1], [], []>} : vector<34x68xf32>, vector<68x68xf32>, vector<34x68xf32> -> vector<34x68xf32>
    %27 = tpu.iota {dimensions = array<i32: 0>} : vector<68x68xi32>
    %28 = tpu.iota {dimensions = array<i32: 1>} : vector<68x68xi32>
    %c1_i32_4 = arith.constant 1 : i32
    %29 = vector.broadcast %c1_i32_4 : i32 to vector<68x68xi32>
    %30 = arith.addi %28, %29 : vector<68x68xi32>
    %31 = arith.cmpi eq, %27, %30 : vector<68x68xi32>
    %32 = vector.broadcast %21 : vector<1x68xi1> to vector<68x68xi1>
    %33 = arith.andi %31, %32 : vector<68x68xi1>
    %34 = arith.extui %33 : vector<68x68xi1> to vector<68x68xi32>
    %35 = arith.sitofp %34 : vector<68x68xi32> to vector<68x68xf32>
    %cst_5 = arith.constant dense<0.000000e+00> : vector<34x68xf32>
    %36 = tpu.matmul %0, %35, %cst_5 {dimension_numbers = #tpu.dot_dimension_numbers<[1], [0], [0], [1], [0, 0, 1, 1], [], []>} : vector<34x68xf32>, vector<68x68xf32>, vector<34x68xf32> -> vector<34x68xf32>
    %c0_6 = arith.constant 0 : index
    %37 = memref.load %arg0[%c0_6] : memref<117xf32, #tpu.memory_space<smem>>
    %38 = vector.extract_strided_slice %26 {offsets = [0, 0], sizes = [32, 68], strides = [1, 1]} : vector<34x68xf32> to vector<32x68xf32>
    %39 = vector.broadcast %37 : f32 to vector<32x68xf32>
    %40 = arith.mulf %39, %38 : vector<32x68xf32>
    %c1 = arith.constant 1 : index
    %41 = memref.load %arg0[%c1] : memref<117xf32, #tpu.memory_space<smem>>
    %42 = vector.extract_strided_slice %0 {offsets = [0, 0], sizes = [32, 68], strides = [1, 1]} : vector<34x68xf32> to vector<32x68xf32>
    %43 = vector.broadcast %41 : f32 to vector<32x68xf32>
    %44 = arith.mulf %43, %42 : vector<32x68xf32>
    %c2 = arith.constant 2 : index
    %45 = memref.load %arg0[%c2] : memref<117xf32, #tpu.memory_space<smem>>
    %46 = vector.extract_strided_slice %36 {offsets = [0, 0], sizes = [32, 68], strides = [1, 1]} : vector<34x68xf32> to vector<32x68xf32>
    %47 = vector.broadcast %45 : f32 to vector<32x68xf32>
    %48 = arith.mulf %47, %46 : vector<32x68xf32>
    %49 = arith.addf %40, %44 : vector<32x68xf32>
    %50 = arith.addf %49, %48 : vector<32x68xf32>
    %c3 = arith.constant 3 : index
    %51 = memref.load %arg0[%c3] : memref<117xf32, #tpu.memory_space<smem>>
    %52 = vector.extract_strided_slice %26 {offsets = [1, 0], sizes = [32, 68], strides = [1, 1]} : vector<34x68xf32> to vector<32x68xf32>
    %53 = vector.broadcast %51 : f32 to vector<32x68xf32>
    %54 = arith.mulf %53, %52 : vector<32x68xf32>
    %c4 = arith.constant 4 : index
    %55 = memref.load %arg0[%c4] : memref<117xf32, #tpu.memory_space<smem>>
    %56 = vector.extract_strided_slice %0 {offsets = [1, 0], sizes = [32, 68], strides = [1, 1]} : vector<34x68xf32> to vector<32x68xf32>
    %57 = vector.broadcast %55 : f32 to vector<32x68xf32>
    %58 = arith.mulf %57, %56 : vector<32x68xf32>
    %c5 = arith.constant 5 : index
    %59 = memref.load %arg0[%c5] : memref<117xf32, #tpu.memory_space<smem>>
    %60 = vector.extract_strided_slice %36 {offsets = [1, 0], sizes = [32, 68], strides = [1, 1]} : vector<34x68xf32> to vector<32x68xf32>
    %61 = vector.broadcast %59 : f32 to vector<32x68xf32>
    %62 = arith.mulf %61, %60 : vector<32x68xf32>
    %63 = arith.addf %54, %58 : vector<32x68xf32>
    %64 = arith.addf %63, %62 : vector<32x68xf32>
    %c6 = arith.constant 6 : index
    %65 = memref.load %arg0[%c6] : memref<117xf32, #tpu.memory_space<smem>>
    %66 = vector.extract_strided_slice %26 {offsets = [2, 0], sizes = [32, 68], strides = [1, 1]} : vector<34x68xf32> to vector<32x68xf32>
    %67 = vector.broadcast %65 : f32 to vector<32x68xf32>
    %68 = arith.mulf %67, %66 : vector<32x68xf32>
    %c7 = arith.constant 7 : index
    %69 = memref.load %arg0[%c7] : memref<117xf32, #tpu.memory_space<smem>>
    %70 = vector.extract_strided_slice %0 {offsets = [2, 0], sizes = [32, 68], strides = [1, 1]} : vector<34x68xf32> to vector<32x68xf32>
    %71 = vector.broadcast %69 : f32 to vector<32x68xf32>
    %72 = arith.mulf %71, %70 : vector<32x68xf32>
    %c8 = arith.constant 8 : index
    %73 = memref.load %arg0[%c8] : memref<117xf32, #tpu.memory_space<smem>>
    %74 = vector.extract_strided_slice %36 {offsets = [2, 0], sizes = [32, 68], strides = [1, 1]} : vector<34x68xf32> to vector<32x68xf32>
    %75 = vector.broadcast %73 : f32 to vector<32x68xf32>
    %76 = arith.mulf %75, %74 : vector<32x68xf32>
    %77 = arith.addf %68, %72 : vector<32x68xf32>
    %78 = arith.addf %77, %76 : vector<32x68xf32>
    %79 = arith.addf %50, %64 : vector<32x68xf32>
    %80 = arith.addf %79, %78 : vector<32x68xf32>
    %c0_7 = arith.constant 0 : index
    %81 = memref.load %arg1[%c0_7] : memref<26xf32, #tpu.memory_space<smem>>
    %82 = vector.broadcast %81 : f32 to vector<32x68xf32>
    %83 = arith.mulf %80, %82 : vector<32x68xf32>
    %c1_8 = arith.constant 1 : index
    %84 = memref.load %arg1[%c1_8] : memref<26xf32, #tpu.memory_space<smem>>
    %85 = vector.broadcast %84 : f32 to vector<32x68xf32>
    %86 = arith.addf %83, %85 : vector<32x68xf32>
    %cst_9 = arith.constant 0.000000e+00 : f32
    %87 = vector.broadcast %cst_9 : f32 to vector<32x68xf32>
    %88 = arith.maximumf %86, %87 : vector<32x68xf32>
    %89 = vector.extract_strided_slice %88 {offsets = [0, 0], sizes = [31, 68], strides = [1, 1]} : vector<32x68xf32> to vector<31x68xf32>
    %90 = vector.extract_strided_slice %88 {offsets = [1, 0], sizes = [31, 68], strides = [1, 1]} : vector<32x68xf32> to vector<31x68xf32>
    %91 = arith.maximumf %89, %90 : vector<31x68xf32>
    %92 = tpu.iota {dimensions = array<i32: 0>} : vector<18x31xi32>
    %93 = tpu.iota {dimensions = array<i32: 1>} : vector<18x31xi32>
    %c2_i32 = arith.constant 2 : i32
    %94 = vector.broadcast %c2_i32 : i32 to vector<18x31xi32>
    %95 = arith.muli %94, %92 : vector<18x31xi32>
    %c2_i32_10 = arith.constant 2 : i32
    %96 = vector.broadcast %c2_i32_10 : i32 to vector<18x31xi32>
    %97 = arith.subi %95, %96 : vector<18x31xi32>
    %98 = arith.cmpi eq, %93, %97 : vector<18x31xi32>
    %99 = arith.extui %98 : vector<18x31xi1> to vector<18x31xi32>
    %100 = arith.sitofp %99 : vector<18x31xi32> to vector<18x31xf32>
    %cst_11 = arith.constant dense<0.000000e+00> : vector<18x68xf32>
    %101 = tpu.matmul %100, %91, %cst_11 {dimension_numbers = #tpu.dot_dimension_numbers<[1], [0], [0], [1], [0, 0, 1, 1], [], []>} : vector<18x31xf32>, vector<31x68xf32>, vector<18x68xf32> -> vector<18x68xf32>
    %102 = vector.extract_strided_slice %101 {offsets = [0, 0], sizes = [18, 67], strides = [1, 1]} : vector<18x68xf32> to vector<18x67xf32>
    %103 = vector.extract_strided_slice %101 {offsets = [0, 1], sizes = [18, 67], strides = [1, 1]} : vector<18x68xf32> to vector<18x67xf32>
    %104 = arith.maximumf %102, %103 : vector<18x67xf32>
    %105 = tpu.iota {dimensions = array<i32: 0>} : vector<67x36xi32>
    %106 = tpu.iota {dimensions = array<i32: 1>} : vector<67x36xi32>
    %c0_i32_12 = arith.constant 0 : i32
    %107 = vector.broadcast %c0_i32_12 : i32 to vector<67x36xi32>
    %108 = arith.subi %106, %107 : vector<67x36xi32>
    %c1_i32_13 = arith.constant 1 : i32
    %109 = vector.broadcast %c1_i32_13 : i32 to vector<67x36xi32>
    %110 = arith.cmpi sge, %108, %109 : vector<67x36xi32>
    %c16_i32 = arith.constant 16 : i32
    %111 = vector.broadcast %c16_i32 : i32 to vector<67x36xi32>
    %112 = arith.cmpi sle, %108, %111 : vector<67x36xi32>
    %113 = arith.andi %110, %112 : vector<67x36xi1>
    %c2_i32_14 = arith.constant 2 : i32
    %114 = vector.broadcast %c2_i32_14 : i32 to vector<67x36xi32>
    %115 = arith.muli %114, %108 : vector<67x36xi32>
    %c0_i32_15 = arith.constant 0 : i32
    %116 = vector.broadcast %c0_i32_15 : i32 to vector<67x36xi32>
    %117 = arith.addi %116, %115 : vector<67x36xi32>
    %c1_i32_16 = arith.constant 1 : i32
    %118 = vector.broadcast %c1_i32_16 : i32 to vector<67x36xi32>
    %119 = arith.subi %117, %118 : vector<67x36xi32>
    %120 = arith.cmpi eq, %105, %119 : vector<67x36xi32>
    %121 = arith.andi %113, %120 : vector<67x36xi1>
    %c18_i32 = arith.constant 18 : i32
    %122 = vector.broadcast %c18_i32 : i32 to vector<67x36xi32>
    %123 = arith.subi %106, %122 : vector<67x36xi32>
    %c1_i32_17 = arith.constant 1 : i32
    %124 = vector.broadcast %c1_i32_17 : i32 to vector<67x36xi32>
    %125 = arith.cmpi sge, %123, %124 : vector<67x36xi32>
    %c16_i32_18 = arith.constant 16 : i32
    %126 = vector.broadcast %c16_i32_18 : i32 to vector<67x36xi32>
    %127 = arith.cmpi sle, %123, %126 : vector<67x36xi32>
    %128 = arith.andi %125, %127 : vector<67x36xi1>
    %c2_i32_19 = arith.constant 2 : i32
    %129 = vector.broadcast %c2_i32_19 : i32 to vector<67x36xi32>
    %130 = arith.muli %129, %123 : vector<67x36xi32>
    %c34_i32_20 = arith.constant 34 : i32
    %131 = vector.broadcast %c34_i32_20 : i32 to vector<67x36xi32>
    %132 = arith.addi %131, %130 : vector<67x36xi32>
    %c1_i32_21 = arith.constant 1 : i32
    %133 = vector.broadcast %c1_i32_21 : i32 to vector<67x36xi32>
    %134 = arith.subi %132, %133 : vector<67x36xi32>
    %135 = arith.cmpi eq, %105, %134 : vector<67x36xi32>
    %136 = arith.andi %128, %135 : vector<67x36xi1>
    %137 = arith.ori %121, %136 : vector<67x36xi1>
    %138 = arith.extui %137 : vector<67x36xi1> to vector<67x36xi32>
    %139 = arith.sitofp %138 : vector<67x36xi32> to vector<67x36xf32>
    %cst_22 = arith.constant dense<0.000000e+00> : vector<18x36xf32>
    %140 = tpu.matmul %104, %139, %cst_22 {dimension_numbers = #tpu.dot_dimension_numbers<[1], [0], [0], [1], [0, 0, 1, 1], [], []>} : vector<18x67xf32>, vector<67x36xf32>, vector<18x36xf32> -> vector<18x36xf32>
    %141 = tpu.iota {dimensions = array<i32: 0>} : vector<36x36xi32>
    %142 = tpu.iota {dimensions = array<i32: 1>} : vector<36x36xi32>
    %c1_i32_23 = arith.constant 1 : i32
    %143 = vector.broadcast %c1_i32_23 : i32 to vector<36x36xi32>
    %144 = arith.subi %142, %143 : vector<36x36xi32>
    %145 = arith.cmpi eq, %141, %144 : vector<36x36xi32>
    %146 = tpu.iota {dimensions = array<i32: 1>} : vector<1x36xi32>
    %c0_i32_24 = arith.constant 0 : i32
    %147 = vector.broadcast %c0_i32_24 : i32 to vector<1x36xi32>
    %148 = arith.subi %146, %147 : vector<1x36xi32>
    %c1_i32_25 = arith.constant 1 : i32
    %149 = vector.broadcast %c1_i32_25 : i32 to vector<1x36xi32>
    %150 = arith.cmpi sge, %148, %149 : vector<1x36xi32>
    %c16_i32_26 = arith.constant 16 : i32
    %151 = vector.broadcast %c16_i32_26 : i32 to vector<1x36xi32>
    %152 = arith.cmpi sle, %148, %151 : vector<1x36xi32>
    %153 = arith.andi %150, %152 : vector<1x36xi1>
    %c18_i32_27 = arith.constant 18 : i32
    %154 = vector.broadcast %c18_i32_27 : i32 to vector<1x36xi32>
    %155 = arith.subi %146, %154 : vector<1x36xi32>
    %c1_i32_28 = arith.constant 1 : i32
    %156 = vector.broadcast %c1_i32_28 : i32 to vector<1x36xi32>
    %157 = arith.cmpi sge, %155, %156 : vector<1x36xi32>
    %c16_i32_29 = arith.constant 16 : i32
    %158 = vector.broadcast %c16_i32_29 : i32 to vector<1x36xi32>
    %159 = arith.cmpi sle, %155, %158 : vector<1x36xi32>
    %160 = arith.andi %157, %159 : vector<1x36xi1>
    %161 = arith.ori %153, %160 : vector<1x36xi1>
    %162 = vector.broadcast %161 : vector<1x36xi1> to vector<36x36xi1>
    %163 = arith.andi %145, %162 : vector<36x36xi1>
    %164 = arith.extui %163 : vector<36x36xi1> to vector<36x36xi32>
    %165 = arith.sitofp %164 : vector<36x36xi32> to vector<36x36xf32>
    %cst_30 = arith.constant dense<0.000000e+00> : vector<18x36xf32>
    %166 = tpu.matmul %140, %165, %cst_30 {dimension_numbers = #tpu.dot_dimension_numbers<[1], [0], [0], [1], [0, 0, 1, 1], [], []>} : vector<18x36xf32>, vector<36x36xf32>, vector<18x36xf32> -> vector<18x36xf32>
    %167 = tpu.iota {dimensions = array<i32: 0>} : vector<36x36xi32>
    %168 = tpu.iota {dimensions = array<i32: 1>} : vector<36x36xi32>
    %c1_i32_31 = arith.constant 1 : i32
    %169 = vector.broadcast %c1_i32_31 : i32 to vector<36x36xi32>
    %170 = arith.addi %168, %169 : vector<36x36xi32>
    %171 = arith.cmpi eq, %167, %170 : vector<36x36xi32>
    %172 = vector.broadcast %161 : vector<1x36xi1> to vector<36x36xi1>
    %173 = arith.andi %171, %172 : vector<36x36xi1>
    %174 = arith.extui %173 : vector<36x36xi1> to vector<36x36xi32>
    %175 = arith.sitofp %174 : vector<36x36xi32> to vector<36x36xf32>
    %cst_32 = arith.constant dense<0.000000e+00> : vector<18x36xf32>
    %176 = tpu.matmul %140, %175, %cst_32 {dimension_numbers = #tpu.dot_dimension_numbers<[1], [0], [0], [1], [0, 0, 1, 1], [], []>} : vector<18x36xf32>, vector<36x36xf32>, vector<18x36xf32> -> vector<18x36xf32>
    %c9 = arith.constant 9 : index
    %177 = memref.load %arg0[%c9] : memref<117xf32, #tpu.memory_space<smem>>
    %178 = vector.extract_strided_slice %166 {offsets = [0, 0], sizes = [16, 36], strides = [1, 1]} : vector<18x36xf32> to vector<16x36xf32>
    %179 = vector.broadcast %177 : f32 to vector<16x36xf32>
    %180 = arith.mulf %179, %178 : vector<16x36xf32>
    %c10 = arith.constant 10 : index
    %181 = memref.load %arg0[%c10] : memref<117xf32, #tpu.memory_space<smem>>
    %182 = vector.extract_strided_slice %140 {offsets = [0, 0], sizes = [16, 36], strides = [1, 1]} : vector<18x36xf32> to vector<16x36xf32>
    %183 = vector.broadcast %181 : f32 to vector<16x36xf32>
    %184 = arith.mulf %183, %182 : vector<16x36xf32>
    %c11 = arith.constant 11 : index
    %185 = memref.load %arg0[%c11] : memref<117xf32, #tpu.memory_space<smem>>
    %186 = vector.extract_strided_slice %176 {offsets = [0, 0], sizes = [16, 36], strides = [1, 1]} : vector<18x36xf32> to vector<16x36xf32>
    %187 = vector.broadcast %185 : f32 to vector<16x36xf32>
    %188 = arith.mulf %187, %186 : vector<16x36xf32>
    %189 = arith.addf %180, %184 : vector<16x36xf32>
    %190 = arith.addf %189, %188 : vector<16x36xf32>
    %c12 = arith.constant 12 : index
    %191 = memref.load %arg0[%c12] : memref<117xf32, #tpu.memory_space<smem>>
    %192 = vector.extract_strided_slice %166 {offsets = [1, 0], sizes = [16, 36], strides = [1, 1]} : vector<18x36xf32> to vector<16x36xf32>
    %193 = vector.broadcast %191 : f32 to vector<16x36xf32>
    %194 = arith.mulf %193, %192 : vector<16x36xf32>
    %c13 = arith.constant 13 : index
    %195 = memref.load %arg0[%c13] : memref<117xf32, #tpu.memory_space<smem>>
    %196 = vector.extract_strided_slice %140 {offsets = [1, 0], sizes = [16, 36], strides = [1, 1]} : vector<18x36xf32> to vector<16x36xf32>
    %197 = vector.broadcast %195 : f32 to vector<16x36xf32>
    %198 = arith.mulf %197, %196 : vector<16x36xf32>
    %c14 = arith.constant 14 : index
    %199 = memref.load %arg0[%c14] : memref<117xf32, #tpu.memory_space<smem>>
    %200 = vector.extract_strided_slice %176 {offsets = [1, 0], sizes = [16, 36], strides = [1, 1]} : vector<18x36xf32> to vector<16x36xf32>
    %201 = vector.broadcast %199 : f32 to vector<16x36xf32>
    %202 = arith.mulf %201, %200 : vector<16x36xf32>
    %203 = arith.addf %194, %198 : vector<16x36xf32>
    %204 = arith.addf %203, %202 : vector<16x36xf32>
    %c15 = arith.constant 15 : index
    %205 = memref.load %arg0[%c15] : memref<117xf32, #tpu.memory_space<smem>>
    %206 = vector.extract_strided_slice %166 {offsets = [2, 0], sizes = [16, 36], strides = [1, 1]} : vector<18x36xf32> to vector<16x36xf32>
    %207 = vector.broadcast %205 : f32 to vector<16x36xf32>
    %208 = arith.mulf %207, %206 : vector<16x36xf32>
    %c16 = arith.constant 16 : index
    %209 = memref.load %arg0[%c16] : memref<117xf32, #tpu.memory_space<smem>>
    %210 = vector.extract_strided_slice %140 {offsets = [2, 0], sizes = [16, 36], strides = [1, 1]} : vector<18x36xf32> to vector<16x36xf32>
    %211 = vector.broadcast %209 : f32 to vector<16x36xf32>
    %212 = arith.mulf %211, %210 : vector<16x36xf32>
    %c17 = arith.constant 17 : index
    %213 = memref.load %arg0[%c17] : memref<117xf32, #tpu.memory_space<smem>>
    %214 = vector.extract_strided_slice %176 {offsets = [2, 0], sizes = [16, 36], strides = [1, 1]} : vector<18x36xf32> to vector<16x36xf32>
    %215 = vector.broadcast %213 : f32 to vector<16x36xf32>
    %216 = arith.mulf %215, %214 : vector<16x36xf32>
    %217 = arith.addf %208, %212 : vector<16x36xf32>
    %218 = arith.addf %217, %216 : vector<16x36xf32>
    %219 = arith.addf %190, %204 : vector<16x36xf32>
    %220 = arith.addf %219, %218 : vector<16x36xf32>
    %c2_33 = arith.constant 2 : index
    %221 = memref.load %arg1[%c2_33] : memref<26xf32, #tpu.memory_space<smem>>
    %222 = vector.broadcast %221 : f32 to vector<16x36xf32>
    %223 = arith.mulf %220, %222 : vector<16x36xf32>
    %c3_34 = arith.constant 3 : index
    %224 = memref.load %arg1[%c3_34] : memref<26xf32, #tpu.memory_space<smem>>
    %225 = vector.broadcast %224 : f32 to vector<16x36xf32>
    %226 = arith.addf %223, %225 : vector<16x36xf32>
    %cst_35 = arith.constant 0.000000e+00 : f32
    %227 = vector.broadcast %cst_35 : f32 to vector<16x36xf32>
    %228 = arith.maximumf %226, %227 : vector<16x36xf32>
    %229 = vector.extract_strided_slice %228 {offsets = [0, 0], sizes = [15, 36], strides = [1, 1]} : vector<16x36xf32> to vector<15x36xf32>
    %230 = vector.extract_strided_slice %228 {offsets = [1, 0], sizes = [15, 36], strides = [1, 1]} : vector<16x36xf32> to vector<15x36xf32>
    %231 = arith.maximumf %229, %230 : vector<15x36xf32>
    %232 = tpu.iota {dimensions = array<i32: 0>} : vector<10x15xi32>
    %233 = tpu.iota {dimensions = array<i32: 1>} : vector<10x15xi32>
    %c2_i32_36 = arith.constant 2 : i32
    %234 = vector.broadcast %c2_i32_36 : i32 to vector<10x15xi32>
    %235 = arith.muli %234, %232 : vector<10x15xi32>
    %c2_i32_37 = arith.constant 2 : i32
    %236 = vector.broadcast %c2_i32_37 : i32 to vector<10x15xi32>
    %237 = arith.subi %235, %236 : vector<10x15xi32>
    %238 = arith.cmpi eq, %233, %237 : vector<10x15xi32>
    %239 = arith.extui %238 : vector<10x15xi1> to vector<10x15xi32>
    %240 = arith.sitofp %239 : vector<10x15xi32> to vector<10x15xf32>
    %cst_38 = arith.constant dense<0.000000e+00> : vector<10x36xf32>
    %241 = tpu.matmul %240, %231, %cst_38 {dimension_numbers = #tpu.dot_dimension_numbers<[1], [0], [0], [1], [0, 0, 1, 1], [], []>} : vector<10x15xf32>, vector<15x36xf32>, vector<10x36xf32> -> vector<10x36xf32>
    %242 = vector.extract_strided_slice %241 {offsets = [0, 0], sizes = [10, 35], strides = [1, 1]} : vector<10x36xf32> to vector<10x35xf32>
    %243 = vector.extract_strided_slice %241 {offsets = [0, 1], sizes = [10, 35], strides = [1, 1]} : vector<10x36xf32> to vector<10x35xf32>
    %244 = arith.maximumf %242, %243 : vector<10x35xf32>
    %245 = tpu.iota {dimensions = array<i32: 0>} : vector<35x20xi32>
    %246 = tpu.iota {dimensions = array<i32: 1>} : vector<35x20xi32>
    %c0_i32_39 = arith.constant 0 : i32
    %247 = vector.broadcast %c0_i32_39 : i32 to vector<35x20xi32>
    %248 = arith.subi %246, %247 : vector<35x20xi32>
    %c1_i32_40 = arith.constant 1 : i32
    %249 = vector.broadcast %c1_i32_40 : i32 to vector<35x20xi32>
    %250 = arith.cmpi sge, %248, %249 : vector<35x20xi32>
    %c8_i32 = arith.constant 8 : i32
    %251 = vector.broadcast %c8_i32 : i32 to vector<35x20xi32>
    %252 = arith.cmpi sle, %248, %251 : vector<35x20xi32>
    %253 = arith.andi %250, %252 : vector<35x20xi1>
    %c2_i32_41 = arith.constant 2 : i32
    %254 = vector.broadcast %c2_i32_41 : i32 to vector<35x20xi32>
    %255 = arith.muli %254, %248 : vector<35x20xi32>
    %c0_i32_42 = arith.constant 0 : i32
    %256 = vector.broadcast %c0_i32_42 : i32 to vector<35x20xi32>
    %257 = arith.addi %256, %255 : vector<35x20xi32>
    %c1_i32_43 = arith.constant 1 : i32
    %258 = vector.broadcast %c1_i32_43 : i32 to vector<35x20xi32>
    %259 = arith.subi %257, %258 : vector<35x20xi32>
    %260 = arith.cmpi eq, %245, %259 : vector<35x20xi32>
    %261 = arith.andi %253, %260 : vector<35x20xi1>
    %c10_i32 = arith.constant 10 : i32
    %262 = vector.broadcast %c10_i32 : i32 to vector<35x20xi32>
    %263 = arith.subi %246, %262 : vector<35x20xi32>
    %c1_i32_44 = arith.constant 1 : i32
    %264 = vector.broadcast %c1_i32_44 : i32 to vector<35x20xi32>
    %265 = arith.cmpi sge, %263, %264 : vector<35x20xi32>
    %c8_i32_45 = arith.constant 8 : i32
    %266 = vector.broadcast %c8_i32_45 : i32 to vector<35x20xi32>
    %267 = arith.cmpi sle, %263, %266 : vector<35x20xi32>
    %268 = arith.andi %265, %267 : vector<35x20xi1>
    %c2_i32_46 = arith.constant 2 : i32
    %269 = vector.broadcast %c2_i32_46 : i32 to vector<35x20xi32>
    %270 = arith.muli %269, %263 : vector<35x20xi32>
    %c18_i32_47 = arith.constant 18 : i32
    %271 = vector.broadcast %c18_i32_47 : i32 to vector<35x20xi32>
    %272 = arith.addi %271, %270 : vector<35x20xi32>
    %c1_i32_48 = arith.constant 1 : i32
    %273 = vector.broadcast %c1_i32_48 : i32 to vector<35x20xi32>
    %274 = arith.subi %272, %273 : vector<35x20xi32>
    %275 = arith.cmpi eq, %245, %274 : vector<35x20xi32>
    %276 = arith.andi %268, %275 : vector<35x20xi1>
    %277 = arith.ori %261, %276 : vector<35x20xi1>
    %278 = arith.extui %277 : vector<35x20xi1> to vector<35x20xi32>
    %279 = arith.sitofp %278 : vector<35x20xi32> to vector<35x20xf32>
    %cst_49 = arith.constant dense<0.000000e+00> : vector<10x20xf32>
    %280 = tpu.matmul %244, %279, %cst_49 {dimension_numbers = #tpu.dot_dimension_numbers<[1], [0], [0], [1], [0, 0, 1, 1], [], []>} : vector<10x35xf32>, vector<35x20xf32>, vector<10x20xf32> -> vector<10x20xf32>
    %281 = tpu.iota {dimensions = array<i32: 0>} : vector<20x20xi32>
    %282 = tpu.iota {dimensions = array<i32: 1>} : vector<20x20xi32>
    %c1_i32_50 = arith.constant 1 : i32
    %283 = vector.broadcast %c1_i32_50 : i32 to vector<20x20xi32>
    %284 = arith.subi %282, %283 : vector<20x20xi32>
    %285 = arith.cmpi eq, %281, %284 : vector<20x20xi32>
    %286 = tpu.iota {dimensions = array<i32: 1>} : vector<1x20xi32>
    %c0_i32_51 = arith.constant 0 : i32
    %287 = vector.broadcast %c0_i32_51 : i32 to vector<1x20xi32>
    %288 = arith.subi %286, %287 : vector<1x20xi32>
    %c1_i32_52 = arith.constant 1 : i32
    %289 = vector.broadcast %c1_i32_52 : i32 to vector<1x20xi32>
    %290 = arith.cmpi sge, %288, %289 : vector<1x20xi32>
    %c8_i32_53 = arith.constant 8 : i32
    %291 = vector.broadcast %c8_i32_53 : i32 to vector<1x20xi32>
    %292 = arith.cmpi sle, %288, %291 : vector<1x20xi32>
    %293 = arith.andi %290, %292 : vector<1x20xi1>
    %c10_i32_54 = arith.constant 10 : i32
    %294 = vector.broadcast %c10_i32_54 : i32 to vector<1x20xi32>
    %295 = arith.subi %286, %294 : vector<1x20xi32>
    %c1_i32_55 = arith.constant 1 : i32
    %296 = vector.broadcast %c1_i32_55 : i32 to vector<1x20xi32>
    %297 = arith.cmpi sge, %295, %296 : vector<1x20xi32>
    %c8_i32_56 = arith.constant 8 : i32
    %298 = vector.broadcast %c8_i32_56 : i32 to vector<1x20xi32>
    %299 = arith.cmpi sle, %295, %298 : vector<1x20xi32>
    %300 = arith.andi %297, %299 : vector<1x20xi1>
    %301 = arith.ori %293, %300 : vector<1x20xi1>
    %302 = vector.broadcast %301 : vector<1x20xi1> to vector<20x20xi1>
    %303 = arith.andi %285, %302 : vector<20x20xi1>
    %304 = arith.extui %303 : vector<20x20xi1> to vector<20x20xi32>
    %305 = arith.sitofp %304 : vector<20x20xi32> to vector<20x20xf32>
    %cst_57 = arith.constant dense<0.000000e+00> : vector<10x20xf32>
    %306 = tpu.matmul %280, %305, %cst_57 {dimension_numbers = #tpu.dot_dimension_numbers<[1], [0], [0], [1], [0, 0, 1, 1], [], []>} : vector<10x20xf32>, vector<20x20xf32>, vector<10x20xf32> -> vector<10x20xf32>
    %307 = tpu.iota {dimensions = array<i32: 0>} : vector<20x20xi32>
    %308 = tpu.iota {dimensions = array<i32: 1>} : vector<20x20xi32>
    %c1_i32_58 = arith.constant 1 : i32
    %309 = vector.broadcast %c1_i32_58 : i32 to vector<20x20xi32>
    %310 = arith.addi %308, %309 : vector<20x20xi32>
    %311 = arith.cmpi eq, %307, %310 : vector<20x20xi32>
    %312 = vector.broadcast %301 : vector<1x20xi1> to vector<20x20xi1>
    %313 = arith.andi %311, %312 : vector<20x20xi1>
    %314 = arith.extui %313 : vector<20x20xi1> to vector<20x20xi32>
    %315 = arith.sitofp %314 : vector<20x20xi32> to vector<20x20xf32>
    %cst_59 = arith.constant dense<0.000000e+00> : vector<10x20xf32>
    %316 = tpu.matmul %280, %315, %cst_59 {dimension_numbers = #tpu.dot_dimension_numbers<[1], [0], [0], [1], [0, 0, 1, 1], [], []>} : vector<10x20xf32>, vector<20x20xf32>, vector<10x20xf32> -> vector<10x20xf32>
    %c18 = arith.constant 18 : index
    %317 = memref.load %arg0[%c18] : memref<117xf32, #tpu.memory_space<smem>>
    %318 = vector.extract_strided_slice %306 {offsets = [0, 0], sizes = [8, 20], strides = [1, 1]} : vector<10x20xf32> to vector<8x20xf32>
    %319 = vector.broadcast %317 : f32 to vector<8x20xf32>
    %320 = arith.mulf %319, %318 : vector<8x20xf32>
    %c19 = arith.constant 19 : index
    %321 = memref.load %arg0[%c19] : memref<117xf32, #tpu.memory_space<smem>>
    %322 = vector.extract_strided_slice %280 {offsets = [0, 0], sizes = [8, 20], strides = [1, 1]} : vector<10x20xf32> to vector<8x20xf32>
    %323 = vector.broadcast %321 : f32 to vector<8x20xf32>
    %324 = arith.mulf %323, %322 : vector<8x20xf32>
    %c20 = arith.constant 20 : index
    %325 = memref.load %arg0[%c20] : memref<117xf32, #tpu.memory_space<smem>>
    %326 = vector.extract_strided_slice %316 {offsets = [0, 0], sizes = [8, 20], strides = [1, 1]} : vector<10x20xf32> to vector<8x20xf32>
    %327 = vector.broadcast %325 : f32 to vector<8x20xf32>
    %328 = arith.mulf %327, %326 : vector<8x20xf32>
    %329 = arith.addf %320, %324 : vector<8x20xf32>
    %330 = arith.addf %329, %328 : vector<8x20xf32>
    %c21 = arith.constant 21 : index
    %331 = memref.load %arg0[%c21] : memref<117xf32, #tpu.memory_space<smem>>
    %332 = vector.extract_strided_slice %306 {offsets = [1, 0], sizes = [8, 20], strides = [1, 1]} : vector<10x20xf32> to vector<8x20xf32>
    %333 = vector.broadcast %331 : f32 to vector<8x20xf32>
    %334 = arith.mulf %333, %332 : vector<8x20xf32>
    %c22 = arith.constant 22 : index
    %335 = memref.load %arg0[%c22] : memref<117xf32, #tpu.memory_space<smem>>
    %336 = vector.extract_strided_slice %280 {offsets = [1, 0], sizes = [8, 20], strides = [1, 1]} : vector<10x20xf32> to vector<8x20xf32>
    %337 = vector.broadcast %335 : f32 to vector<8x20xf32>
    %338 = arith.mulf %337, %336 : vector<8x20xf32>
    %c23 = arith.constant 23 : index
    %339 = memref.load %arg0[%c23] : memref<117xf32, #tpu.memory_space<smem>>
    %340 = vector.extract_strided_slice %316 {offsets = [1, 0], sizes = [8, 20], strides = [1, 1]} : vector<10x20xf32> to vector<8x20xf32>
    %341 = vector.broadcast %339 : f32 to vector<8x20xf32>
    %342 = arith.mulf %341, %340 : vector<8x20xf32>
    %343 = arith.addf %334, %338 : vector<8x20xf32>
    %344 = arith.addf %343, %342 : vector<8x20xf32>
    %c24 = arith.constant 24 : index
    %345 = memref.load %arg0[%c24] : memref<117xf32, #tpu.memory_space<smem>>
    %346 = vector.extract_strided_slice %306 {offsets = [2, 0], sizes = [8, 20], strides = [1, 1]} : vector<10x20xf32> to vector<8x20xf32>
    %347 = vector.broadcast %345 : f32 to vector<8x20xf32>
    %348 = arith.mulf %347, %346 : vector<8x20xf32>
    %c25 = arith.constant 25 : index
    %349 = memref.load %arg0[%c25] : memref<117xf32, #tpu.memory_space<smem>>
    %350 = vector.extract_strided_slice %280 {offsets = [2, 0], sizes = [8, 20], strides = [1, 1]} : vector<10x20xf32> to vector<8x20xf32>
    %351 = vector.broadcast %349 : f32 to vector<8x20xf32>
    %352 = arith.mulf %351, %350 : vector<8x20xf32>
    %c26 = arith.constant 26 : index
    %353 = memref.load %arg0[%c26] : memref<117xf32, #tpu.memory_space<smem>>
    %354 = vector.extract_strided_slice %316 {offsets = [2, 0], sizes = [8, 20], strides = [1, 1]} : vector<10x20xf32> to vector<8x20xf32>
    %355 = vector.broadcast %353 : f32 to vector<8x20xf32>
    %356 = arith.mulf %355, %354 : vector<8x20xf32>
    %357 = arith.addf %348, %352 : vector<8x20xf32>
    %358 = arith.addf %357, %356 : vector<8x20xf32>
    %359 = arith.addf %330, %344 : vector<8x20xf32>
    %360 = arith.addf %359, %358 : vector<8x20xf32>
    %c4_60 = arith.constant 4 : index
    %361 = memref.load %arg1[%c4_60] : memref<26xf32, #tpu.memory_space<smem>>
    %362 = vector.broadcast %361 : f32 to vector<8x20xf32>
    %363 = arith.mulf %360, %362 : vector<8x20xf32>
    %c5_61 = arith.constant 5 : index
    %364 = memref.load %arg1[%c5_61] : memref<26xf32, #tpu.memory_space<smem>>
    %365 = vector.broadcast %364 : f32 to vector<8x20xf32>
    %366 = arith.addf %363, %365 : vector<8x20xf32>
    %cst_62 = arith.constant 0.000000e+00 : f32
    %367 = vector.broadcast %cst_62 : f32 to vector<8x20xf32>
    %368 = arith.maximumf %366, %367 : vector<8x20xf32>
    %369 = vector.extract_strided_slice %368 {offsets = [0, 0], sizes = [7, 20], strides = [1, 1]} : vector<8x20xf32> to vector<7x20xf32>
    %370 = vector.extract_strided_slice %368 {offsets = [1, 0], sizes = [7, 20], strides = [1, 1]} : vector<8x20xf32> to vector<7x20xf32>
    %371 = arith.maximumf %369, %370 : vector<7x20xf32>
    %372 = tpu.iota {dimensions = array<i32: 0>} : vector<6x7xi32>
    %373 = tpu.iota {dimensions = array<i32: 1>} : vector<6x7xi32>
    %c2_i32_63 = arith.constant 2 : i32
    %374 = vector.broadcast %c2_i32_63 : i32 to vector<6x7xi32>
    %375 = arith.muli %374, %372 : vector<6x7xi32>
    %c2_i32_64 = arith.constant 2 : i32
    %376 = vector.broadcast %c2_i32_64 : i32 to vector<6x7xi32>
    %377 = arith.subi %375, %376 : vector<6x7xi32>
    %378 = arith.cmpi eq, %373, %377 : vector<6x7xi32>
    %379 = arith.extui %378 : vector<6x7xi1> to vector<6x7xi32>
    %380 = arith.sitofp %379 : vector<6x7xi32> to vector<6x7xf32>
    %cst_65 = arith.constant dense<0.000000e+00> : vector<6x20xf32>
    %381 = tpu.matmul %380, %371, %cst_65 {dimension_numbers = #tpu.dot_dimension_numbers<[1], [0], [0], [1], [0, 0, 1, 1], [], []>} : vector<6x7xf32>, vector<7x20xf32>, vector<6x20xf32> -> vector<6x20xf32>
    %382 = vector.extract_strided_slice %381 {offsets = [0, 0], sizes = [6, 19], strides = [1, 1]} : vector<6x20xf32> to vector<6x19xf32>
    %383 = vector.extract_strided_slice %381 {offsets = [0, 1], sizes = [6, 19], strides = [1, 1]} : vector<6x20xf32> to vector<6x19xf32>
    %384 = arith.maximumf %382, %383 : vector<6x19xf32>
    %385 = tpu.iota {dimensions = array<i32: 0>} : vector<19x12xi32>
    %386 = tpu.iota {dimensions = array<i32: 1>} : vector<19x12xi32>
    %c0_i32_66 = arith.constant 0 : i32
    %387 = vector.broadcast %c0_i32_66 : i32 to vector<19x12xi32>
    %388 = arith.subi %386, %387 : vector<19x12xi32>
    %c1_i32_67 = arith.constant 1 : i32
    %389 = vector.broadcast %c1_i32_67 : i32 to vector<19x12xi32>
    %390 = arith.cmpi sge, %388, %389 : vector<19x12xi32>
    %c4_i32 = arith.constant 4 : i32
    %391 = vector.broadcast %c4_i32 : i32 to vector<19x12xi32>
    %392 = arith.cmpi sle, %388, %391 : vector<19x12xi32>
    %393 = arith.andi %390, %392 : vector<19x12xi1>
    %c2_i32_68 = arith.constant 2 : i32
    %394 = vector.broadcast %c2_i32_68 : i32 to vector<19x12xi32>
    %395 = arith.muli %394, %388 : vector<19x12xi32>
    %c0_i32_69 = arith.constant 0 : i32
    %396 = vector.broadcast %c0_i32_69 : i32 to vector<19x12xi32>
    %397 = arith.addi %396, %395 : vector<19x12xi32>
    %c1_i32_70 = arith.constant 1 : i32
    %398 = vector.broadcast %c1_i32_70 : i32 to vector<19x12xi32>
    %399 = arith.subi %397, %398 : vector<19x12xi32>
    %400 = arith.cmpi eq, %385, %399 : vector<19x12xi32>
    %401 = arith.andi %393, %400 : vector<19x12xi1>
    %c6_i32 = arith.constant 6 : i32
    %402 = vector.broadcast %c6_i32 : i32 to vector<19x12xi32>
    %403 = arith.subi %386, %402 : vector<19x12xi32>
    %c1_i32_71 = arith.constant 1 : i32
    %404 = vector.broadcast %c1_i32_71 : i32 to vector<19x12xi32>
    %405 = arith.cmpi sge, %403, %404 : vector<19x12xi32>
    %c4_i32_72 = arith.constant 4 : i32
    %406 = vector.broadcast %c4_i32_72 : i32 to vector<19x12xi32>
    %407 = arith.cmpi sle, %403, %406 : vector<19x12xi32>
    %408 = arith.andi %405, %407 : vector<19x12xi1>
    %c2_i32_73 = arith.constant 2 : i32
    %409 = vector.broadcast %c2_i32_73 : i32 to vector<19x12xi32>
    %410 = arith.muli %409, %403 : vector<19x12xi32>
    %c10_i32_74 = arith.constant 10 : i32
    %411 = vector.broadcast %c10_i32_74 : i32 to vector<19x12xi32>
    %412 = arith.addi %411, %410 : vector<19x12xi32>
    %c1_i32_75 = arith.constant 1 : i32
    %413 = vector.broadcast %c1_i32_75 : i32 to vector<19x12xi32>
    %414 = arith.subi %412, %413 : vector<19x12xi32>
    %415 = arith.cmpi eq, %385, %414 : vector<19x12xi32>
    %416 = arith.andi %408, %415 : vector<19x12xi1>
    %417 = arith.ori %401, %416 : vector<19x12xi1>
    %418 = arith.extui %417 : vector<19x12xi1> to vector<19x12xi32>
    %419 = arith.sitofp %418 : vector<19x12xi32> to vector<19x12xf32>
    %cst_76 = arith.constant dense<0.000000e+00> : vector<6x12xf32>
    %420 = tpu.matmul %384, %419, %cst_76 {dimension_numbers = #tpu.dot_dimension_numbers<[1], [0], [0], [1], [0, 0, 1, 1], [], []>} : vector<6x19xf32>, vector<19x12xf32>, vector<6x12xf32> -> vector<6x12xf32>
    %421 = tpu.iota {dimensions = array<i32: 0>} : vector<12x12xi32>
    %422 = tpu.iota {dimensions = array<i32: 1>} : vector<12x12xi32>
    %c1_i32_77 = arith.constant 1 : i32
    %423 = vector.broadcast %c1_i32_77 : i32 to vector<12x12xi32>
    %424 = arith.subi %422, %423 : vector<12x12xi32>
    %425 = arith.cmpi eq, %421, %424 : vector<12x12xi32>
    %426 = tpu.iota {dimensions = array<i32: 1>} : vector<1x12xi32>
    %c0_i32_78 = arith.constant 0 : i32
    %427 = vector.broadcast %c0_i32_78 : i32 to vector<1x12xi32>
    %428 = arith.subi %426, %427 : vector<1x12xi32>
    %c1_i32_79 = arith.constant 1 : i32
    %429 = vector.broadcast %c1_i32_79 : i32 to vector<1x12xi32>
    %430 = arith.cmpi sge, %428, %429 : vector<1x12xi32>
    %c4_i32_80 = arith.constant 4 : i32
    %431 = vector.broadcast %c4_i32_80 : i32 to vector<1x12xi32>
    %432 = arith.cmpi sle, %428, %431 : vector<1x12xi32>
    %433 = arith.andi %430, %432 : vector<1x12xi1>
    %c6_i32_81 = arith.constant 6 : i32
    %434 = vector.broadcast %c6_i32_81 : i32 to vector<1x12xi32>
    %435 = arith.subi %426, %434 : vector<1x12xi32>
    %c1_i32_82 = arith.constant 1 : i32
    %436 = vector.broadcast %c1_i32_82 : i32 to vector<1x12xi32>
    %437 = arith.cmpi sge, %435, %436 : vector<1x12xi32>
    %c4_i32_83 = arith.constant 4 : i32
    %438 = vector.broadcast %c4_i32_83 : i32 to vector<1x12xi32>
    %439 = arith.cmpi sle, %435, %438 : vector<1x12xi32>
    %440 = arith.andi %437, %439 : vector<1x12xi1>
    %441 = arith.ori %433, %440 : vector<1x12xi1>
    %442 = vector.broadcast %441 : vector<1x12xi1> to vector<12x12xi1>
    %443 = arith.andi %425, %442 : vector<12x12xi1>
    %444 = arith.extui %443 : vector<12x12xi1> to vector<12x12xi32>
    %445 = arith.sitofp %444 : vector<12x12xi32> to vector<12x12xf32>
    %cst_84 = arith.constant dense<0.000000e+00> : vector<6x12xf32>
    %446 = tpu.matmul %420, %445, %cst_84 {dimension_numbers = #tpu.dot_dimension_numbers<[1], [0], [0], [1], [0, 0, 1, 1], [], []>} : vector<6x12xf32>, vector<12x12xf32>, vector<6x12xf32> -> vector<6x12xf32>
    %447 = tpu.iota {dimensions = array<i32: 0>} : vector<12x12xi32>
    %448 = tpu.iota {dimensions = array<i32: 1>} : vector<12x12xi32>
    %c1_i32_85 = arith.constant 1 : i32
    %449 = vector.broadcast %c1_i32_85 : i32 to vector<12x12xi32>
    %450 = arith.addi %448, %449 : vector<12x12xi32>
    %451 = arith.cmpi eq, %447, %450 : vector<12x12xi32>
    %452 = vector.broadcast %441 : vector<1x12xi1> to vector<12x12xi1>
    %453 = arith.andi %451, %452 : vector<12x12xi1>
    %454 = arith.extui %453 : vector<12x12xi1> to vector<12x12xi32>
    %455 = arith.sitofp %454 : vector<12x12xi32> to vector<12x12xf32>
    %cst_86 = arith.constant dense<0.000000e+00> : vector<6x12xf32>
    %456 = tpu.matmul %420, %455, %cst_86 {dimension_numbers = #tpu.dot_dimension_numbers<[1], [0], [0], [1], [0, 0, 1, 1], [], []>} : vector<6x12xf32>, vector<12x12xf32>, vector<6x12xf32> -> vector<6x12xf32>
    %c27 = arith.constant 27 : index
    %457 = memref.load %arg0[%c27] : memref<117xf32, #tpu.memory_space<smem>>
    %458 = vector.extract_strided_slice %446 {offsets = [0, 0], sizes = [4, 12], strides = [1, 1]} : vector<6x12xf32> to vector<4x12xf32>
    %459 = vector.broadcast %457 : f32 to vector<4x12xf32>
    %460 = arith.mulf %459, %458 : vector<4x12xf32>
    %c28 = arith.constant 28 : index
    %461 = memref.load %arg0[%c28] : memref<117xf32, #tpu.memory_space<smem>>
    %462 = vector.extract_strided_slice %420 {offsets = [0, 0], sizes = [4, 12], strides = [1, 1]} : vector<6x12xf32> to vector<4x12xf32>
    %463 = vector.broadcast %461 : f32 to vector<4x12xf32>
    %464 = arith.mulf %463, %462 : vector<4x12xf32>
    %c29 = arith.constant 29 : index
    %465 = memref.load %arg0[%c29] : memref<117xf32, #tpu.memory_space<smem>>
    %466 = vector.extract_strided_slice %456 {offsets = [0, 0], sizes = [4, 12], strides = [1, 1]} : vector<6x12xf32> to vector<4x12xf32>
    %467 = vector.broadcast %465 : f32 to vector<4x12xf32>
    %468 = arith.mulf %467, %466 : vector<4x12xf32>
    %469 = arith.addf %460, %464 : vector<4x12xf32>
    %470 = arith.addf %469, %468 : vector<4x12xf32>
    %c30 = arith.constant 30 : index
    %471 = memref.load %arg0[%c30] : memref<117xf32, #tpu.memory_space<smem>>
    %472 = vector.extract_strided_slice %446 {offsets = [1, 0], sizes = [4, 12], strides = [1, 1]} : vector<6x12xf32> to vector<4x12xf32>
    %473 = vector.broadcast %471 : f32 to vector<4x12xf32>
    %474 = arith.mulf %473, %472 : vector<4x12xf32>
    %c31 = arith.constant 31 : index
    %475 = memref.load %arg0[%c31] : memref<117xf32, #tpu.memory_space<smem>>
    %476 = vector.extract_strided_slice %420 {offsets = [1, 0], sizes = [4, 12], strides = [1, 1]} : vector<6x12xf32> to vector<4x12xf32>
    %477 = vector.broadcast %475 : f32 to vector<4x12xf32>
    %478 = arith.mulf %477, %476 : vector<4x12xf32>
    %c32 = arith.constant 32 : index
    %479 = memref.load %arg0[%c32] : memref<117xf32, #tpu.memory_space<smem>>
    %480 = vector.extract_strided_slice %456 {offsets = [1, 0], sizes = [4, 12], strides = [1, 1]} : vector<6x12xf32> to vector<4x12xf32>
    %481 = vector.broadcast %479 : f32 to vector<4x12xf32>
    %482 = arith.mulf %481, %480 : vector<4x12xf32>
    %483 = arith.addf %474, %478 : vector<4x12xf32>
    %484 = arith.addf %483, %482 : vector<4x12xf32>
    %c33 = arith.constant 33 : index
    %485 = memref.load %arg0[%c33] : memref<117xf32, #tpu.memory_space<smem>>
    %486 = vector.extract_strided_slice %446 {offsets = [2, 0], sizes = [4, 12], strides = [1, 1]} : vector<6x12xf32> to vector<4x12xf32>
    %487 = vector.broadcast %485 : f32 to vector<4x12xf32>
    %488 = arith.mulf %487, %486 : vector<4x12xf32>
    %c34 = arith.constant 34 : index
    %489 = memref.load %arg0[%c34] : memref<117xf32, #tpu.memory_space<smem>>
    %490 = vector.extract_strided_slice %420 {offsets = [2, 0], sizes = [4, 12], strides = [1, 1]} : vector<6x12xf32> to vector<4x12xf32>
    %491 = vector.broadcast %489 : f32 to vector<4x12xf32>
    %492 = arith.mulf %491, %490 : vector<4x12xf32>
    %c35 = arith.constant 35 : index
    %493 = memref.load %arg0[%c35] : memref<117xf32, #tpu.memory_space<smem>>
    %494 = vector.extract_strided_slice %456 {offsets = [2, 0], sizes = [4, 12], strides = [1, 1]} : vector<6x12xf32> to vector<4x12xf32>
    %495 = vector.broadcast %493 : f32 to vector<4x12xf32>
    %496 = arith.mulf %495, %494 : vector<4x12xf32>
    %497 = arith.addf %488, %492 : vector<4x12xf32>
    %498 = arith.addf %497, %496 : vector<4x12xf32>
    %499 = arith.addf %470, %484 : vector<4x12xf32>
    %500 = arith.addf %499, %498 : vector<4x12xf32>
    %c6_87 = arith.constant 6 : index
    %501 = memref.load %arg1[%c6_87] : memref<26xf32, #tpu.memory_space<smem>>
    %502 = vector.broadcast %501 : f32 to vector<4x12xf32>
    %503 = arith.mulf %500, %502 : vector<4x12xf32>
    %c7_88 = arith.constant 7 : index
    %504 = memref.load %arg1[%c7_88] : memref<26xf32, #tpu.memory_space<smem>>
    %505 = vector.broadcast %504 : f32 to vector<4x12xf32>
    %506 = arith.addf %503, %505 : vector<4x12xf32>
    %cst_89 = arith.constant 0.000000e+00 : f32
    %507 = vector.broadcast %cst_89 : f32 to vector<4x12xf32>
    %508 = arith.maximumf %506, %507 : vector<4x12xf32>
    %509 = vector.extract_strided_slice %508 {offsets = [0, 0], sizes = [3, 12], strides = [1, 1]} : vector<4x12xf32> to vector<3x12xf32>
    %510 = vector.extract_strided_slice %508 {offsets = [1, 0], sizes = [3, 12], strides = [1, 1]} : vector<4x12xf32> to vector<3x12xf32>
    %511 = arith.maximumf %509, %510 : vector<3x12xf32>
    %512 = tpu.iota {dimensions = array<i32: 0>} : vector<4x3xi32>
    %513 = tpu.iota {dimensions = array<i32: 1>} : vector<4x3xi32>
    %c2_i32_90 = arith.constant 2 : i32
    %514 = vector.broadcast %c2_i32_90 : i32 to vector<4x3xi32>
    %515 = arith.muli %514, %512 : vector<4x3xi32>
    %c2_i32_91 = arith.constant 2 : i32
    %516 = vector.broadcast %c2_i32_91 : i32 to vector<4x3xi32>
    %517 = arith.subi %515, %516 : vector<4x3xi32>
    %518 = arith.cmpi eq, %513, %517 : vector<4x3xi32>
    %519 = arith.extui %518 : vector<4x3xi1> to vector<4x3xi32>
    %520 = arith.sitofp %519 : vector<4x3xi32> to vector<4x3xf32>
    %cst_92 = arith.constant dense<0.000000e+00> : vector<4x12xf32>
    %521 = tpu.matmul %520, %511, %cst_92 {dimension_numbers = #tpu.dot_dimension_numbers<[1], [0], [0], [1], [0, 0, 1, 1], [], []>} : vector<4x3xf32>, vector<3x12xf32>, vector<4x12xf32> -> vector<4x12xf32>
    %522 = vector.extract_strided_slice %521 {offsets = [0, 0], sizes = [4, 11], strides = [1, 1]} : vector<4x12xf32> to vector<4x11xf32>
    %523 = vector.extract_strided_slice %521 {offsets = [0, 1], sizes = [4, 11], strides = [1, 1]} : vector<4x12xf32> to vector<4x11xf32>
    %524 = arith.maximumf %522, %523 : vector<4x11xf32>
    %525 = tpu.iota {dimensions = array<i32: 0>} : vector<11x8xi32>
    %526 = tpu.iota {dimensions = array<i32: 1>} : vector<11x8xi32>
    %c0_i32_93 = arith.constant 0 : i32
    %527 = vector.broadcast %c0_i32_93 : i32 to vector<11x8xi32>
    %528 = arith.subi %526, %527 : vector<11x8xi32>
    %c1_i32_94 = arith.constant 1 : i32
    %529 = vector.broadcast %c1_i32_94 : i32 to vector<11x8xi32>
    %530 = arith.cmpi sge, %528, %529 : vector<11x8xi32>
    %c2_i32_95 = arith.constant 2 : i32
    %531 = vector.broadcast %c2_i32_95 : i32 to vector<11x8xi32>
    %532 = arith.cmpi sle, %528, %531 : vector<11x8xi32>
    %533 = arith.andi %530, %532 : vector<11x8xi1>
    %c2_i32_96 = arith.constant 2 : i32
    %534 = vector.broadcast %c2_i32_96 : i32 to vector<11x8xi32>
    %535 = arith.muli %534, %528 : vector<11x8xi32>
    %c0_i32_97 = arith.constant 0 : i32
    %536 = vector.broadcast %c0_i32_97 : i32 to vector<11x8xi32>
    %537 = arith.addi %536, %535 : vector<11x8xi32>
    %c1_i32_98 = arith.constant 1 : i32
    %538 = vector.broadcast %c1_i32_98 : i32 to vector<11x8xi32>
    %539 = arith.subi %537, %538 : vector<11x8xi32>
    %540 = arith.cmpi eq, %525, %539 : vector<11x8xi32>
    %541 = arith.andi %533, %540 : vector<11x8xi1>
    %c4_i32_99 = arith.constant 4 : i32
    %542 = vector.broadcast %c4_i32_99 : i32 to vector<11x8xi32>
    %543 = arith.subi %526, %542 : vector<11x8xi32>
    %c1_i32_100 = arith.constant 1 : i32
    %544 = vector.broadcast %c1_i32_100 : i32 to vector<11x8xi32>
    %545 = arith.cmpi sge, %543, %544 : vector<11x8xi32>
    %c2_i32_101 = arith.constant 2 : i32
    %546 = vector.broadcast %c2_i32_101 : i32 to vector<11x8xi32>
    %547 = arith.cmpi sle, %543, %546 : vector<11x8xi32>
    %548 = arith.andi %545, %547 : vector<11x8xi1>
    %c2_i32_102 = arith.constant 2 : i32
    %549 = vector.broadcast %c2_i32_102 : i32 to vector<11x8xi32>
    %550 = arith.muli %549, %543 : vector<11x8xi32>
    %c6_i32_103 = arith.constant 6 : i32
    %551 = vector.broadcast %c6_i32_103 : i32 to vector<11x8xi32>
    %552 = arith.addi %551, %550 : vector<11x8xi32>
    %c1_i32_104 = arith.constant 1 : i32
    %553 = vector.broadcast %c1_i32_104 : i32 to vector<11x8xi32>
    %554 = arith.subi %552, %553 : vector<11x8xi32>
    %555 = arith.cmpi eq, %525, %554 : vector<11x8xi32>
    %556 = arith.andi %548, %555 : vector<11x8xi1>
    %557 = arith.ori %541, %556 : vector<11x8xi1>
    %558 = arith.extui %557 : vector<11x8xi1> to vector<11x8xi32>
    %559 = arith.sitofp %558 : vector<11x8xi32> to vector<11x8xf32>
    %cst_105 = arith.constant dense<0.000000e+00> : vector<4x8xf32>
    %560 = tpu.matmul %524, %559, %cst_105 {dimension_numbers = #tpu.dot_dimension_numbers<[1], [0], [0], [1], [0, 0, 1, 1], [], []>} : vector<4x11xf32>, vector<11x8xf32>, vector<4x8xf32> -> vector<4x8xf32>
    %561 = tpu.iota {dimensions = array<i32: 0>} : vector<8x8xi32>
    %562 = tpu.iota {dimensions = array<i32: 1>} : vector<8x8xi32>
    %c1_i32_106 = arith.constant 1 : i32
    %563 = vector.broadcast %c1_i32_106 : i32 to vector<8x8xi32>
    %564 = arith.subi %562, %563 : vector<8x8xi32>
    %565 = arith.cmpi eq, %561, %564 : vector<8x8xi32>
    %566 = tpu.iota {dimensions = array<i32: 1>} : vector<1x8xi32>
    %c0_i32_107 = arith.constant 0 : i32
    %567 = vector.broadcast %c0_i32_107 : i32 to vector<1x8xi32>
    %568 = arith.subi %566, %567 : vector<1x8xi32>
    %c1_i32_108 = arith.constant 1 : i32
    %569 = vector.broadcast %c1_i32_108 : i32 to vector<1x8xi32>
    %570 = arith.cmpi sge, %568, %569 : vector<1x8xi32>
    %c2_i32_109 = arith.constant 2 : i32
    %571 = vector.broadcast %c2_i32_109 : i32 to vector<1x8xi32>
    %572 = arith.cmpi sle, %568, %571 : vector<1x8xi32>
    %573 = arith.andi %570, %572 : vector<1x8xi1>
    %c4_i32_110 = arith.constant 4 : i32
    %574 = vector.broadcast %c4_i32_110 : i32 to vector<1x8xi32>
    %575 = arith.subi %566, %574 : vector<1x8xi32>
    %c1_i32_111 = arith.constant 1 : i32
    %576 = vector.broadcast %c1_i32_111 : i32 to vector<1x8xi32>
    %577 = arith.cmpi sge, %575, %576 : vector<1x8xi32>
    %c2_i32_112 = arith.constant 2 : i32
    %578 = vector.broadcast %c2_i32_112 : i32 to vector<1x8xi32>
    %579 = arith.cmpi sle, %575, %578 : vector<1x8xi32>
    %580 = arith.andi %577, %579 : vector<1x8xi1>
    %581 = arith.ori %573, %580 : vector<1x8xi1>
    %582 = vector.broadcast %581 : vector<1x8xi1> to vector<8x8xi1>
    %583 = arith.andi %565, %582 : vector<8x8xi1>
    %584 = arith.extui %583 : vector<8x8xi1> to vector<8x8xi32>
    %585 = arith.sitofp %584 : vector<8x8xi32> to vector<8x8xf32>
    %cst_113 = arith.constant dense<0.000000e+00> : vector<4x8xf32>
    %586 = tpu.matmul %560, %585, %cst_113 {dimension_numbers = #tpu.dot_dimension_numbers<[1], [0], [0], [1], [0, 0, 1, 1], [], []>} : vector<4x8xf32>, vector<8x8xf32>, vector<4x8xf32> -> vector<4x8xf32>
    %587 = tpu.iota {dimensions = array<i32: 0>} : vector<8x8xi32>
    %588 = tpu.iota {dimensions = array<i32: 1>} : vector<8x8xi32>
    %c1_i32_114 = arith.constant 1 : i32
    %589 = vector.broadcast %c1_i32_114 : i32 to vector<8x8xi32>
    %590 = arith.addi %588, %589 : vector<8x8xi32>
    %591 = arith.cmpi eq, %587, %590 : vector<8x8xi32>
    %592 = vector.broadcast %581 : vector<1x8xi1> to vector<8x8xi1>
    %593 = arith.andi %591, %592 : vector<8x8xi1>
    %594 = arith.extui %593 : vector<8x8xi1> to vector<8x8xi32>
    %595 = arith.sitofp %594 : vector<8x8xi32> to vector<8x8xf32>
    %cst_115 = arith.constant dense<0.000000e+00> : vector<4x8xf32>
    %596 = tpu.matmul %560, %595, %cst_115 {dimension_numbers = #tpu.dot_dimension_numbers<[1], [0], [0], [1], [0, 0, 1, 1], [], []>} : vector<4x8xf32>, vector<8x8xf32>, vector<4x8xf32> -> vector<4x8xf32>
    %c36 = arith.constant 36 : index
    %597 = memref.load %arg0[%c36] : memref<117xf32, #tpu.memory_space<smem>>
    %598 = vector.extract_strided_slice %586 {offsets = [0, 0], sizes = [2, 8], strides = [1, 1]} : vector<4x8xf32> to vector<2x8xf32>
    %599 = vector.broadcast %597 : f32 to vector<2x8xf32>
    %600 = arith.mulf %599, %598 : vector<2x8xf32>
    %c37 = arith.constant 37 : index
    %601 = memref.load %arg0[%c37] : memref<117xf32, #tpu.memory_space<smem>>
    %602 = vector.extract_strided_slice %560 {offsets = [0, 0], sizes = [2, 8], strides = [1, 1]} : vector<4x8xf32> to vector<2x8xf32>
    %603 = vector.broadcast %601 : f32 to vector<2x8xf32>
    %604 = arith.mulf %603, %602 : vector<2x8xf32>
    %c38 = arith.constant 38 : index
    %605 = memref.load %arg0[%c38] : memref<117xf32, #tpu.memory_space<smem>>
    %606 = vector.extract_strided_slice %596 {offsets = [0, 0], sizes = [2, 8], strides = [1, 1]} : vector<4x8xf32> to vector<2x8xf32>
    %607 = vector.broadcast %605 : f32 to vector<2x8xf32>
    %608 = arith.mulf %607, %606 : vector<2x8xf32>
    %609 = arith.addf %600, %604 : vector<2x8xf32>
    %610 = arith.addf %609, %608 : vector<2x8xf32>
    %c39 = arith.constant 39 : index
    %611 = memref.load %arg0[%c39] : memref<117xf32, #tpu.memory_space<smem>>
    %612 = vector.extract_strided_slice %586 {offsets = [1, 0], sizes = [2, 8], strides = [1, 1]} : vector<4x8xf32> to vector<2x8xf32>
    %613 = vector.broadcast %611 : f32 to vector<2x8xf32>
    %614 = arith.mulf %613, %612 : vector<2x8xf32>
    %c40 = arith.constant 40 : index
    %615 = memref.load %arg0[%c40] : memref<117xf32, #tpu.memory_space<smem>>
    %616 = vector.extract_strided_slice %560 {offsets = [1, 0], sizes = [2, 8], strides = [1, 1]} : vector<4x8xf32> to vector<2x8xf32>
    %617 = vector.broadcast %615 : f32 to vector<2x8xf32>
    %618 = arith.mulf %617, %616 : vector<2x8xf32>
    %c41 = arith.constant 41 : index
    %619 = memref.load %arg0[%c41] : memref<117xf32, #tpu.memory_space<smem>>
    %620 = vector.extract_strided_slice %596 {offsets = [1, 0], sizes = [2, 8], strides = [1, 1]} : vector<4x8xf32> to vector<2x8xf32>
    %621 = vector.broadcast %619 : f32 to vector<2x8xf32>
    %622 = arith.mulf %621, %620 : vector<2x8xf32>
    %623 = arith.addf %614, %618 : vector<2x8xf32>
    %624 = arith.addf %623, %622 : vector<2x8xf32>
    %c42 = arith.constant 42 : index
    %625 = memref.load %arg0[%c42] : memref<117xf32, #tpu.memory_space<smem>>
    %626 = vector.extract_strided_slice %586 {offsets = [2, 0], sizes = [2, 8], strides = [1, 1]} : vector<4x8xf32> to vector<2x8xf32>
    %627 = vector.broadcast %625 : f32 to vector<2x8xf32>
    %628 = arith.mulf %627, %626 : vector<2x8xf32>
    %c43 = arith.constant 43 : index
    %629 = memref.load %arg0[%c43] : memref<117xf32, #tpu.memory_space<smem>>
    %630 = vector.extract_strided_slice %560 {offsets = [2, 0], sizes = [2, 8], strides = [1, 1]} : vector<4x8xf32> to vector<2x8xf32>
    %631 = vector.broadcast %629 : f32 to vector<2x8xf32>
    %632 = arith.mulf %631, %630 : vector<2x8xf32>
    %c44 = arith.constant 44 : index
    %633 = memref.load %arg0[%c44] : memref<117xf32, #tpu.memory_space<smem>>
    %634 = vector.extract_strided_slice %596 {offsets = [2, 0], sizes = [2, 8], strides = [1, 1]} : vector<4x8xf32> to vector<2x8xf32>
    %635 = vector.broadcast %633 : f32 to vector<2x8xf32>
    %636 = arith.mulf %635, %634 : vector<2x8xf32>
    %637 = arith.addf %628, %632 : vector<2x8xf32>
    %638 = arith.addf %637, %636 : vector<2x8xf32>
    %639 = arith.addf %610, %624 : vector<2x8xf32>
    %640 = arith.addf %639, %638 : vector<2x8xf32>
    %c8_116 = arith.constant 8 : index
    %641 = memref.load %arg1[%c8_116] : memref<26xf32, #tpu.memory_space<smem>>
    %642 = vector.broadcast %641 : f32 to vector<2x8xf32>
    %643 = arith.mulf %640, %642 : vector<2x8xf32>
    %c9_117 = arith.constant 9 : index
    %644 = memref.load %arg1[%c9_117] : memref<26xf32, #tpu.memory_space<smem>>
    %645 = vector.broadcast %644 : f32 to vector<2x8xf32>
    %646 = arith.addf %643, %645 : vector<2x8xf32>
    %cst_118 = arith.constant 0.000000e+00 : f32
    %647 = vector.broadcast %cst_118 : f32 to vector<2x8xf32>
    %648 = arith.maximumf %646, %647 : vector<2x8xf32>
    %649 = vector.extract_strided_slice %648 {offsets = [0, 0], sizes = [1, 8], strides = [1, 1]} : vector<2x8xf32> to vector<1x8xf32>
    %650 = vector.extract_strided_slice %648 {offsets = [1, 0], sizes = [1, 8], strides = [1, 1]} : vector<2x8xf32> to vector<1x8xf32>
    %651 = arith.maximumf %649, %650 : vector<1x8xf32>
    %652 = tpu.iota {dimensions = array<i32: 0>} : vector<3x1xi32>
    %653 = tpu.iota {dimensions = array<i32: 1>} : vector<3x1xi32>
    %c2_i32_119 = arith.constant 2 : i32
    %654 = vector.broadcast %c2_i32_119 : i32 to vector<3x1xi32>
    %655 = arith.muli %654, %652 : vector<3x1xi32>
    %c2_i32_120 = arith.constant 2 : i32
    %656 = vector.broadcast %c2_i32_120 : i32 to vector<3x1xi32>
    %657 = arith.subi %655, %656 : vector<3x1xi32>
    %658 = arith.cmpi eq, %653, %657 : vector<3x1xi32>
    %659 = arith.extui %658 : vector<3x1xi1> to vector<3x1xi32>
    %660 = arith.sitofp %659 : vector<3x1xi32> to vector<3x1xf32>
    %cst_121 = arith.constant dense<0.000000e+00> : vector<3x8xf32>
    %661 = tpu.matmul %660, %651, %cst_121 {dimension_numbers = #tpu.dot_dimension_numbers<[1], [0], [0], [1], [0, 0, 1, 1], [], []>} : vector<3x1xf32>, vector<1x8xf32>, vector<3x8xf32> -> vector<3x8xf32>
    %662 = vector.extract_strided_slice %661 {offsets = [0, 0], sizes = [3, 7], strides = [1, 1]} : vector<3x8xf32> to vector<3x7xf32>
    %663 = vector.extract_strided_slice %661 {offsets = [0, 1], sizes = [3, 7], strides = [1, 1]} : vector<3x8xf32> to vector<3x7xf32>
    %664 = arith.maximumf %662, %663 : vector<3x7xf32>
    %665 = tpu.iota {dimensions = array<i32: 0>} : vector<7x6xi32>
    %666 = tpu.iota {dimensions = array<i32: 1>} : vector<7x6xi32>
    %c0_i32_122 = arith.constant 0 : i32
    %667 = vector.broadcast %c0_i32_122 : i32 to vector<7x6xi32>
    %668 = arith.subi %666, %667 : vector<7x6xi32>
    %c1_i32_123 = arith.constant 1 : i32
    %669 = vector.broadcast %c1_i32_123 : i32 to vector<7x6xi32>
    %670 = arith.cmpi sge, %668, %669 : vector<7x6xi32>
    %c1_i32_124 = arith.constant 1 : i32
    %671 = vector.broadcast %c1_i32_124 : i32 to vector<7x6xi32>
    %672 = arith.cmpi sle, %668, %671 : vector<7x6xi32>
    %673 = arith.andi %670, %672 : vector<7x6xi1>
    %c2_i32_125 = arith.constant 2 : i32
    %674 = vector.broadcast %c2_i32_125 : i32 to vector<7x6xi32>
    %675 = arith.muli %674, %668 : vector<7x6xi32>
    %c0_i32_126 = arith.constant 0 : i32
    %676 = vector.broadcast %c0_i32_126 : i32 to vector<7x6xi32>
    %677 = arith.addi %676, %675 : vector<7x6xi32>
    %c1_i32_127 = arith.constant 1 : i32
    %678 = vector.broadcast %c1_i32_127 : i32 to vector<7x6xi32>
    %679 = arith.subi %677, %678 : vector<7x6xi32>
    %680 = arith.cmpi eq, %665, %679 : vector<7x6xi32>
    %681 = arith.andi %673, %680 : vector<7x6xi1>
    %c3_i32 = arith.constant 3 : i32
    %682 = vector.broadcast %c3_i32 : i32 to vector<7x6xi32>
    %683 = arith.subi %666, %682 : vector<7x6xi32>
    %c1_i32_128 = arith.constant 1 : i32
    %684 = vector.broadcast %c1_i32_128 : i32 to vector<7x6xi32>
    %685 = arith.cmpi sge, %683, %684 : vector<7x6xi32>
    %c1_i32_129 = arith.constant 1 : i32
    %686 = vector.broadcast %c1_i32_129 : i32 to vector<7x6xi32>
    %687 = arith.cmpi sle, %683, %686 : vector<7x6xi32>
    %688 = arith.andi %685, %687 : vector<7x6xi1>
    %c2_i32_130 = arith.constant 2 : i32
    %689 = vector.broadcast %c2_i32_130 : i32 to vector<7x6xi32>
    %690 = arith.muli %689, %683 : vector<7x6xi32>
    %c4_i32_131 = arith.constant 4 : i32
    %691 = vector.broadcast %c4_i32_131 : i32 to vector<7x6xi32>
    %692 = arith.addi %691, %690 : vector<7x6xi32>
    %c1_i32_132 = arith.constant 1 : i32
    %693 = vector.broadcast %c1_i32_132 : i32 to vector<7x6xi32>
    %694 = arith.subi %692, %693 : vector<7x6xi32>
    %695 = arith.cmpi eq, %665, %694 : vector<7x6xi32>
    %696 = arith.andi %688, %695 : vector<7x6xi1>
    %697 = arith.ori %681, %696 : vector<7x6xi1>
    %698 = arith.extui %697 : vector<7x6xi1> to vector<7x6xi32>
    %699 = arith.sitofp %698 : vector<7x6xi32> to vector<7x6xf32>
    %cst_133 = arith.constant dense<0.000000e+00> : vector<3x6xf32>
    %700 = tpu.matmul %664, %699, %cst_133 {dimension_numbers = #tpu.dot_dimension_numbers<[1], [0], [0], [1], [0, 0, 1, 1], [], []>} : vector<3x7xf32>, vector<7x6xf32>, vector<3x6xf32> -> vector<3x6xf32>
    %701 = tpu.iota {dimensions = array<i32: 0>} : vector<6x6xi32>
    %702 = tpu.iota {dimensions = array<i32: 1>} : vector<6x6xi32>
    %c1_i32_134 = arith.constant 1 : i32
    %703 = vector.broadcast %c1_i32_134 : i32 to vector<6x6xi32>
    %704 = arith.subi %702, %703 : vector<6x6xi32>
    %705 = arith.cmpi eq, %701, %704 : vector<6x6xi32>
    %706 = tpu.iota {dimensions = array<i32: 1>} : vector<1x6xi32>
    %c0_i32_135 = arith.constant 0 : i32
    %707 = vector.broadcast %c0_i32_135 : i32 to vector<1x6xi32>
    %708 = arith.subi %706, %707 : vector<1x6xi32>
    %c1_i32_136 = arith.constant 1 : i32
    %709 = vector.broadcast %c1_i32_136 : i32 to vector<1x6xi32>
    %710 = arith.cmpi sge, %708, %709 : vector<1x6xi32>
    %c1_i32_137 = arith.constant 1 : i32
    %711 = vector.broadcast %c1_i32_137 : i32 to vector<1x6xi32>
    %712 = arith.cmpi sle, %708, %711 : vector<1x6xi32>
    %713 = arith.andi %710, %712 : vector<1x6xi1>
    %c3_i32_138 = arith.constant 3 : i32
    %714 = vector.broadcast %c3_i32_138 : i32 to vector<1x6xi32>
    %715 = arith.subi %706, %714 : vector<1x6xi32>
    %c1_i32_139 = arith.constant 1 : i32
    %716 = vector.broadcast %c1_i32_139 : i32 to vector<1x6xi32>
    %717 = arith.cmpi sge, %715, %716 : vector<1x6xi32>
    %c1_i32_140 = arith.constant 1 : i32
    %718 = vector.broadcast %c1_i32_140 : i32 to vector<1x6xi32>
    %719 = arith.cmpi sle, %715, %718 : vector<1x6xi32>
    %720 = arith.andi %717, %719 : vector<1x6xi1>
    %721 = arith.ori %713, %720 : vector<1x6xi1>
    %722 = vector.broadcast %721 : vector<1x6xi1> to vector<6x6xi1>
    %723 = arith.andi %705, %722 : vector<6x6xi1>
    %724 = arith.extui %723 : vector<6x6xi1> to vector<6x6xi32>
    %725 = arith.sitofp %724 : vector<6x6xi32> to vector<6x6xf32>
    %cst_141 = arith.constant dense<0.000000e+00> : vector<3x6xf32>
    %726 = tpu.matmul %700, %725, %cst_141 {dimension_numbers = #tpu.dot_dimension_numbers<[1], [0], [0], [1], [0, 0, 1, 1], [], []>} : vector<3x6xf32>, vector<6x6xf32>, vector<3x6xf32> -> vector<3x6xf32>
    %727 = tpu.iota {dimensions = array<i32: 0>} : vector<6x6xi32>
    %728 = tpu.iota {dimensions = array<i32: 1>} : vector<6x6xi32>
    %c1_i32_142 = arith.constant 1 : i32
    %729 = vector.broadcast %c1_i32_142 : i32 to vector<6x6xi32>
    %730 = arith.addi %728, %729 : vector<6x6xi32>
    %731 = arith.cmpi eq, %727, %730 : vector<6x6xi32>
    %732 = vector.broadcast %721 : vector<1x6xi1> to vector<6x6xi1>
    %733 = arith.andi %731, %732 : vector<6x6xi1>
    %734 = arith.extui %733 : vector<6x6xi1> to vector<6x6xi32>
    %735 = arith.sitofp %734 : vector<6x6xi32> to vector<6x6xf32>
    %cst_143 = arith.constant dense<0.000000e+00> : vector<3x6xf32>
    %736 = tpu.matmul %700, %735, %cst_143 {dimension_numbers = #tpu.dot_dimension_numbers<[1], [0], [0], [1], [0, 0, 1, 1], [], []>} : vector<3x6xf32>, vector<6x6xf32>, vector<3x6xf32> -> vector<3x6xf32>
    %c45 = arith.constant 45 : index
    %737 = memref.load %arg0[%c45] : memref<117xf32, #tpu.memory_space<smem>>
    %738 = vector.extract_strided_slice %726 {offsets = [0, 0], sizes = [1, 6], strides = [1, 1]} : vector<3x6xf32> to vector<1x6xf32>
    %739 = vector.broadcast %737 : f32 to vector<1x6xf32>
    %740 = arith.mulf %739, %738 : vector<1x6xf32>
    %c46 = arith.constant 46 : index
    %741 = memref.load %arg0[%c46] : memref<117xf32, #tpu.memory_space<smem>>
    %742 = vector.extract_strided_slice %700 {offsets = [0, 0], sizes = [1, 6], strides = [1, 1]} : vector<3x6xf32> to vector<1x6xf32>
    %743 = vector.broadcast %741 : f32 to vector<1x6xf32>
    %744 = arith.mulf %743, %742 : vector<1x6xf32>
    %c47 = arith.constant 47 : index
    %745 = memref.load %arg0[%c47] : memref<117xf32, #tpu.memory_space<smem>>
    %746 = vector.extract_strided_slice %736 {offsets = [0, 0], sizes = [1, 6], strides = [1, 1]} : vector<3x6xf32> to vector<1x6xf32>
    %747 = vector.broadcast %745 : f32 to vector<1x6xf32>
    %748 = arith.mulf %747, %746 : vector<1x6xf32>
    %749 = arith.addf %740, %744 : vector<1x6xf32>
    %750 = arith.addf %749, %748 : vector<1x6xf32>
    %c48 = arith.constant 48 : index
    %751 = memref.load %arg0[%c48] : memref<117xf32, #tpu.memory_space<smem>>
    %752 = vector.extract_strided_slice %726 {offsets = [1, 0], sizes = [1, 6], strides = [1, 1]} : vector<3x6xf32> to vector<1x6xf32>
    %753 = vector.broadcast %751 : f32 to vector<1x6xf32>
    %754 = arith.mulf %753, %752 : vector<1x6xf32>
    %c49 = arith.constant 49 : index
    %755 = memref.load %arg0[%c49] : memref<117xf32, #tpu.memory_space<smem>>
    %756 = vector.extract_strided_slice %700 {offsets = [1, 0], sizes = [1, 6], strides = [1, 1]} : vector<3x6xf32> to vector<1x6xf32>
    %757 = vector.broadcast %755 : f32 to vector<1x6xf32>
    %758 = arith.mulf %757, %756 : vector<1x6xf32>
    %c50 = arith.constant 50 : index
    %759 = memref.load %arg0[%c50] : memref<117xf32, #tpu.memory_space<smem>>
    %760 = vector.extract_strided_slice %736 {offsets = [1, 0], sizes = [1, 6], strides = [1, 1]} : vector<3x6xf32> to vector<1x6xf32>
    %761 = vector.broadcast %759 : f32 to vector<1x6xf32>
    %762 = arith.mulf %761, %760 : vector<1x6xf32>
    %763 = arith.addf %754, %758 : vector<1x6xf32>
    %764 = arith.addf %763, %762 : vector<1x6xf32>
    %c51 = arith.constant 51 : index
    %765 = memref.load %arg0[%c51] : memref<117xf32, #tpu.memory_space<smem>>
    %766 = vector.extract_strided_slice %726 {offsets = [2, 0], sizes = [1, 6], strides = [1, 1]} : vector<3x6xf32> to vector<1x6xf32>
    %767 = vector.broadcast %765 : f32 to vector<1x6xf32>
    %768 = arith.mulf %767, %766 : vector<1x6xf32>
    %c52 = arith.constant 52 : index
    %769 = memref.load %arg0[%c52] : memref<117xf32, #tpu.memory_space<smem>>
    %770 = vector.extract_strided_slice %700 {offsets = [2, 0], sizes = [1, 6], strides = [1, 1]} : vector<3x6xf32> to vector<1x6xf32>
    %771 = vector.broadcast %769 : f32 to vector<1x6xf32>
    %772 = arith.mulf %771, %770 : vector<1x6xf32>
    %c53 = arith.constant 53 : index
    %773 = memref.load %arg0[%c53] : memref<117xf32, #tpu.memory_space<smem>>
    %774 = vector.extract_strided_slice %736 {offsets = [2, 0], sizes = [1, 6], strides = [1, 1]} : vector<3x6xf32> to vector<1x6xf32>
    %775 = vector.broadcast %773 : f32 to vector<1x6xf32>
    %776 = arith.mulf %775, %774 : vector<1x6xf32>
    %777 = arith.addf %768, %772 : vector<1x6xf32>
    %778 = arith.addf %777, %776 : vector<1x6xf32>
    %779 = arith.addf %750, %764 : vector<1x6xf32>
    %780 = arith.addf %779, %778 : vector<1x6xf32>
    %c10_144 = arith.constant 10 : index
    %781 = memref.load %arg1[%c10_144] : memref<26xf32, #tpu.memory_space<smem>>
    %782 = vector.broadcast %781 : f32 to vector<1x6xf32>
    %783 = arith.mulf %780, %782 : vector<1x6xf32>
    %c11_145 = arith.constant 11 : index
    %784 = memref.load %arg1[%c11_145] : memref<26xf32, #tpu.memory_space<smem>>
    %785 = vector.broadcast %784 : f32 to vector<1x6xf32>
    %786 = arith.addf %783, %785 : vector<1x6xf32>
    %cst_146 = arith.constant 0.000000e+00 : f32
    %787 = vector.broadcast %cst_146 : f32 to vector<1x6xf32>
    %788 = arith.maximumf %786, %787 : vector<1x6xf32>
    %789 = tpu.iota {dimensions = array<i32: 0>} : vector<3x1xi32>
    %790 = tpu.iota {dimensions = array<i32: 1>} : vector<3x1xi32>
    %c1_i32_147 = arith.constant 1 : i32
    %791 = vector.broadcast %c1_i32_147 : i32 to vector<3x1xi32>
    %792 = arith.addi %790, %791 : vector<3x1xi32>
    %793 = arith.cmpi eq, %789, %792 : vector<3x1xi32>
    %794 = arith.extui %793 : vector<3x1xi1> to vector<3x1xi32>
    %795 = arith.sitofp %794 : vector<3x1xi32> to vector<3x1xf32>
    %796 = arith.extui %721 : vector<1x6xi1> to vector<1x6xi32>
    %797 = arith.sitofp %796 : vector<1x6xi32> to vector<1x6xf32>
    %798 = arith.mulf %788, %797 : vector<1x6xf32>
    %cst_148 = arith.constant dense<0.000000e+00> : vector<3x6xf32>
    %799 = tpu.matmul %795, %798, %cst_148 {dimension_numbers = #tpu.dot_dimension_numbers<[1], [0], [0], [1], [0, 0, 1, 1], [], []>} : vector<3x1xf32>, vector<1x6xf32>, vector<3x6xf32> -> vector<3x6xf32>
    %cst_149 = arith.constant dense<0.000000e+00> : vector<3x6xf32>
    %800 = tpu.matmul %799, %725, %cst_149 {dimension_numbers = #tpu.dot_dimension_numbers<[1], [0], [0], [1], [0, 0, 1, 1], [], []>} : vector<3x6xf32>, vector<6x6xf32>, vector<3x6xf32> -> vector<3x6xf32>
    %cst_150 = arith.constant dense<0.000000e+00> : vector<3x6xf32>
    %801 = tpu.matmul %799, %735, %cst_150 {dimension_numbers = #tpu.dot_dimension_numbers<[1], [0], [0], [1], [0, 0, 1, 1], [], []>} : vector<3x6xf32>, vector<6x6xf32>, vector<3x6xf32> -> vector<3x6xf32>
    %c54 = arith.constant 54 : index
    %802 = memref.load %arg0[%c54] : memref<117xf32, #tpu.memory_space<smem>>
    %803 = vector.extract_strided_slice %800 {offsets = [0, 0], sizes = [1, 6], strides = [1, 1]} : vector<3x6xf32> to vector<1x6xf32>
    %804 = vector.broadcast %802 : f32 to vector<1x6xf32>
    %805 = arith.mulf %804, %803 : vector<1x6xf32>
    %c55 = arith.constant 55 : index
    %806 = memref.load %arg0[%c55] : memref<117xf32, #tpu.memory_space<smem>>
    %807 = vector.extract_strided_slice %799 {offsets = [0, 0], sizes = [1, 6], strides = [1, 1]} : vector<3x6xf32> to vector<1x6xf32>
    %808 = vector.broadcast %806 : f32 to vector<1x6xf32>
    %809 = arith.mulf %808, %807 : vector<1x6xf32>
    %c56 = arith.constant 56 : index
    %810 = memref.load %arg0[%c56] : memref<117xf32, #tpu.memory_space<smem>>
    %811 = vector.extract_strided_slice %801 {offsets = [0, 0], sizes = [1, 6], strides = [1, 1]} : vector<3x6xf32> to vector<1x6xf32>
    %812 = vector.broadcast %810 : f32 to vector<1x6xf32>
    %813 = arith.mulf %812, %811 : vector<1x6xf32>
    %814 = arith.addf %805, %809 : vector<1x6xf32>
    %815 = arith.addf %814, %813 : vector<1x6xf32>
    %c57 = arith.constant 57 : index
    %816 = memref.load %arg0[%c57] : memref<117xf32, #tpu.memory_space<smem>>
    %817 = vector.extract_strided_slice %800 {offsets = [1, 0], sizes = [1, 6], strides = [1, 1]} : vector<3x6xf32> to vector<1x6xf32>
    %818 = vector.broadcast %816 : f32 to vector<1x6xf32>
    %819 = arith.mulf %818, %817 : vector<1x6xf32>
    %c58 = arith.constant 58 : index
    %820 = memref.load %arg0[%c58] : memref<117xf32, #tpu.memory_space<smem>>
    %821 = vector.extract_strided_slice %799 {offsets = [1, 0], sizes = [1, 6], strides = [1, 1]} : vector<3x6xf32> to vector<1x6xf32>
    %822 = vector.broadcast %820 : f32 to vector<1x6xf32>
    %823 = arith.mulf %822, %821 : vector<1x6xf32>
    %c59 = arith.constant 59 : index
    %824 = memref.load %arg0[%c59] : memref<117xf32, #tpu.memory_space<smem>>
    %825 = vector.extract_strided_slice %801 {offsets = [1, 0], sizes = [1, 6], strides = [1, 1]} : vector<3x6xf32> to vector<1x6xf32>
    %826 = vector.broadcast %824 : f32 to vector<1x6xf32>
    %827 = arith.mulf %826, %825 : vector<1x6xf32>
    %828 = arith.addf %819, %823 : vector<1x6xf32>
    %829 = arith.addf %828, %827 : vector<1x6xf32>
    %c60 = arith.constant 60 : index
    %830 = memref.load %arg0[%c60] : memref<117xf32, #tpu.memory_space<smem>>
    %831 = vector.extract_strided_slice %800 {offsets = [2, 0], sizes = [1, 6], strides = [1, 1]} : vector<3x6xf32> to vector<1x6xf32>
    %832 = vector.broadcast %830 : f32 to vector<1x6xf32>
    %833 = arith.mulf %832, %831 : vector<1x6xf32>
    %c61 = arith.constant 61 : index
    %834 = memref.load %arg0[%c61] : memref<117xf32, #tpu.memory_space<smem>>
    %835 = vector.extract_strided_slice %799 {offsets = [2, 0], sizes = [1, 6], strides = [1, 1]} : vector<3x6xf32> to vector<1x6xf32>
    %836 = vector.broadcast %834 : f32 to vector<1x6xf32>
    %837 = arith.mulf %836, %835 : vector<1x6xf32>
    %c62 = arith.constant 62 : index
    %838 = memref.load %arg0[%c62] : memref<117xf32, #tpu.memory_space<smem>>
    %839 = vector.extract_strided_slice %801 {offsets = [2, 0], sizes = [1, 6], strides = [1, 1]} : vector<3x6xf32> to vector<1x6xf32>
    %840 = vector.broadcast %838 : f32 to vector<1x6xf32>
    %841 = arith.mulf %840, %839 : vector<1x6xf32>
    %842 = arith.addf %833, %837 : vector<1x6xf32>
    %843 = arith.addf %842, %841 : vector<1x6xf32>
    %844 = arith.addf %815, %829 : vector<1x6xf32>
    %845 = arith.addf %844, %843 : vector<1x6xf32>
    %c12_151 = arith.constant 12 : index
    %846 = memref.load %arg1[%c12_151] : memref<26xf32, #tpu.memory_space<smem>>
    %847 = vector.broadcast %846 : f32 to vector<1x6xf32>
    %848 = arith.mulf %845, %847 : vector<1x6xf32>
    %c13_152 = arith.constant 13 : index
    %849 = memref.load %arg1[%c13_152] : memref<26xf32, #tpu.memory_space<smem>>
    %850 = vector.broadcast %849 : f32 to vector<1x6xf32>
    %851 = arith.addf %848, %850 : vector<1x6xf32>
    %cst_153 = arith.constant 0.000000e+00 : f32
    %852 = vector.broadcast %cst_153 : f32 to vector<1x6xf32>
    %853 = arith.maximumf %851, %852 : vector<1x6xf32>
    %854 = tpu.iota {dimensions = array<i32: 0>} : vector<4x1xi32>
    %855 = tpu.iota {dimensions = array<i32: 1>} : vector<4x1xi32>
    %c2_i32_154 = arith.constant 2 : i32
    %856 = vector.broadcast %c2_i32_154 : i32 to vector<4x1xi32>
    %857 = arith.muli %856, %855 : vector<4x1xi32>
    %c1_i32_155 = arith.constant 1 : i32
    %858 = vector.broadcast %c1_i32_155 : i32 to vector<4x1xi32>
    %859 = arith.addi %857, %858 : vector<4x1xi32>
    %860 = arith.cmpi eq, %854, %859 : vector<4x1xi32>
    %c2_i32_156 = arith.constant 2 : i32
    %861 = vector.broadcast %c2_i32_156 : i32 to vector<4x1xi32>
    %862 = arith.muli %861, %855 : vector<4x1xi32>
    %c2_i32_157 = arith.constant 2 : i32
    %863 = vector.broadcast %c2_i32_157 : i32 to vector<4x1xi32>
    %864 = arith.addi %862, %863 : vector<4x1xi32>
    %865 = arith.cmpi eq, %854, %864 : vector<4x1xi32>
    %866 = arith.ori %860, %865 : vector<4x1xi1>
    %867 = arith.extui %866 : vector<4x1xi1> to vector<4x1xi32>
    %868 = arith.sitofp %867 : vector<4x1xi32> to vector<4x1xf32>
    %869 = tpu.iota {dimensions = array<i32: 0>} : vector<6x8xi32>
    %870 = tpu.iota {dimensions = array<i32: 1>} : vector<6x8xi32>
    %c0_i32_158 = arith.constant 0 : i32
    %871 = vector.broadcast %c0_i32_158 : i32 to vector<6x8xi32>
    %872 = arith.subi %869, %871 : vector<6x8xi32>
    %c0_i32_159 = arith.constant 0 : i32
    %873 = vector.broadcast %c0_i32_159 : i32 to vector<6x8xi32>
    %874 = arith.subi %870, %873 : vector<6x8xi32>
    %c1_i32_160 = arith.constant 1 : i32
    %875 = vector.broadcast %c1_i32_160 : i32 to vector<6x8xi32>
    %876 = arith.cmpi sge, %872, %875 : vector<6x8xi32>
    %c1_i32_161 = arith.constant 1 : i32
    %877 = vector.broadcast %c1_i32_161 : i32 to vector<6x8xi32>
    %878 = arith.cmpi sle, %872, %877 : vector<6x8xi32>
    %879 = arith.andi %876, %878 : vector<6x8xi1>
    %c2_i32_162 = arith.constant 2 : i32
    %880 = vector.broadcast %c2_i32_162 : i32 to vector<6x8xi32>
    %881 = arith.muli %880, %872 : vector<6x8xi32>
    %c1_i32_163 = arith.constant 1 : i32
    %882 = vector.broadcast %c1_i32_163 : i32 to vector<6x8xi32>
    %883 = arith.subi %881, %882 : vector<6x8xi32>
    %884 = arith.cmpi eq, %874, %883 : vector<6x8xi32>
    %c2_i32_164 = arith.constant 2 : i32
    %885 = vector.broadcast %c2_i32_164 : i32 to vector<6x8xi32>
    %886 = arith.muli %885, %872 : vector<6x8xi32>
    %887 = arith.cmpi eq, %874, %886 : vector<6x8xi32>
    %888 = arith.ori %884, %887 : vector<6x8xi1>
    %889 = arith.andi %879, %888 : vector<6x8xi1>
    %c3_i32_165 = arith.constant 3 : i32
    %890 = vector.broadcast %c3_i32_165 : i32 to vector<6x8xi32>
    %891 = arith.subi %869, %890 : vector<6x8xi32>
    %c4_i32_166 = arith.constant 4 : i32
    %892 = vector.broadcast %c4_i32_166 : i32 to vector<6x8xi32>
    %893 = arith.subi %870, %892 : vector<6x8xi32>
    %c1_i32_167 = arith.constant 1 : i32
    %894 = vector.broadcast %c1_i32_167 : i32 to vector<6x8xi32>
    %895 = arith.cmpi sge, %891, %894 : vector<6x8xi32>
    %c1_i32_168 = arith.constant 1 : i32
    %896 = vector.broadcast %c1_i32_168 : i32 to vector<6x8xi32>
    %897 = arith.cmpi sle, %891, %896 : vector<6x8xi32>
    %898 = arith.andi %895, %897 : vector<6x8xi1>
    %c2_i32_169 = arith.constant 2 : i32
    %899 = vector.broadcast %c2_i32_169 : i32 to vector<6x8xi32>
    %900 = arith.muli %899, %891 : vector<6x8xi32>
    %c1_i32_170 = arith.constant 1 : i32
    %901 = vector.broadcast %c1_i32_170 : i32 to vector<6x8xi32>
    %902 = arith.subi %900, %901 : vector<6x8xi32>
    %903 = arith.cmpi eq, %893, %902 : vector<6x8xi32>
    %c2_i32_171 = arith.constant 2 : i32
    %904 = vector.broadcast %c2_i32_171 : i32 to vector<6x8xi32>
    %905 = arith.muli %904, %891 : vector<6x8xi32>
    %906 = arith.cmpi eq, %893, %905 : vector<6x8xi32>
    %907 = arith.ori %903, %906 : vector<6x8xi1>
    %908 = arith.andi %898, %907 : vector<6x8xi1>
    %909 = arith.ori %889, %908 : vector<6x8xi1>
    %910 = arith.extui %909 : vector<6x8xi1> to vector<6x8xi32>
    %911 = arith.sitofp %910 : vector<6x8xi32> to vector<6x8xf32>
    %cst_172 = arith.constant dense<0.000000e+00> : vector<4x6xf32>
    %912 = tpu.matmul %868, %853, %cst_172 {dimension_numbers = #tpu.dot_dimension_numbers<[1], [0], [0], [1], [0, 0, 1, 1], [], []>} : vector<4x1xf32>, vector<1x6xf32>, vector<4x6xf32> -> vector<4x6xf32>
    %cst_173 = arith.constant dense<0.000000e+00> : vector<4x8xf32>
    %913 = tpu.matmul %912, %911, %cst_173 {dimension_numbers = #tpu.dot_dimension_numbers<[1], [0], [0], [1], [0, 0, 1, 1], [], []>} : vector<4x6xf32>, vector<6x8xf32>, vector<4x8xf32> -> vector<4x8xf32>
    %cst_174 = arith.constant dense<0.000000e+00> : vector<4x8xf32>
    %914 = tpu.matmul %913, %585, %cst_174 {dimension_numbers = #tpu.dot_dimension_numbers<[1], [0], [0], [1], [0, 0, 1, 1], [], []>} : vector<4x8xf32>, vector<8x8xf32>, vector<4x8xf32> -> vector<4x8xf32>
    %cst_175 = arith.constant dense<0.000000e+00> : vector<4x8xf32>
    %915 = tpu.matmul %913, %595, %cst_175 {dimension_numbers = #tpu.dot_dimension_numbers<[1], [0], [0], [1], [0, 0, 1, 1], [], []>} : vector<4x8xf32>, vector<8x8xf32>, vector<4x8xf32> -> vector<4x8xf32>
    %c63 = arith.constant 63 : index
    %916 = memref.load %arg0[%c63] : memref<117xf32, #tpu.memory_space<smem>>
    %917 = vector.extract_strided_slice %914 {offsets = [0, 0], sizes = [2, 8], strides = [1, 1]} : vector<4x8xf32> to vector<2x8xf32>
    %918 = vector.broadcast %916 : f32 to vector<2x8xf32>
    %919 = arith.mulf %918, %917 : vector<2x8xf32>
    %c64 = arith.constant 64 : index
    %920 = memref.load %arg0[%c64] : memref<117xf32, #tpu.memory_space<smem>>
    %921 = vector.extract_strided_slice %913 {offsets = [0, 0], sizes = [2, 8], strides = [1, 1]} : vector<4x8xf32> to vector<2x8xf32>
    %922 = vector.broadcast %920 : f32 to vector<2x8xf32>
    %923 = arith.mulf %922, %921 : vector<2x8xf32>
    %c65 = arith.constant 65 : index
    %924 = memref.load %arg0[%c65] : memref<117xf32, #tpu.memory_space<smem>>
    %925 = vector.extract_strided_slice %915 {offsets = [0, 0], sizes = [2, 8], strides = [1, 1]} : vector<4x8xf32> to vector<2x8xf32>
    %926 = vector.broadcast %924 : f32 to vector<2x8xf32>
    %927 = arith.mulf %926, %925 : vector<2x8xf32>
    %928 = arith.addf %919, %923 : vector<2x8xf32>
    %929 = arith.addf %928, %927 : vector<2x8xf32>
    %c66 = arith.constant 66 : index
    %930 = memref.load %arg0[%c66] : memref<117xf32, #tpu.memory_space<smem>>
    %931 = vector.extract_strided_slice %914 {offsets = [1, 0], sizes = [2, 8], strides = [1, 1]} : vector<4x8xf32> to vector<2x8xf32>
    %932 = vector.broadcast %930 : f32 to vector<2x8xf32>
    %933 = arith.mulf %932, %931 : vector<2x8xf32>
    %c67 = arith.constant 67 : index
    %934 = memref.load %arg0[%c67] : memref<117xf32, #tpu.memory_space<smem>>
    %935 = vector.extract_strided_slice %913 {offsets = [1, 0], sizes = [2, 8], strides = [1, 1]} : vector<4x8xf32> to vector<2x8xf32>
    %936 = vector.broadcast %934 : f32 to vector<2x8xf32>
    %937 = arith.mulf %936, %935 : vector<2x8xf32>
    %c68 = arith.constant 68 : index
    %938 = memref.load %arg0[%c68] : memref<117xf32, #tpu.memory_space<smem>>
    %939 = vector.extract_strided_slice %915 {offsets = [1, 0], sizes = [2, 8], strides = [1, 1]} : vector<4x8xf32> to vector<2x8xf32>
    %940 = vector.broadcast %938 : f32 to vector<2x8xf32>
    %941 = arith.mulf %940, %939 : vector<2x8xf32>
    %942 = arith.addf %933, %937 : vector<2x8xf32>
    %943 = arith.addf %942, %941 : vector<2x8xf32>
    %c69 = arith.constant 69 : index
    %944 = memref.load %arg0[%c69] : memref<117xf32, #tpu.memory_space<smem>>
    %945 = vector.extract_strided_slice %914 {offsets = [2, 0], sizes = [2, 8], strides = [1, 1]} : vector<4x8xf32> to vector<2x8xf32>
    %946 = vector.broadcast %944 : f32 to vector<2x8xf32>
    %947 = arith.mulf %946, %945 : vector<2x8xf32>
    %c70 = arith.constant 70 : index
    %948 = memref.load %arg0[%c70] : memref<117xf32, #tpu.memory_space<smem>>
    %949 = vector.extract_strided_slice %913 {offsets = [2, 0], sizes = [2, 8], strides = [1, 1]} : vector<4x8xf32> to vector<2x8xf32>
    %950 = vector.broadcast %948 : f32 to vector<2x8xf32>
    %951 = arith.mulf %950, %949 : vector<2x8xf32>
    %c71 = arith.constant 71 : index
    %952 = memref.load %arg0[%c71] : memref<117xf32, #tpu.memory_space<smem>>
    %953 = vector.extract_strided_slice %915 {offsets = [2, 0], sizes = [2, 8], strides = [1, 1]} : vector<4x8xf32> to vector<2x8xf32>
    %954 = vector.broadcast %952 : f32 to vector<2x8xf32>
    %955 = arith.mulf %954, %953 : vector<2x8xf32>
    %956 = arith.addf %947, %951 : vector<2x8xf32>
    %957 = arith.addf %956, %955 : vector<2x8xf32>
    %958 = arith.addf %929, %943 : vector<2x8xf32>
    %959 = arith.addf %958, %957 : vector<2x8xf32>
    %c14_176 = arith.constant 14 : index
    %960 = memref.load %arg1[%c14_176] : memref<26xf32, #tpu.memory_space<smem>>
    %961 = vector.broadcast %960 : f32 to vector<2x8xf32>
    %962 = arith.mulf %959, %961 : vector<2x8xf32>
    %c15_177 = arith.constant 15 : index
    %963 = memref.load %arg1[%c15_177] : memref<26xf32, #tpu.memory_space<smem>>
    %964 = vector.broadcast %963 : f32 to vector<2x8xf32>
    %965 = arith.addf %962, %964 : vector<2x8xf32>
    %cst_178 = arith.constant 0.000000e+00 : f32
    %966 = vector.broadcast %cst_178 : f32 to vector<2x8xf32>
    %967 = arith.maximumf %965, %966 : vector<2x8xf32>
    %968 = tpu.iota {dimensions = array<i32: 0>} : vector<6x2xi32>
    %969 = tpu.iota {dimensions = array<i32: 1>} : vector<6x2xi32>
    %c2_i32_179 = arith.constant 2 : i32
    %970 = vector.broadcast %c2_i32_179 : i32 to vector<6x2xi32>
    %971 = arith.muli %970, %969 : vector<6x2xi32>
    %c1_i32_180 = arith.constant 1 : i32
    %972 = vector.broadcast %c1_i32_180 : i32 to vector<6x2xi32>
    %973 = arith.addi %971, %972 : vector<6x2xi32>
    %974 = arith.cmpi eq, %968, %973 : vector<6x2xi32>
    %c2_i32_181 = arith.constant 2 : i32
    %975 = vector.broadcast %c2_i32_181 : i32 to vector<6x2xi32>
    %976 = arith.muli %975, %969 : vector<6x2xi32>
    %c2_i32_182 = arith.constant 2 : i32
    %977 = vector.broadcast %c2_i32_182 : i32 to vector<6x2xi32>
    %978 = arith.addi %976, %977 : vector<6x2xi32>
    %979 = arith.cmpi eq, %968, %978 : vector<6x2xi32>
    %980 = arith.ori %974, %979 : vector<6x2xi1>
    %981 = arith.extui %980 : vector<6x2xi1> to vector<6x2xi32>
    %982 = arith.sitofp %981 : vector<6x2xi32> to vector<6x2xf32>
    %983 = tpu.iota {dimensions = array<i32: 0>} : vector<8x12xi32>
    %984 = tpu.iota {dimensions = array<i32: 1>} : vector<8x12xi32>
    %c0_i32_183 = arith.constant 0 : i32
    %985 = vector.broadcast %c0_i32_183 : i32 to vector<8x12xi32>
    %986 = arith.subi %983, %985 : vector<8x12xi32>
    %c0_i32_184 = arith.constant 0 : i32
    %987 = vector.broadcast %c0_i32_184 : i32 to vector<8x12xi32>
    %988 = arith.subi %984, %987 : vector<8x12xi32>
    %c1_i32_185 = arith.constant 1 : i32
    %989 = vector.broadcast %c1_i32_185 : i32 to vector<8x12xi32>
    %990 = arith.cmpi sge, %986, %989 : vector<8x12xi32>
    %c2_i32_186 = arith.constant 2 : i32
    %991 = vector.broadcast %c2_i32_186 : i32 to vector<8x12xi32>
    %992 = arith.cmpi sle, %986, %991 : vector<8x12xi32>
    %993 = arith.andi %990, %992 : vector<8x12xi1>
    %c2_i32_187 = arith.constant 2 : i32
    %994 = vector.broadcast %c2_i32_187 : i32 to vector<8x12xi32>
    %995 = arith.muli %994, %986 : vector<8x12xi32>
    %c1_i32_188 = arith.constant 1 : i32
    %996 = vector.broadcast %c1_i32_188 : i32 to vector<8x12xi32>
    %997 = arith.subi %995, %996 : vector<8x12xi32>
    %998 = arith.cmpi eq, %988, %997 : vector<8x12xi32>
    %c2_i32_189 = arith.constant 2 : i32
    %999 = vector.broadcast %c2_i32_189 : i32 to vector<8x12xi32>
    %1000 = arith.muli %999, %986 : vector<8x12xi32>
    %1001 = arith.cmpi eq, %988, %1000 : vector<8x12xi32>
    %1002 = arith.ori %998, %1001 : vector<8x12xi1>
    %1003 = arith.andi %993, %1002 : vector<8x12xi1>
    %c4_i32_190 = arith.constant 4 : i32
    %1004 = vector.broadcast %c4_i32_190 : i32 to vector<8x12xi32>
    %1005 = arith.subi %983, %1004 : vector<8x12xi32>
    %c6_i32_191 = arith.constant 6 : i32
    %1006 = vector.broadcast %c6_i32_191 : i32 to vector<8x12xi32>
    %1007 = arith.subi %984, %1006 : vector<8x12xi32>
    %c1_i32_192 = arith.constant 1 : i32
    %1008 = vector.broadcast %c1_i32_192 : i32 to vector<8x12xi32>
    %1009 = arith.cmpi sge, %1005, %1008 : vector<8x12xi32>
    %c2_i32_193 = arith.constant 2 : i32
    %1010 = vector.broadcast %c2_i32_193 : i32 to vector<8x12xi32>
    %1011 = arith.cmpi sle, %1005, %1010 : vector<8x12xi32>
    %1012 = arith.andi %1009, %1011 : vector<8x12xi1>
    %c2_i32_194 = arith.constant 2 : i32
    %1013 = vector.broadcast %c2_i32_194 : i32 to vector<8x12xi32>
    %1014 = arith.muli %1013, %1005 : vector<8x12xi32>
    %c1_i32_195 = arith.constant 1 : i32
    %1015 = vector.broadcast %c1_i32_195 : i32 to vector<8x12xi32>
    %1016 = arith.subi %1014, %1015 : vector<8x12xi32>
    %1017 = arith.cmpi eq, %1007, %1016 : vector<8x12xi32>
    %c2_i32_196 = arith.constant 2 : i32
    %1018 = vector.broadcast %c2_i32_196 : i32 to vector<8x12xi32>
    %1019 = arith.muli %1018, %1005 : vector<8x12xi32>
    %1020 = arith.cmpi eq, %1007, %1019 : vector<8x12xi32>
    %1021 = arith.ori %1017, %1020 : vector<8x12xi1>
    %1022 = arith.andi %1012, %1021 : vector<8x12xi1>
    %1023 = arith.ori %1003, %1022 : vector<8x12xi1>
    %1024 = arith.extui %1023 : vector<8x12xi1> to vector<8x12xi32>
    %1025 = arith.sitofp %1024 : vector<8x12xi32> to vector<8x12xf32>
    %cst_197 = arith.constant dense<0.000000e+00> : vector<6x8xf32>
    %1026 = tpu.matmul %982, %967, %cst_197 {dimension_numbers = #tpu.dot_dimension_numbers<[1], [0], [0], [1], [0, 0, 1, 1], [], []>} : vector<6x2xf32>, vector<2x8xf32>, vector<6x8xf32> -> vector<6x8xf32>
    %cst_198 = arith.constant dense<0.000000e+00> : vector<6x12xf32>
    %1027 = tpu.matmul %1026, %1025, %cst_198 {dimension_numbers = #tpu.dot_dimension_numbers<[1], [0], [0], [1], [0, 0, 1, 1], [], []>} : vector<6x8xf32>, vector<8x12xf32>, vector<6x12xf32> -> vector<6x12xf32>
    %cst_199 = arith.constant dense<0.000000e+00> : vector<6x12xf32>
    %1028 = tpu.matmul %1027, %445, %cst_199 {dimension_numbers = #tpu.dot_dimension_numbers<[1], [0], [0], [1], [0, 0, 1, 1], [], []>} : vector<6x12xf32>, vector<12x12xf32>, vector<6x12xf32> -> vector<6x12xf32>
    %cst_200 = arith.constant dense<0.000000e+00> : vector<6x12xf32>
    %1029 = tpu.matmul %1027, %455, %cst_200 {dimension_numbers = #tpu.dot_dimension_numbers<[1], [0], [0], [1], [0, 0, 1, 1], [], []>} : vector<6x12xf32>, vector<12x12xf32>, vector<6x12xf32> -> vector<6x12xf32>
    %c72 = arith.constant 72 : index
    %1030 = memref.load %arg0[%c72] : memref<117xf32, #tpu.memory_space<smem>>
    %1031 = vector.extract_strided_slice %1028 {offsets = [0, 0], sizes = [4, 12], strides = [1, 1]} : vector<6x12xf32> to vector<4x12xf32>
    %1032 = vector.broadcast %1030 : f32 to vector<4x12xf32>
    %1033 = arith.mulf %1032, %1031 : vector<4x12xf32>
    %c73 = arith.constant 73 : index
    %1034 = memref.load %arg0[%c73] : memref<117xf32, #tpu.memory_space<smem>>
    %1035 = vector.extract_strided_slice %1027 {offsets = [0, 0], sizes = [4, 12], strides = [1, 1]} : vector<6x12xf32> to vector<4x12xf32>
    %1036 = vector.broadcast %1034 : f32 to vector<4x12xf32>
    %1037 = arith.mulf %1036, %1035 : vector<4x12xf32>
    %c74 = arith.constant 74 : index
    %1038 = memref.load %arg0[%c74] : memref<117xf32, #tpu.memory_space<smem>>
    %1039 = vector.extract_strided_slice %1029 {offsets = [0, 0], sizes = [4, 12], strides = [1, 1]} : vector<6x12xf32> to vector<4x12xf32>
    %1040 = vector.broadcast %1038 : f32 to vector<4x12xf32>
    %1041 = arith.mulf %1040, %1039 : vector<4x12xf32>
    %1042 = arith.addf %1033, %1037 : vector<4x12xf32>
    %1043 = arith.addf %1042, %1041 : vector<4x12xf32>
    %c75 = arith.constant 75 : index
    %1044 = memref.load %arg0[%c75] : memref<117xf32, #tpu.memory_space<smem>>
    %1045 = vector.extract_strided_slice %1028 {offsets = [1, 0], sizes = [4, 12], strides = [1, 1]} : vector<6x12xf32> to vector<4x12xf32>
    %1046 = vector.broadcast %1044 : f32 to vector<4x12xf32>
    %1047 = arith.mulf %1046, %1045 : vector<4x12xf32>
    %c76 = arith.constant 76 : index
    %1048 = memref.load %arg0[%c76] : memref<117xf32, #tpu.memory_space<smem>>
    %1049 = vector.extract_strided_slice %1027 {offsets = [1, 0], sizes = [4, 12], strides = [1, 1]} : vector<6x12xf32> to vector<4x12xf32>
    %1050 = vector.broadcast %1048 : f32 to vector<4x12xf32>
    %1051 = arith.mulf %1050, %1049 : vector<4x12xf32>
    %c77 = arith.constant 77 : index
    %1052 = memref.load %arg0[%c77] : memref<117xf32, #tpu.memory_space<smem>>
    %1053 = vector.extract_strided_slice %1029 {offsets = [1, 0], sizes = [4, 12], strides = [1, 1]} : vector<6x12xf32> to vector<4x12xf32>
    %1054 = vector.broadcast %1052 : f32 to vector<4x12xf32>
    %1055 = arith.mulf %1054, %1053 : vector<4x12xf32>
    %1056 = arith.addf %1047, %1051 : vector<4x12xf32>
    %1057 = arith.addf %1056, %1055 : vector<4x12xf32>
    %c78 = arith.constant 78 : index
    %1058 = memref.load %arg0[%c78] : memref<117xf32, #tpu.memory_space<smem>>
    %1059 = vector.extract_strided_slice %1028 {offsets = [2, 0], sizes = [4, 12], strides = [1, 1]} : vector<6x12xf32> to vector<4x12xf32>
    %1060 = vector.broadcast %1058 : f32 to vector<4x12xf32>
    %1061 = arith.mulf %1060, %1059 : vector<4x12xf32>
    %c79 = arith.constant 79 : index
    %1062 = memref.load %arg0[%c79] : memref<117xf32, #tpu.memory_space<smem>>
    %1063 = vector.extract_strided_slice %1027 {offsets = [2, 0], sizes = [4, 12], strides = [1, 1]} : vector<6x12xf32> to vector<4x12xf32>
    %1064 = vector.broadcast %1062 : f32 to vector<4x12xf32>
    %1065 = arith.mulf %1064, %1063 : vector<4x12xf32>
    %c80 = arith.constant 80 : index
    %1066 = memref.load %arg0[%c80] : memref<117xf32, #tpu.memory_space<smem>>
    %1067 = vector.extract_strided_slice %1029 {offsets = [2, 0], sizes = [4, 12], strides = [1, 1]} : vector<6x12xf32> to vector<4x12xf32>
    %1068 = vector.broadcast %1066 : f32 to vector<4x12xf32>
    %1069 = arith.mulf %1068, %1067 : vector<4x12xf32>
    %1070 = arith.addf %1061, %1065 : vector<4x12xf32>
    %1071 = arith.addf %1070, %1069 : vector<4x12xf32>
    %1072 = arith.addf %1043, %1057 : vector<4x12xf32>
    %1073 = arith.addf %1072, %1071 : vector<4x12xf32>
    %c16_201 = arith.constant 16 : index
    %1074 = memref.load %arg1[%c16_201] : memref<26xf32, #tpu.memory_space<smem>>
    %1075 = vector.broadcast %1074 : f32 to vector<4x12xf32>
    %1076 = arith.mulf %1073, %1075 : vector<4x12xf32>
    %c17_202 = arith.constant 17 : index
    %1077 = memref.load %arg1[%c17_202] : memref<26xf32, #tpu.memory_space<smem>>
    %1078 = vector.broadcast %1077 : f32 to vector<4x12xf32>
    %1079 = arith.addf %1076, %1078 : vector<4x12xf32>
    %cst_203 = arith.constant 0.000000e+00 : f32
    %1080 = vector.broadcast %cst_203 : f32 to vector<4x12xf32>
    %1081 = arith.maximumf %1079, %1080 : vector<4x12xf32>
    %1082 = tpu.iota {dimensions = array<i32: 0>} : vector<10x4xi32>
    %1083 = tpu.iota {dimensions = array<i32: 1>} : vector<10x4xi32>
    %c2_i32_204 = arith.constant 2 : i32
    %1084 = vector.broadcast %c2_i32_204 : i32 to vector<10x4xi32>
    %1085 = arith.muli %1084, %1083 : vector<10x4xi32>
    %c1_i32_205 = arith.constant 1 : i32
    %1086 = vector.broadcast %c1_i32_205 : i32 to vector<10x4xi32>
    %1087 = arith.addi %1085, %1086 : vector<10x4xi32>
    %1088 = arith.cmpi eq, %1082, %1087 : vector<10x4xi32>
    %c2_i32_206 = arith.constant 2 : i32
    %1089 = vector.broadcast %c2_i32_206 : i32 to vector<10x4xi32>
    %1090 = arith.muli %1089, %1083 : vector<10x4xi32>
    %c2_i32_207 = arith.constant 2 : i32
    %1091 = vector.broadcast %c2_i32_207 : i32 to vector<10x4xi32>
    %1092 = arith.addi %1090, %1091 : vector<10x4xi32>
    %1093 = arith.cmpi eq, %1082, %1092 : vector<10x4xi32>
    %1094 = arith.ori %1088, %1093 : vector<10x4xi1>
    %1095 = arith.extui %1094 : vector<10x4xi1> to vector<10x4xi32>
    %1096 = arith.sitofp %1095 : vector<10x4xi32> to vector<10x4xf32>
    %1097 = tpu.iota {dimensions = array<i32: 0>} : vector<12x20xi32>
    %1098 = tpu.iota {dimensions = array<i32: 1>} : vector<12x20xi32>
    %c0_i32_208 = arith.constant 0 : i32
    %1099 = vector.broadcast %c0_i32_208 : i32 to vector<12x20xi32>
    %1100 = arith.subi %1097, %1099 : vector<12x20xi32>
    %c0_i32_209 = arith.constant 0 : i32
    %1101 = vector.broadcast %c0_i32_209 : i32 to vector<12x20xi32>
    %1102 = arith.subi %1098, %1101 : vector<12x20xi32>
    %c1_i32_210 = arith.constant 1 : i32
    %1103 = vector.broadcast %c1_i32_210 : i32 to vector<12x20xi32>
    %1104 = arith.cmpi sge, %1100, %1103 : vector<12x20xi32>
    %c4_i32_211 = arith.constant 4 : i32
    %1105 = vector.broadcast %c4_i32_211 : i32 to vector<12x20xi32>
    %1106 = arith.cmpi sle, %1100, %1105 : vector<12x20xi32>
    %1107 = arith.andi %1104, %1106 : vector<12x20xi1>
    %c2_i32_212 = arith.constant 2 : i32
    %1108 = vector.broadcast %c2_i32_212 : i32 to vector<12x20xi32>
    %1109 = arith.muli %1108, %1100 : vector<12x20xi32>
    %c1_i32_213 = arith.constant 1 : i32
    %1110 = vector.broadcast %c1_i32_213 : i32 to vector<12x20xi32>
    %1111 = arith.subi %1109, %1110 : vector<12x20xi32>
    %1112 = arith.cmpi eq, %1102, %1111 : vector<12x20xi32>
    %c2_i32_214 = arith.constant 2 : i32
    %1113 = vector.broadcast %c2_i32_214 : i32 to vector<12x20xi32>
    %1114 = arith.muli %1113, %1100 : vector<12x20xi32>
    %1115 = arith.cmpi eq, %1102, %1114 : vector<12x20xi32>
    %1116 = arith.ori %1112, %1115 : vector<12x20xi1>
    %1117 = arith.andi %1107, %1116 : vector<12x20xi1>
    %c6_i32_215 = arith.constant 6 : i32
    %1118 = vector.broadcast %c6_i32_215 : i32 to vector<12x20xi32>
    %1119 = arith.subi %1097, %1118 : vector<12x20xi32>
    %c10_i32_216 = arith.constant 10 : i32
    %1120 = vector.broadcast %c10_i32_216 : i32 to vector<12x20xi32>
    %1121 = arith.subi %1098, %1120 : vector<12x20xi32>
    %c1_i32_217 = arith.constant 1 : i32
    %1122 = vector.broadcast %c1_i32_217 : i32 to vector<12x20xi32>
    %1123 = arith.cmpi sge, %1119, %1122 : vector<12x20xi32>
    %c4_i32_218 = arith.constant 4 : i32
    %1124 = vector.broadcast %c4_i32_218 : i32 to vector<12x20xi32>
    %1125 = arith.cmpi sle, %1119, %1124 : vector<12x20xi32>
    %1126 = arith.andi %1123, %1125 : vector<12x20xi1>
    %c2_i32_219 = arith.constant 2 : i32
    %1127 = vector.broadcast %c2_i32_219 : i32 to vector<12x20xi32>
    %1128 = arith.muli %1127, %1119 : vector<12x20xi32>
    %c1_i32_220 = arith.constant 1 : i32
    %1129 = vector.broadcast %c1_i32_220 : i32 to vector<12x20xi32>
    %1130 = arith.subi %1128, %1129 : vector<12x20xi32>
    %1131 = arith.cmpi eq, %1121, %1130 : vector<12x20xi32>
    %c2_i32_221 = arith.constant 2 : i32
    %1132 = vector.broadcast %c2_i32_221 : i32 to vector<12x20xi32>
    %1133 = arith.muli %1132, %1119 : vector<12x20xi32>
    %1134 = arith.cmpi eq, %1121, %1133 : vector<12x20xi32>
    %1135 = arith.ori %1131, %1134 : vector<12x20xi1>
    %1136 = arith.andi %1126, %1135 : vector<12x20xi1>
    %1137 = arith.ori %1117, %1136 : vector<12x20xi1>
    %1138 = arith.extui %1137 : vector<12x20xi1> to vector<12x20xi32>
    %1139 = arith.sitofp %1138 : vector<12x20xi32> to vector<12x20xf32>
    %cst_222 = arith.constant dense<0.000000e+00> : vector<10x12xf32>
    %1140 = tpu.matmul %1096, %1081, %cst_222 {dimension_numbers = #tpu.dot_dimension_numbers<[1], [0], [0], [1], [0, 0, 1, 1], [], []>} : vector<10x4xf32>, vector<4x12xf32>, vector<10x12xf32> -> vector<10x12xf32>
    %cst_223 = arith.constant dense<0.000000e+00> : vector<10x20xf32>
    %1141 = tpu.matmul %1140, %1139, %cst_223 {dimension_numbers = #tpu.dot_dimension_numbers<[1], [0], [0], [1], [0, 0, 1, 1], [], []>} : vector<10x12xf32>, vector<12x20xf32>, vector<10x20xf32> -> vector<10x20xf32>
    %cst_224 = arith.constant dense<0.000000e+00> : vector<10x20xf32>
    %1142 = tpu.matmul %1141, %305, %cst_224 {dimension_numbers = #tpu.dot_dimension_numbers<[1], [0], [0], [1], [0, 0, 1, 1], [], []>} : vector<10x20xf32>, vector<20x20xf32>, vector<10x20xf32> -> vector<10x20xf32>
    %cst_225 = arith.constant dense<0.000000e+00> : vector<10x20xf32>
    %1143 = tpu.matmul %1141, %315, %cst_225 {dimension_numbers = #tpu.dot_dimension_numbers<[1], [0], [0], [1], [0, 0, 1, 1], [], []>} : vector<10x20xf32>, vector<20x20xf32>, vector<10x20xf32> -> vector<10x20xf32>
    %c81 = arith.constant 81 : index
    %1144 = memref.load %arg0[%c81] : memref<117xf32, #tpu.memory_space<smem>>
    %1145 = vector.extract_strided_slice %1142 {offsets = [0, 0], sizes = [8, 20], strides = [1, 1]} : vector<10x20xf32> to vector<8x20xf32>
    %1146 = vector.broadcast %1144 : f32 to vector<8x20xf32>
    %1147 = arith.mulf %1146, %1145 : vector<8x20xf32>
    %c82 = arith.constant 82 : index
    %1148 = memref.load %arg0[%c82] : memref<117xf32, #tpu.memory_space<smem>>
    %1149 = vector.extract_strided_slice %1141 {offsets = [0, 0], sizes = [8, 20], strides = [1, 1]} : vector<10x20xf32> to vector<8x20xf32>
    %1150 = vector.broadcast %1148 : f32 to vector<8x20xf32>
    %1151 = arith.mulf %1150, %1149 : vector<8x20xf32>
    %c83 = arith.constant 83 : index
    %1152 = memref.load %arg0[%c83] : memref<117xf32, #tpu.memory_space<smem>>
    %1153 = vector.extract_strided_slice %1143 {offsets = [0, 0], sizes = [8, 20], strides = [1, 1]} : vector<10x20xf32> to vector<8x20xf32>
    %1154 = vector.broadcast %1152 : f32 to vector<8x20xf32>
    %1155 = arith.mulf %1154, %1153 : vector<8x20xf32>
    %1156 = arith.addf %1147, %1151 : vector<8x20xf32>
    %1157 = arith.addf %1156, %1155 : vector<8x20xf32>
    %c84 = arith.constant 84 : index
    %1158 = memref.load %arg0[%c84] : memref<117xf32, #tpu.memory_space<smem>>
    %1159 = vector.extract_strided_slice %1142 {offsets = [1, 0], sizes = [8, 20], strides = [1, 1]} : vector<10x20xf32> to vector<8x20xf32>
    %1160 = vector.broadcast %1158 : f32 to vector<8x20xf32>
    %1161 = arith.mulf %1160, %1159 : vector<8x20xf32>
    %c85 = arith.constant 85 : index
    %1162 = memref.load %arg0[%c85] : memref<117xf32, #tpu.memory_space<smem>>
    %1163 = vector.extract_strided_slice %1141 {offsets = [1, 0], sizes = [8, 20], strides = [1, 1]} : vector<10x20xf32> to vector<8x20xf32>
    %1164 = vector.broadcast %1162 : f32 to vector<8x20xf32>
    %1165 = arith.mulf %1164, %1163 : vector<8x20xf32>
    %c86 = arith.constant 86 : index
    %1166 = memref.load %arg0[%c86] : memref<117xf32, #tpu.memory_space<smem>>
    %1167 = vector.extract_strided_slice %1143 {offsets = [1, 0], sizes = [8, 20], strides = [1, 1]} : vector<10x20xf32> to vector<8x20xf32>
    %1168 = vector.broadcast %1166 : f32 to vector<8x20xf32>
    %1169 = arith.mulf %1168, %1167 : vector<8x20xf32>
    %1170 = arith.addf %1161, %1165 : vector<8x20xf32>
    %1171 = arith.addf %1170, %1169 : vector<8x20xf32>
    %c87 = arith.constant 87 : index
    %1172 = memref.load %arg0[%c87] : memref<117xf32, #tpu.memory_space<smem>>
    %1173 = vector.extract_strided_slice %1142 {offsets = [2, 0], sizes = [8, 20], strides = [1, 1]} : vector<10x20xf32> to vector<8x20xf32>
    %1174 = vector.broadcast %1172 : f32 to vector<8x20xf32>
    %1175 = arith.mulf %1174, %1173 : vector<8x20xf32>
    %c88 = arith.constant 88 : index
    %1176 = memref.load %arg0[%c88] : memref<117xf32, #tpu.memory_space<smem>>
    %1177 = vector.extract_strided_slice %1141 {offsets = [2, 0], sizes = [8, 20], strides = [1, 1]} : vector<10x20xf32> to vector<8x20xf32>
    %1178 = vector.broadcast %1176 : f32 to vector<8x20xf32>
    %1179 = arith.mulf %1178, %1177 : vector<8x20xf32>
    %c89 = arith.constant 89 : index
    %1180 = memref.load %arg0[%c89] : memref<117xf32, #tpu.memory_space<smem>>
    %1181 = vector.extract_strided_slice %1143 {offsets = [2, 0], sizes = [8, 20], strides = [1, 1]} : vector<10x20xf32> to vector<8x20xf32>
    %1182 = vector.broadcast %1180 : f32 to vector<8x20xf32>
    %1183 = arith.mulf %1182, %1181 : vector<8x20xf32>
    %1184 = arith.addf %1175, %1179 : vector<8x20xf32>
    %1185 = arith.addf %1184, %1183 : vector<8x20xf32>
    %1186 = arith.addf %1157, %1171 : vector<8x20xf32>
    %1187 = arith.addf %1186, %1185 : vector<8x20xf32>
    %c18_226 = arith.constant 18 : index
    %1188 = memref.load %arg1[%c18_226] : memref<26xf32, #tpu.memory_space<smem>>
    %1189 = vector.broadcast %1188 : f32 to vector<8x20xf32>
    %1190 = arith.mulf %1187, %1189 : vector<8x20xf32>
    %c19_227 = arith.constant 19 : index
    %1191 = memref.load %arg1[%c19_227] : memref<26xf32, #tpu.memory_space<smem>>
    %1192 = vector.broadcast %1191 : f32 to vector<8x20xf32>
    %1193 = arith.addf %1190, %1192 : vector<8x20xf32>
    %cst_228 = arith.constant 0.000000e+00 : f32
    %1194 = vector.broadcast %cst_228 : f32 to vector<8x20xf32>
    %1195 = arith.maximumf %1193, %1194 : vector<8x20xf32>
    %1196 = tpu.iota {dimensions = array<i32: 0>} : vector<18x8xi32>
    %1197 = tpu.iota {dimensions = array<i32: 1>} : vector<18x8xi32>
    %c2_i32_229 = arith.constant 2 : i32
    %1198 = vector.broadcast %c2_i32_229 : i32 to vector<18x8xi32>
    %1199 = arith.muli %1198, %1197 : vector<18x8xi32>
    %c1_i32_230 = arith.constant 1 : i32
    %1200 = vector.broadcast %c1_i32_230 : i32 to vector<18x8xi32>
    %1201 = arith.addi %1199, %1200 : vector<18x8xi32>
    %1202 = arith.cmpi eq, %1196, %1201 : vector<18x8xi32>
    %c2_i32_231 = arith.constant 2 : i32
    %1203 = vector.broadcast %c2_i32_231 : i32 to vector<18x8xi32>
    %1204 = arith.muli %1203, %1197 : vector<18x8xi32>
    %c2_i32_232 = arith.constant 2 : i32
    %1205 = vector.broadcast %c2_i32_232 : i32 to vector<18x8xi32>
    %1206 = arith.addi %1204, %1205 : vector<18x8xi32>
    %1207 = arith.cmpi eq, %1196, %1206 : vector<18x8xi32>
    %1208 = arith.ori %1202, %1207 : vector<18x8xi1>
    %1209 = arith.extui %1208 : vector<18x8xi1> to vector<18x8xi32>
    %1210 = arith.sitofp %1209 : vector<18x8xi32> to vector<18x8xf32>
    %1211 = tpu.iota {dimensions = array<i32: 0>} : vector<20x36xi32>
    %1212 = tpu.iota {dimensions = array<i32: 1>} : vector<20x36xi32>
    %c0_i32_233 = arith.constant 0 : i32
    %1213 = vector.broadcast %c0_i32_233 : i32 to vector<20x36xi32>
    %1214 = arith.subi %1211, %1213 : vector<20x36xi32>
    %c0_i32_234 = arith.constant 0 : i32
    %1215 = vector.broadcast %c0_i32_234 : i32 to vector<20x36xi32>
    %1216 = arith.subi %1212, %1215 : vector<20x36xi32>
    %c1_i32_235 = arith.constant 1 : i32
    %1217 = vector.broadcast %c1_i32_235 : i32 to vector<20x36xi32>
    %1218 = arith.cmpi sge, %1214, %1217 : vector<20x36xi32>
    %c8_i32_236 = arith.constant 8 : i32
    %1219 = vector.broadcast %c8_i32_236 : i32 to vector<20x36xi32>
    %1220 = arith.cmpi sle, %1214, %1219 : vector<20x36xi32>
    %1221 = arith.andi %1218, %1220 : vector<20x36xi1>
    %c2_i32_237 = arith.constant 2 : i32
    %1222 = vector.broadcast %c2_i32_237 : i32 to vector<20x36xi32>
    %1223 = arith.muli %1222, %1214 : vector<20x36xi32>
    %c1_i32_238 = arith.constant 1 : i32
    %1224 = vector.broadcast %c1_i32_238 : i32 to vector<20x36xi32>
    %1225 = arith.subi %1223, %1224 : vector<20x36xi32>
    %1226 = arith.cmpi eq, %1216, %1225 : vector<20x36xi32>
    %c2_i32_239 = arith.constant 2 : i32
    %1227 = vector.broadcast %c2_i32_239 : i32 to vector<20x36xi32>
    %1228 = arith.muli %1227, %1214 : vector<20x36xi32>
    %1229 = arith.cmpi eq, %1216, %1228 : vector<20x36xi32>
    %1230 = arith.ori %1226, %1229 : vector<20x36xi1>
    %1231 = arith.andi %1221, %1230 : vector<20x36xi1>
    %c10_i32_240 = arith.constant 10 : i32
    %1232 = vector.broadcast %c10_i32_240 : i32 to vector<20x36xi32>
    %1233 = arith.subi %1211, %1232 : vector<20x36xi32>
    %c18_i32_241 = arith.constant 18 : i32
    %1234 = vector.broadcast %c18_i32_241 : i32 to vector<20x36xi32>
    %1235 = arith.subi %1212, %1234 : vector<20x36xi32>
    %c1_i32_242 = arith.constant 1 : i32
    %1236 = vector.broadcast %c1_i32_242 : i32 to vector<20x36xi32>
    %1237 = arith.cmpi sge, %1233, %1236 : vector<20x36xi32>
    %c8_i32_243 = arith.constant 8 : i32
    %1238 = vector.broadcast %c8_i32_243 : i32 to vector<20x36xi32>
    %1239 = arith.cmpi sle, %1233, %1238 : vector<20x36xi32>
    %1240 = arith.andi %1237, %1239 : vector<20x36xi1>
    %c2_i32_244 = arith.constant 2 : i32
    %1241 = vector.broadcast %c2_i32_244 : i32 to vector<20x36xi32>
    %1242 = arith.muli %1241, %1233 : vector<20x36xi32>
    %c1_i32_245 = arith.constant 1 : i32
    %1243 = vector.broadcast %c1_i32_245 : i32 to vector<20x36xi32>
    %1244 = arith.subi %1242, %1243 : vector<20x36xi32>
    %1245 = arith.cmpi eq, %1235, %1244 : vector<20x36xi32>
    %c2_i32_246 = arith.constant 2 : i32
    %1246 = vector.broadcast %c2_i32_246 : i32 to vector<20x36xi32>
    %1247 = arith.muli %1246, %1233 : vector<20x36xi32>
    %1248 = arith.cmpi eq, %1235, %1247 : vector<20x36xi32>
    %1249 = arith.ori %1245, %1248 : vector<20x36xi1>
    %1250 = arith.andi %1240, %1249 : vector<20x36xi1>
    %1251 = arith.ori %1231, %1250 : vector<20x36xi1>
    %1252 = arith.extui %1251 : vector<20x36xi1> to vector<20x36xi32>
    %1253 = arith.sitofp %1252 : vector<20x36xi32> to vector<20x36xf32>
    %cst_247 = arith.constant dense<0.000000e+00> : vector<18x20xf32>
    %1254 = tpu.matmul %1210, %1195, %cst_247 {dimension_numbers = #tpu.dot_dimension_numbers<[1], [0], [0], [1], [0, 0, 1, 1], [], []>} : vector<18x8xf32>, vector<8x20xf32>, vector<18x20xf32> -> vector<18x20xf32>
    %cst_248 = arith.constant dense<0.000000e+00> : vector<18x36xf32>
    %1255 = tpu.matmul %1254, %1253, %cst_248 {dimension_numbers = #tpu.dot_dimension_numbers<[1], [0], [0], [1], [0, 0, 1, 1], [], []>} : vector<18x20xf32>, vector<20x36xf32>, vector<18x36xf32> -> vector<18x36xf32>
    %cst_249 = arith.constant dense<0.000000e+00> : vector<18x36xf32>
    %1256 = tpu.matmul %1255, %165, %cst_249 {dimension_numbers = #tpu.dot_dimension_numbers<[1], [0], [0], [1], [0, 0, 1, 1], [], []>} : vector<18x36xf32>, vector<36x36xf32>, vector<18x36xf32> -> vector<18x36xf32>
    %cst_250 = arith.constant dense<0.000000e+00> : vector<18x36xf32>
    %1257 = tpu.matmul %1255, %175, %cst_250 {dimension_numbers = #tpu.dot_dimension_numbers<[1], [0], [0], [1], [0, 0, 1, 1], [], []>} : vector<18x36xf32>, vector<36x36xf32>, vector<18x36xf32> -> vector<18x36xf32>
    %c90 = arith.constant 90 : index
    %1258 = memref.load %arg0[%c90] : memref<117xf32, #tpu.memory_space<smem>>
    %1259 = vector.extract_strided_slice %1256 {offsets = [0, 0], sizes = [16, 36], strides = [1, 1]} : vector<18x36xf32> to vector<16x36xf32>
    %1260 = vector.broadcast %1258 : f32 to vector<16x36xf32>
    %1261 = arith.mulf %1260, %1259 : vector<16x36xf32>
    %c91 = arith.constant 91 : index
    %1262 = memref.load %arg0[%c91] : memref<117xf32, #tpu.memory_space<smem>>
    %1263 = vector.extract_strided_slice %1255 {offsets = [0, 0], sizes = [16, 36], strides = [1, 1]} : vector<18x36xf32> to vector<16x36xf32>
    %1264 = vector.broadcast %1262 : f32 to vector<16x36xf32>
    %1265 = arith.mulf %1264, %1263 : vector<16x36xf32>
    %c92 = arith.constant 92 : index
    %1266 = memref.load %arg0[%c92] : memref<117xf32, #tpu.memory_space<smem>>
    %1267 = vector.extract_strided_slice %1257 {offsets = [0, 0], sizes = [16, 36], strides = [1, 1]} : vector<18x36xf32> to vector<16x36xf32>
    %1268 = vector.broadcast %1266 : f32 to vector<16x36xf32>
    %1269 = arith.mulf %1268, %1267 : vector<16x36xf32>
    %1270 = arith.addf %1261, %1265 : vector<16x36xf32>
    %1271 = arith.addf %1270, %1269 : vector<16x36xf32>
    %c93 = arith.constant 93 : index
    %1272 = memref.load %arg0[%c93] : memref<117xf32, #tpu.memory_space<smem>>
    %1273 = vector.extract_strided_slice %1256 {offsets = [1, 0], sizes = [16, 36], strides = [1, 1]} : vector<18x36xf32> to vector<16x36xf32>
    %1274 = vector.broadcast %1272 : f32 to vector<16x36xf32>
    %1275 = arith.mulf %1274, %1273 : vector<16x36xf32>
    %c94 = arith.constant 94 : index
    %1276 = memref.load %arg0[%c94] : memref<117xf32, #tpu.memory_space<smem>>
    %1277 = vector.extract_strided_slice %1255 {offsets = [1, 0], sizes = [16, 36], strides = [1, 1]} : vector<18x36xf32> to vector<16x36xf32>
    %1278 = vector.broadcast %1276 : f32 to vector<16x36xf32>
    %1279 = arith.mulf %1278, %1277 : vector<16x36xf32>
    %c95 = arith.constant 95 : index
    %1280 = memref.load %arg0[%c95] : memref<117xf32, #tpu.memory_space<smem>>
    %1281 = vector.extract_strided_slice %1257 {offsets = [1, 0], sizes = [16, 36], strides = [1, 1]} : vector<18x36xf32> to vector<16x36xf32>
    %1282 = vector.broadcast %1280 : f32 to vector<16x36xf32>
    %1283 = arith.mulf %1282, %1281 : vector<16x36xf32>
    %1284 = arith.addf %1275, %1279 : vector<16x36xf32>
    %1285 = arith.addf %1284, %1283 : vector<16x36xf32>
    %c96 = arith.constant 96 : index
    %1286 = memref.load %arg0[%c96] : memref<117xf32, #tpu.memory_space<smem>>
    %1287 = vector.extract_strided_slice %1256 {offsets = [2, 0], sizes = [16, 36], strides = [1, 1]} : vector<18x36xf32> to vector<16x36xf32>
    %1288 = vector.broadcast %1286 : f32 to vector<16x36xf32>
    %1289 = arith.mulf %1288, %1287 : vector<16x36xf32>
    %c97 = arith.constant 97 : index
    %1290 = memref.load %arg0[%c97] : memref<117xf32, #tpu.memory_space<smem>>
    %1291 = vector.extract_strided_slice %1255 {offsets = [2, 0], sizes = [16, 36], strides = [1, 1]} : vector<18x36xf32> to vector<16x36xf32>
    %1292 = vector.broadcast %1290 : f32 to vector<16x36xf32>
    %1293 = arith.mulf %1292, %1291 : vector<16x36xf32>
    %c98 = arith.constant 98 : index
    %1294 = memref.load %arg0[%c98] : memref<117xf32, #tpu.memory_space<smem>>
    %1295 = vector.extract_strided_slice %1257 {offsets = [2, 0], sizes = [16, 36], strides = [1, 1]} : vector<18x36xf32> to vector<16x36xf32>
    %1296 = vector.broadcast %1294 : f32 to vector<16x36xf32>
    %1297 = arith.mulf %1296, %1295 : vector<16x36xf32>
    %1298 = arith.addf %1289, %1293 : vector<16x36xf32>
    %1299 = arith.addf %1298, %1297 : vector<16x36xf32>
    %1300 = arith.addf %1271, %1285 : vector<16x36xf32>
    %1301 = arith.addf %1300, %1299 : vector<16x36xf32>
    %c20_251 = arith.constant 20 : index
    %1302 = memref.load %arg1[%c20_251] : memref<26xf32, #tpu.memory_space<smem>>
    %1303 = vector.broadcast %1302 : f32 to vector<16x36xf32>
    %1304 = arith.mulf %1301, %1303 : vector<16x36xf32>
    %c21_252 = arith.constant 21 : index
    %1305 = memref.load %arg1[%c21_252] : memref<26xf32, #tpu.memory_space<smem>>
    %1306 = vector.broadcast %1305 : f32 to vector<16x36xf32>
    %1307 = arith.addf %1304, %1306 : vector<16x36xf32>
    %cst_253 = arith.constant 0.000000e+00 : f32
    %1308 = vector.broadcast %cst_253 : f32 to vector<16x36xf32>
    %1309 = arith.maximumf %1307, %1308 : vector<16x36xf32>
    %1310 = tpu.iota {dimensions = array<i32: 0>} : vector<34x16xi32>
    %1311 = tpu.iota {dimensions = array<i32: 1>} : vector<34x16xi32>
    %c2_i32_254 = arith.constant 2 : i32
    %1312 = vector.broadcast %c2_i32_254 : i32 to vector<34x16xi32>
    %1313 = arith.muli %1312, %1311 : vector<34x16xi32>
    %c1_i32_255 = arith.constant 1 : i32
    %1314 = vector.broadcast %c1_i32_255 : i32 to vector<34x16xi32>
    %1315 = arith.addi %1313, %1314 : vector<34x16xi32>
    %1316 = arith.cmpi eq, %1310, %1315 : vector<34x16xi32>
    %c2_i32_256 = arith.constant 2 : i32
    %1317 = vector.broadcast %c2_i32_256 : i32 to vector<34x16xi32>
    %1318 = arith.muli %1317, %1311 : vector<34x16xi32>
    %c2_i32_257 = arith.constant 2 : i32
    %1319 = vector.broadcast %c2_i32_257 : i32 to vector<34x16xi32>
    %1320 = arith.addi %1318, %1319 : vector<34x16xi32>
    %1321 = arith.cmpi eq, %1310, %1320 : vector<34x16xi32>
    %1322 = arith.ori %1316, %1321 : vector<34x16xi1>
    %1323 = arith.extui %1322 : vector<34x16xi1> to vector<34x16xi32>
    %1324 = arith.sitofp %1323 : vector<34x16xi32> to vector<34x16xf32>
    %1325 = tpu.iota {dimensions = array<i32: 0>} : vector<36x68xi32>
    %1326 = tpu.iota {dimensions = array<i32: 1>} : vector<36x68xi32>
    %c0_i32_258 = arith.constant 0 : i32
    %1327 = vector.broadcast %c0_i32_258 : i32 to vector<36x68xi32>
    %1328 = arith.subi %1325, %1327 : vector<36x68xi32>
    %c0_i32_259 = arith.constant 0 : i32
    %1329 = vector.broadcast %c0_i32_259 : i32 to vector<36x68xi32>
    %1330 = arith.subi %1326, %1329 : vector<36x68xi32>
    %c1_i32_260 = arith.constant 1 : i32
    %1331 = vector.broadcast %c1_i32_260 : i32 to vector<36x68xi32>
    %1332 = arith.cmpi sge, %1328, %1331 : vector<36x68xi32>
    %c16_i32_261 = arith.constant 16 : i32
    %1333 = vector.broadcast %c16_i32_261 : i32 to vector<36x68xi32>
    %1334 = arith.cmpi sle, %1328, %1333 : vector<36x68xi32>
    %1335 = arith.andi %1332, %1334 : vector<36x68xi1>
    %c2_i32_262 = arith.constant 2 : i32
    %1336 = vector.broadcast %c2_i32_262 : i32 to vector<36x68xi32>
    %1337 = arith.muli %1336, %1328 : vector<36x68xi32>
    %c1_i32_263 = arith.constant 1 : i32
    %1338 = vector.broadcast %c1_i32_263 : i32 to vector<36x68xi32>
    %1339 = arith.subi %1337, %1338 : vector<36x68xi32>
    %1340 = arith.cmpi eq, %1330, %1339 : vector<36x68xi32>
    %c2_i32_264 = arith.constant 2 : i32
    %1341 = vector.broadcast %c2_i32_264 : i32 to vector<36x68xi32>
    %1342 = arith.muli %1341, %1328 : vector<36x68xi32>
    %1343 = arith.cmpi eq, %1330, %1342 : vector<36x68xi32>
    %1344 = arith.ori %1340, %1343 : vector<36x68xi1>
    %1345 = arith.andi %1335, %1344 : vector<36x68xi1>
    %c18_i32_265 = arith.constant 18 : i32
    %1346 = vector.broadcast %c18_i32_265 : i32 to vector<36x68xi32>
    %1347 = arith.subi %1325, %1346 : vector<36x68xi32>
    %c34_i32_266 = arith.constant 34 : i32
    %1348 = vector.broadcast %c34_i32_266 : i32 to vector<36x68xi32>
    %1349 = arith.subi %1326, %1348 : vector<36x68xi32>
    %c1_i32_267 = arith.constant 1 : i32
    %1350 = vector.broadcast %c1_i32_267 : i32 to vector<36x68xi32>
    %1351 = arith.cmpi sge, %1347, %1350 : vector<36x68xi32>
    %c16_i32_268 = arith.constant 16 : i32
    %1352 = vector.broadcast %c16_i32_268 : i32 to vector<36x68xi32>
    %1353 = arith.cmpi sle, %1347, %1352 : vector<36x68xi32>
    %1354 = arith.andi %1351, %1353 : vector<36x68xi1>
    %c2_i32_269 = arith.constant 2 : i32
    %1355 = vector.broadcast %c2_i32_269 : i32 to vector<36x68xi32>
    %1356 = arith.muli %1355, %1347 : vector<36x68xi32>
    %c1_i32_270 = arith.constant 1 : i32
    %1357 = vector.broadcast %c1_i32_270 : i32 to vector<36x68xi32>
    %1358 = arith.subi %1356, %1357 : vector<36x68xi32>
    %1359 = arith.cmpi eq, %1349, %1358 : vector<36x68xi32>
    %c2_i32_271 = arith.constant 2 : i32
    %1360 = vector.broadcast %c2_i32_271 : i32 to vector<36x68xi32>
    %1361 = arith.muli %1360, %1347 : vector<36x68xi32>
    %1362 = arith.cmpi eq, %1349, %1361 : vector<36x68xi32>
    %1363 = arith.ori %1359, %1362 : vector<36x68xi1>
    %1364 = arith.andi %1354, %1363 : vector<36x68xi1>
    %1365 = arith.ori %1345, %1364 : vector<36x68xi1>
    %1366 = arith.extui %1365 : vector<36x68xi1> to vector<36x68xi32>
    %1367 = arith.sitofp %1366 : vector<36x68xi32> to vector<36x68xf32>
    %cst_272 = arith.constant dense<0.000000e+00> : vector<34x36xf32>
    %1368 = tpu.matmul %1324, %1309, %cst_272 {dimension_numbers = #tpu.dot_dimension_numbers<[1], [0], [0], [1], [0, 0, 1, 1], [], []>} : vector<34x16xf32>, vector<16x36xf32>, vector<34x36xf32> -> vector<34x36xf32>
    %cst_273 = arith.constant dense<0.000000e+00> : vector<34x68xf32>
    %1369 = tpu.matmul %1368, %1367, %cst_273 {dimension_numbers = #tpu.dot_dimension_numbers<[1], [0], [0], [1], [0, 0, 1, 1], [], []>} : vector<34x36xf32>, vector<36x68xf32>, vector<34x68xf32> -> vector<34x68xf32>
    %cst_274 = arith.constant dense<0.000000e+00> : vector<34x68xf32>
    %1370 = tpu.matmul %1369, %25, %cst_274 {dimension_numbers = #tpu.dot_dimension_numbers<[1], [0], [0], [1], [0, 0, 1, 1], [], []>} : vector<34x68xf32>, vector<68x68xf32>, vector<34x68xf32> -> vector<34x68xf32>
    %cst_275 = arith.constant dense<0.000000e+00> : vector<34x68xf32>
    %1371 = tpu.matmul %1369, %35, %cst_275 {dimension_numbers = #tpu.dot_dimension_numbers<[1], [0], [0], [1], [0, 0, 1, 1], [], []>} : vector<34x68xf32>, vector<68x68xf32>, vector<34x68xf32> -> vector<34x68xf32>
    %c99 = arith.constant 99 : index
    %1372 = memref.load %arg0[%c99] : memref<117xf32, #tpu.memory_space<smem>>
    %1373 = vector.extract_strided_slice %1370 {offsets = [0, 0], sizes = [32, 68], strides = [1, 1]} : vector<34x68xf32> to vector<32x68xf32>
    %1374 = vector.broadcast %1372 : f32 to vector<32x68xf32>
    %1375 = arith.mulf %1374, %1373 : vector<32x68xf32>
    %c100 = arith.constant 100 : index
    %1376 = memref.load %arg0[%c100] : memref<117xf32, #tpu.memory_space<smem>>
    %1377 = vector.extract_strided_slice %1369 {offsets = [0, 0], sizes = [32, 68], strides = [1, 1]} : vector<34x68xf32> to vector<32x68xf32>
    %1378 = vector.broadcast %1376 : f32 to vector<32x68xf32>
    %1379 = arith.mulf %1378, %1377 : vector<32x68xf32>
    %c101 = arith.constant 101 : index
    %1380 = memref.load %arg0[%c101] : memref<117xf32, #tpu.memory_space<smem>>
    %1381 = vector.extract_strided_slice %1371 {offsets = [0, 0], sizes = [32, 68], strides = [1, 1]} : vector<34x68xf32> to vector<32x68xf32>
    %1382 = vector.broadcast %1380 : f32 to vector<32x68xf32>
    %1383 = arith.mulf %1382, %1381 : vector<32x68xf32>
    %1384 = arith.addf %1375, %1379 : vector<32x68xf32>
    %1385 = arith.addf %1384, %1383 : vector<32x68xf32>
    %c102 = arith.constant 102 : index
    %1386 = memref.load %arg0[%c102] : memref<117xf32, #tpu.memory_space<smem>>
    %1387 = vector.extract_strided_slice %1370 {offsets = [1, 0], sizes = [32, 68], strides = [1, 1]} : vector<34x68xf32> to vector<32x68xf32>
    %1388 = vector.broadcast %1386 : f32 to vector<32x68xf32>
    %1389 = arith.mulf %1388, %1387 : vector<32x68xf32>
    %c103 = arith.constant 103 : index
    %1390 = memref.load %arg0[%c103] : memref<117xf32, #tpu.memory_space<smem>>
    %1391 = vector.extract_strided_slice %1369 {offsets = [1, 0], sizes = [32, 68], strides = [1, 1]} : vector<34x68xf32> to vector<32x68xf32>
    %1392 = vector.broadcast %1390 : f32 to vector<32x68xf32>
    %1393 = arith.mulf %1392, %1391 : vector<32x68xf32>
    %c104 = arith.constant 104 : index
    %1394 = memref.load %arg0[%c104] : memref<117xf32, #tpu.memory_space<smem>>
    %1395 = vector.extract_strided_slice %1371 {offsets = [1, 0], sizes = [32, 68], strides = [1, 1]} : vector<34x68xf32> to vector<32x68xf32>
    %1396 = vector.broadcast %1394 : f32 to vector<32x68xf32>
    %1397 = arith.mulf %1396, %1395 : vector<32x68xf32>
    %1398 = arith.addf %1389, %1393 : vector<32x68xf32>
    %1399 = arith.addf %1398, %1397 : vector<32x68xf32>
    %c105 = arith.constant 105 : index
    %1400 = memref.load %arg0[%c105] : memref<117xf32, #tpu.memory_space<smem>>
    %1401 = vector.extract_strided_slice %1370 {offsets = [2, 0], sizes = [32, 68], strides = [1, 1]} : vector<34x68xf32> to vector<32x68xf32>
    %1402 = vector.broadcast %1400 : f32 to vector<32x68xf32>
    %1403 = arith.mulf %1402, %1401 : vector<32x68xf32>
    %c106 = arith.constant 106 : index
    %1404 = memref.load %arg0[%c106] : memref<117xf32, #tpu.memory_space<smem>>
    %1405 = vector.extract_strided_slice %1369 {offsets = [2, 0], sizes = [32, 68], strides = [1, 1]} : vector<34x68xf32> to vector<32x68xf32>
    %1406 = vector.broadcast %1404 : f32 to vector<32x68xf32>
    %1407 = arith.mulf %1406, %1405 : vector<32x68xf32>
    %c107 = arith.constant 107 : index
    %1408 = memref.load %arg0[%c107] : memref<117xf32, #tpu.memory_space<smem>>
    %1409 = vector.extract_strided_slice %1371 {offsets = [2, 0], sizes = [32, 68], strides = [1, 1]} : vector<34x68xf32> to vector<32x68xf32>
    %1410 = vector.broadcast %1408 : f32 to vector<32x68xf32>
    %1411 = arith.mulf %1410, %1409 : vector<32x68xf32>
    %1412 = arith.addf %1403, %1407 : vector<32x68xf32>
    %1413 = arith.addf %1412, %1411 : vector<32x68xf32>
    %1414 = arith.addf %1385, %1399 : vector<32x68xf32>
    %1415 = arith.addf %1414, %1413 : vector<32x68xf32>
    %c22_276 = arith.constant 22 : index
    %1416 = memref.load %arg1[%c22_276] : memref<26xf32, #tpu.memory_space<smem>>
    %1417 = vector.broadcast %1416 : f32 to vector<32x68xf32>
    %1418 = arith.mulf %1415, %1417 : vector<32x68xf32>
    %c23_277 = arith.constant 23 : index
    %1419 = memref.load %arg1[%c23_277] : memref<26xf32, #tpu.memory_space<smem>>
    %1420 = vector.broadcast %1419 : f32 to vector<32x68xf32>
    %1421 = arith.addf %1418, %1420 : vector<32x68xf32>
    %cst_278 = arith.constant 0.000000e+00 : f32
    %1422 = vector.broadcast %cst_278 : f32 to vector<32x68xf32>
    %1423 = arith.maximumf %1421, %1422 : vector<32x68xf32>
    %1424 = tpu.iota {dimensions = array<i32: 0>} : vector<34x32xi32>
    %1425 = tpu.iota {dimensions = array<i32: 1>} : vector<34x32xi32>
    %c1_i32_279 = arith.constant 1 : i32
    %1426 = vector.broadcast %c1_i32_279 : i32 to vector<34x32xi32>
    %1427 = arith.addi %1425, %1426 : vector<34x32xi32>
    %1428 = arith.cmpi eq, %1424, %1427 : vector<34x32xi32>
    %1429 = arith.extui %1428 : vector<34x32xi1> to vector<34x32xi32>
    %1430 = arith.sitofp %1429 : vector<34x32xi32> to vector<34x32xf32>
    %1431 = arith.extui %21 : vector<1x68xi1> to vector<1x68xi32>
    %1432 = arith.sitofp %1431 : vector<1x68xi32> to vector<1x68xf32>
    %1433 = vector.broadcast %1432 : vector<1x68xf32> to vector<32x68xf32>
    %1434 = arith.mulf %1423, %1433 : vector<32x68xf32>
    %cst_280 = arith.constant dense<0.000000e+00> : vector<34x68xf32>
    %1435 = tpu.matmul %1430, %1434, %cst_280 {dimension_numbers = #tpu.dot_dimension_numbers<[1], [0], [0], [1], [0, 0, 1, 1], [], []>} : vector<34x32xf32>, vector<32x68xf32>, vector<34x68xf32> -> vector<34x68xf32>
    %cst_281 = arith.constant dense<0.000000e+00> : vector<34x68xf32>
    %1436 = tpu.matmul %1435, %25, %cst_281 {dimension_numbers = #tpu.dot_dimension_numbers<[1], [0], [0], [1], [0, 0, 1, 1], [], []>} : vector<34x68xf32>, vector<68x68xf32>, vector<34x68xf32> -> vector<34x68xf32>
    %cst_282 = arith.constant dense<0.000000e+00> : vector<34x68xf32>
    %1437 = tpu.matmul %1435, %35, %cst_282 {dimension_numbers = #tpu.dot_dimension_numbers<[1], [0], [0], [1], [0, 0, 1, 1], [], []>} : vector<34x68xf32>, vector<68x68xf32>, vector<34x68xf32> -> vector<34x68xf32>
    %c108 = arith.constant 108 : index
    %1438 = memref.load %arg0[%c108] : memref<117xf32, #tpu.memory_space<smem>>
    %1439 = vector.extract_strided_slice %1436 {offsets = [0, 0], sizes = [32, 68], strides = [1, 1]} : vector<34x68xf32> to vector<32x68xf32>
    %1440 = vector.broadcast %1438 : f32 to vector<32x68xf32>
    %1441 = arith.mulf %1440, %1439 : vector<32x68xf32>
    %c109 = arith.constant 109 : index
    %1442 = memref.load %arg0[%c109] : memref<117xf32, #tpu.memory_space<smem>>
    %1443 = vector.extract_strided_slice %1435 {offsets = [0, 0], sizes = [32, 68], strides = [1, 1]} : vector<34x68xf32> to vector<32x68xf32>
    %1444 = vector.broadcast %1442 : f32 to vector<32x68xf32>
    %1445 = arith.mulf %1444, %1443 : vector<32x68xf32>
    %c110 = arith.constant 110 : index
    %1446 = memref.load %arg0[%c110] : memref<117xf32, #tpu.memory_space<smem>>
    %1447 = vector.extract_strided_slice %1437 {offsets = [0, 0], sizes = [32, 68], strides = [1, 1]} : vector<34x68xf32> to vector<32x68xf32>
    %1448 = vector.broadcast %1446 : f32 to vector<32x68xf32>
    %1449 = arith.mulf %1448, %1447 : vector<32x68xf32>
    %1450 = arith.addf %1441, %1445 : vector<32x68xf32>
    %1451 = arith.addf %1450, %1449 : vector<32x68xf32>
    %c111 = arith.constant 111 : index
    %1452 = memref.load %arg0[%c111] : memref<117xf32, #tpu.memory_space<smem>>
    %1453 = vector.extract_strided_slice %1436 {offsets = [1, 0], sizes = [32, 68], strides = [1, 1]} : vector<34x68xf32> to vector<32x68xf32>
    %1454 = vector.broadcast %1452 : f32 to vector<32x68xf32>
    %1455 = arith.mulf %1454, %1453 : vector<32x68xf32>
    %c112 = arith.constant 112 : index
    %1456 = memref.load %arg0[%c112] : memref<117xf32, #tpu.memory_space<smem>>
    %1457 = vector.extract_strided_slice %1435 {offsets = [1, 0], sizes = [32, 68], strides = [1, 1]} : vector<34x68xf32> to vector<32x68xf32>
    %1458 = vector.broadcast %1456 : f32 to vector<32x68xf32>
    %1459 = arith.mulf %1458, %1457 : vector<32x68xf32>
    %c113 = arith.constant 113 : index
    %1460 = memref.load %arg0[%c113] : memref<117xf32, #tpu.memory_space<smem>>
    %1461 = vector.extract_strided_slice %1437 {offsets = [1, 0], sizes = [32, 68], strides = [1, 1]} : vector<34x68xf32> to vector<32x68xf32>
    %1462 = vector.broadcast %1460 : f32 to vector<32x68xf32>
    %1463 = arith.mulf %1462, %1461 : vector<32x68xf32>
    %1464 = arith.addf %1455, %1459 : vector<32x68xf32>
    %1465 = arith.addf %1464, %1463 : vector<32x68xf32>
    %c114 = arith.constant 114 : index
    %1466 = memref.load %arg0[%c114] : memref<117xf32, #tpu.memory_space<smem>>
    %1467 = vector.extract_strided_slice %1436 {offsets = [2, 0], sizes = [32, 68], strides = [1, 1]} : vector<34x68xf32> to vector<32x68xf32>
    %1468 = vector.broadcast %1466 : f32 to vector<32x68xf32>
    %1469 = arith.mulf %1468, %1467 : vector<32x68xf32>
    %c115 = arith.constant 115 : index
    %1470 = memref.load %arg0[%c115] : memref<117xf32, #tpu.memory_space<smem>>
    %1471 = vector.extract_strided_slice %1435 {offsets = [2, 0], sizes = [32, 68], strides = [1, 1]} : vector<34x68xf32> to vector<32x68xf32>
    %1472 = vector.broadcast %1470 : f32 to vector<32x68xf32>
    %1473 = arith.mulf %1472, %1471 : vector<32x68xf32>
    %c116 = arith.constant 116 : index
    %1474 = memref.load %arg0[%c116] : memref<117xf32, #tpu.memory_space<smem>>
    %1475 = vector.extract_strided_slice %1437 {offsets = [2, 0], sizes = [32, 68], strides = [1, 1]} : vector<34x68xf32> to vector<32x68xf32>
    %1476 = vector.broadcast %1474 : f32 to vector<32x68xf32>
    %1477 = arith.mulf %1476, %1475 : vector<32x68xf32>
    %1478 = arith.addf %1469, %1473 : vector<32x68xf32>
    %1479 = arith.addf %1478, %1477 : vector<32x68xf32>
    %1480 = arith.addf %1451, %1465 : vector<32x68xf32>
    %1481 = arith.addf %1480, %1479 : vector<32x68xf32>
    %c24_283 = arith.constant 24 : index
    %1482 = memref.load %arg1[%c24_283] : memref<26xf32, #tpu.memory_space<smem>>
    %1483 = vector.broadcast %1482 : f32 to vector<32x68xf32>
    %1484 = arith.mulf %1481, %1483 : vector<32x68xf32>
    %c25_284 = arith.constant 25 : index
    %1485 = memref.load %arg1[%c25_284] : memref<26xf32, #tpu.memory_space<smem>>
    %1486 = vector.broadcast %1485 : f32 to vector<32x68xf32>
    %1487 = arith.addf %1484, %1486 : vector<32x68xf32>
    %cst_285 = arith.constant 0.000000e+00 : f32
    %1488 = vector.broadcast %cst_285 : f32 to vector<32x68xf32>
    %1489 = arith.maximumf %1487, %1488 : vector<32x68xf32>
    %1490 = vector.broadcast %1432 : vector<1x68xf32> to vector<32x68xf32>
    %1491 = arith.mulf %1489, %1490 : vector<32x68xf32>
    %1492 = vector.shape_cast %1491 : vector<32x68xf32> to vector<1x32x68xf32>
    %cst_286 = arith.constant dense<0xFF800000> : vector<1xf32>
    %1493 = vector.multi_reduction <maximumf>, %1492, %cst_286 [1, 2] : vector<1x32x68xf32> to vector<1xf32>
    %1494 = vector.shape_cast %1493 : vector<1xf32> to vector<1x1x1xf32>
    %1495 = vector.extract %1494[0, 0, 0] : f32 from vector<1x1x1xf32>
    %cst_287 = arith.constant 1.000000e+00 : f32
    %1496 = arith.divf %cst_287, %1495 : f32
    %1497 = vector.broadcast %1496 : f32 to vector<32x68xf32>
    %1498 = arith.mulf %1491, %1497 : vector<32x68xf32>
    %c0_288 = arith.constant 0 : index
    %c0_289 = arith.constant 0 : index
    %1499 = vector.load %arg3[%c0_288, %c0_289] : memref<32x68xf32, #tpu.memory_space<vmem>>, vector<32x68xf32>
    tpu.vector_store %arg3[%c0_288, %c0_289], %1498 {strides = array<i32>} : memref<32x68xf32, #tpu.memory_space<vmem>>, vector<32x68xf32>,
    return
  }
}

</mosaic_0001>

<bundles_post_ra>
// kernel: forward.1
= control target key start
LH: loop header
LB: loop body
LE: loop exit
PB: predicated region body
PF: predicated region fallthrough
CT: control target
= control target key end

     0   :  { %8 = vsyncpa [#allocation3], 0  ;;  %s9425_s0 = inlined_call_operand.vmem [shape: f32[117], index: 0, kind: input, shape index: {}]   ;;  %s9426_s1 = inlined_call_operand.vmem [shape: f32[26], index: 1, kind: input, shape index: {}]   ;;  %s9427_s2 = inlined_call_operand.vmem [shape: f32[34,68], index: 2, kind: input, shape index: {}]   ;;  %s9428_s3 = inlined_call_operand.vmem [shape: f32[32,68], index: 3, kind: output, shape index: {}]  }
   0x1   :  { %s16_s14 = sshll.u32 %s9425_s0, 4  ;;  %s17_s14 = int_to_ptr.vmem [resolvable:$true] %s16_s14 }
   0x2   :  { %9 = vsyncpa [#allocation5], 0  ;;  %s26_s17 = sshll.u32 %s9426_s1, 4  ;;  %s7443_s18 = scalar_lea.vmem %s17_s14, 16  ;;  %s27_s17 = int_to_ptr.vmem [resolvable:$true] %s26_s17 }
   0x3   :  { %p7444_p0 = scmp.ne.s32.totalorder %s17_s14, %s7443_s18  ;;  %p7448_p1 = scmp.lt.s32.totalorder %s17_s14, %s17_s14 }
   0x4   :  { %p7449_p2 = scmp.lt.s32.totalorder %s7443_s18, %s7443_s18 }
   0x6   :  { %p7450_p3 = por %p7449_p2, %p7448_p1 }
   0x8   :  { %p7451_p4 = pnand %p7450_p3, %p7444_p0 }
   0xa   :  { %7454 = shalt.err (!%p7451_p4)
}
   0xb   :  { %s7471_s19 = smov [#allocation2]   ;;  %s7455_s20 = scalar_lea.vmem %s27_s17, 16 }
   0xc   :  { %19 = dma.vmem_to_smem %s17_s14, 16, %s7471_s19, [#allocation3]  }
   0xd   :  { %p7456_p5 = scmp.ne.s32.totalorder %s27_s17, %s7455_s20  ;;  %p7460_p6 = scmp.lt.s32.totalorder %s27_s17, %s27_s17 }
   0xe   :  { %p7461_p7 = scmp.lt.s32.totalorder %s7455_s20, %s7455_s20 }
  0x10   :  { %p7462_p8 = por %p7461_p7, %p7460_p6 }
  0x12   :  { %p7463_p9 = pnand %p7462_p8, %p7456_p5 }
  0x14   :  { %7466 = shalt.err (!%p7463_p9)
}
  0x15   :  { %s7472_s0 = smov [#allocation4]  }
  0x16   :  { %29 = dma.vmem_to_smem %s27_s17, 16, %s7472_s0, [#allocation5]  }
  0x17   :  { %7467 = dma.done.wait [#allocation3], 16  }
  0x18   :  { %7468 = vsyncadd [#allocation3], 4294967280 }
  0x19   :  { %7469 = dma.done.wait [#allocation5], 16  }
  0x1a   :  { %7470 = vsyncadd [#allocation5], 4294967280 }
  0x1b   :  { %38 = sfence }
  0x1c   :  { %v44_v0 = vlaneseq  ;;  %v9449_v1 = vmov 0.0|0.0   ;;  %vm9436_vm0 = vmmov 0   ;;  %v9447_v4 = vmov 0.0   ;;  %v39_v29 = vld [vmem:[%s9427_s2] sm:$0xff]  ;;  %v40_v32 = vld [vmem:[%s9427_s2 + $0x8] sm:$0xff]  ;;  %v41_v33 = vld [vmem:[%s9427_s2 + $0x10] sm:$0xff] }
  0x1d   :  { %7226 = vmatprep.subr.bf16.mxu0 %v9449_v1  ;;  %7238 = vmatprep.subr.bf16.mxu1 %v9449_v1  ;;  %v9546_v8 = vmov 0  ;;  %v9548_v9 = vmov 0  ;;  %v9551_v11 = vmov 0  ;;  %v9445_v13 = vmov 1.0|1.0   ;;  %v42_v34 = vld [vmem:[%s9427_s2 + $0x18] sm:$0xff] }
  0x1e   :  { %v7508_v2 = vshrl.u32 %v44_v0, 7  ;;  %v7510_v3 = vand.u32 127, %v44_v0  ;;  %6636 = vmatprep.mubr.msk.f32.mxu0 %vm9436_vm0, %v9447_v4  ;;  %6669 = vmatprep.mubr.msk.f32.mxu1 %vm9436_vm0, %v9447_v4  ;;  %v9554_v14 = vmov 0  ;;  %v9556_v16 = vmov 0  ;;  %v7782_v35 = vld [vmem:[%s9427_s2 + $0x20] sm:$0x3] }
  0x1f   :  { %v9558_v17 = vmov 0  ;;  %v9561_v18 = vmov 0  ;;  %v9564_v21 = vmov 0  ;;  %v9567_v24 = vmov 0  ;;  %s5878_s30 = sld [smem:[#allocation2 + $0x1]]  ;;  %s5881_s2 = sld [smem:[#allocation2 + $0x4]] }
  0x20   :  { %v7517_v5 = vadd.s32 8, %v7508_v2  ;;  %v7520_v6 = vadd.s32 4294967295, %v7510_v3  ;;  %vm9435_vm1 = vcmp.ge.s32.totalorder %v7510_v3, 1  ;;  %vm67_vm2 = vcmp.le.s32.totalorder %v7510_v3, 32  ;;  %s5884_s4 = sld [smem:[#allocation2 + $0x7]]  ;;  %s343_s5 = sld [smem:[#allocation2]] }
  0x21   :  { %v7525_v7 = vadd.s32 4294967262, %v7510_v3  ;;  %vm68_vm3 = vmand %vm9435_vm1, %vm67_vm2  ;;  %v7544_v10 = vadd.s32 1, %v7510_v3  ;;  %v7560_v12 = vadd.s32 16, %v7508_v2  ;;  %v7572_v15 = vadd.s32 24, %v7508_v2  ;;  %s5880_s6 = sld [smem:[#allocation2 + $0x3]]  ;;  %s5883_s7 = sld [smem:[#allocation2 + $0x6]] }
  0x22   :  { %vm7531_vm4 = vcmp.eq.s32.totalorder %v7508_v2, %v7520_v6  ;;  %vm9431_vm7 = vcmp.eq.s32.totalorder %v7517_v5, %v7520_v6  ;;  %v7616_v19 = vadd.s32 32, %v7508_v2  ;;  %v7624_v20 = vadd.s32 40, %v7508_v2  ;;  %s5879_s8 = sld [smem:[#allocation2 + $0x2]]  ;;  %s5882_s9 = sld [smem:[#allocation2 + $0x5]] }
  0x23   :  { %9545 = vst [vmem:[#allocation8_spill] sm:$0xff] %v7525_v7  ;;  %v9547_v8 = vsel %vm7531_vm4, 4294967295, %v9546_v8  ;;  %vm70_vm5 = vcmp.ge.s32.totalorder %v7525_v7, 1  ;;  %vm71_vm6 = vcmp.le.s32.totalorder %v7525_v7, 32  ;;  %vm7567_vm13 = vcmp.eq.s32.totalorder %v7508_v2, %v7544_v10  ;;  %s5885_s10 = sld [smem:[#allocation2 + $0x8]]  ;;  %s7809_s12 = sld [smem:[#allocation4 + $0x1]] }
  0x24   :  { %vm72_vm8 = vmand %vm70_vm5, %vm71_vm6  ;;  %v9555_v14 = vsel %vm7567_vm13, 4294967295, %v9554_v14  ;;  %vm7576_vm14 = vcmp.eq.s32.totalorder %v7517_v5, %v7544_v10  ;;  %vm9429_vm2 = vcmp.eq.s32.totalorder %v7560_v12, %v7520_v6  ;;  %vm9430_vm5 = vcmp.eq.s32.totalorder %v7572_v15, %v7520_v6  ;;  %s7801_s11 = sld [smem:[#allocation4]]  ;;  %s7478_s13 = smov 127  }
  0x25   :  { %vm7539_vm9 = vmor %vm68_vm3, %vm72_vm8  ;;  %v9557_v16 = vsel %vm7576_vm14, 4294967295, %v9556_v16  ;;  %v7656_v22 = vadd.s32 48, %v7508_v2  ;;  %v7664_v23 = vadd.s32 56, %v7508_v2  ;;  %v9570_v25 = vmov 0  ;;  %s8177_s14 = sld [smem:[#allocation2 + $0xa]]  ;;  %s5951_s15 = sld [smem:[#allocation2 + $0xd]] }
  0x26   :  { %v9549_v9 = vsel %vm7539_vm9, 4294967295, %v9548_v9  ;;  %vm76_vm10 = vmand %vm7531_vm4, %vm7539_vm9  ;;  %v7692_v26 = vadd.s32 64, %v7508_v2  ;;  %v9573_v27 = vmov 0  ;;  %v9576_v28 = vmov 0  ;;  %s8179_s16 = sld [smem:[#allocation2 + $0x9]]  ;;  %s5954_s17 = sld [smem:[#allocation2 + $0x10]] }
  0x27   :  { %9550 = vst [vmem:[#allocation9_spill] sm:$0xff] %v9549_v9  ;;  %vm77_vm11 = vmand %vm9431_vm7, %vm7539_vm9  ;;  %vm64_vm1 = vcmp.eq.s32.totalorder %v7664_v23, %v7520_v6  ;;  %v350_v36 = vstv %s5878_s30  ;;  %v377_v37 = vstv %s5881_s2  ;;  %v408_v38 = vstv %s5884_s4  ;;  %s5950_s18 = sld [smem:[#allocation2 + $0xc]]  ;;  %s5953_s19 = sld [smem:[#allocation2 + $0xf]] }
  0x28   :  { %vm7555_vm12 = vmpackc.low %vm77_vm11, %vm76_vm10  ;;  %v7795_v39 = vstv %s343_s5  ;;  %v7797_v40 = vstv %s5880_s6  ;;  %v7799_v41 = vstv %s5883_s7  ;;  %v351_v42 = vmul.f32 %v350_v36, %v39_v29  ;;  %s8181_s20 = sld [smem:[#allocation2 + $0xb]]  ;;  %s5952_s0 = sld [smem:[#allocation2 + $0xe]] }
  0x29   :  { %v9552_v11 = vsel %vm7555_vm12, 4294967295, %v9551_v11  ;;  %7228 = vmatpush3.bf16.msk.msra.mxu0 %vm7555_vm12, %v9445_v13  ;;  %vm223_vm15 = vmand %vm7567_vm13, %vm7539_vm9  ;;  %v378_v43 = vmul.f32 %v377_v37, %v39_v29  ;;  %v409_v44 = vmul.f32 %v408_v38, %v39_v29  ;;  %v7803_v45 = vstv %s5879_s8  ;;  %s5955_s1 = sld [smem:[#allocation2 + $0x11]]  ;;  %s8187_s21 = sld [smem:[#allocation4 + $0x2]] }
  0x2a   :  { %9553 = vst [vmem:[#allocation10_spill] sm:$0xff] %v9552_v11  ;;  %7229 = vmatprep.subr.bf16.mxu0 %v9449_v1  ;;  %vm224_vm3 = vmand %vm7576_vm14, %vm7539_vm9  ;;  %v7805_v47 = vstv %s5882_s9  ;;  %v7807_v48 = vstv %s5885_s10  ;;  %v352_v49 = vmul.f32 %v350_v36, %v40_v32  ;;  %v379_v50 = vmul.f32 %v377_v37, %v40_v32  ;;  %s5957_s22 = sld [smem:[#allocation4 + $0x3]]  ;;  %s5995_s23 = sld [smem:[#allocation2 + $0x16]] }
  0x2b   :  { %vm7593_vm6 = vmpackc.low %vm224_vm3, %vm223_vm15  ;;  %vm9432_vm15 = vcmp.eq.s32.totalorder %v7560_v12, %v7544_v10  ;;  %vm9433_vm3 = vcmp.eq.s32.totalorder %v7572_v15, %v7544_v10  ;;  %v410_v55 = vmul.f32 %v408_v38, %v40_v32  ;;  %v353_v57 = vmul.f32 %v350_v36, %v41_v33  ;;  %s5998_s24 = sld [smem:[#allocation2 + $0x19]]  ;;  %s5994_s25 = sld [smem:[#allocation2 + $0x15]] }
  0x2c   :  { %v9559_v17 = vsel %vm7593_vm6, 4294967295, %v9558_v17  ;;  %7240 = vmatpush3.bf16.msk.msra.mxu1 %vm7593_vm6, %v9445_v13  ;;  %vm78_vm8 = vmand %vm9429_vm2, %vm7539_vm9  ;;  %vm9467_vm6 = vcmask 1043456   ;;  %v380_v58 = vmul.f32 %v377_v37, %v41_v33  ;;  %v411_v59 = vmul.f32 %v408_v38, %v41_v33  ;;  %s5992_s26 = sld [smem:[#allocation2 + $0x13]]  ;;  %s5997_s27 = sld [smem:[#allocation2 + $0x18]] }
  0x2d   :  { %9560 = vst [vmem:[#allocation11_spill] sm:$0xff] %v9559_v17  ;;  %vm79_vm10 = vmand %vm9430_vm5, %vm7539_vm9  ;;  %7241 = vmatprep.subr.bf16.mxu1 %v9449_v1  ;;  %vm62_vm5 = vcmp.eq.s32.totalorder %v7624_v20, %v7520_v6  ;;  %v7814_v60 = vmul.f32 %v350_v36, %v42_v34  ;;  %s8358_s28 = sld [smem:[#allocation2 + $0x17]]  ;;  %s8360_s29 = sld [smem:[#allocation2 + $0x1a]] }
  0x2e   :  { %vm7611_vm11 = vmpackc.low %vm79_vm10, %vm78_vm8  ;;  %vm9434_vm10 = vcmp.eq.s32.totalorder %v7616_v19, %v7520_v6  ;;  %s5991_s30 = sld [smem:[#allocation2 + $0x12]]  ;;  %s5993_s2 = sld [smem:[#allocation2 + $0x14]] }
  0x2f   :  { %v9562_v18 = vsel %vm7611_vm11, 4294967295, %v9561_v18  ;;  %7231 = vmatpush3.bf16.msk.msra.mxu0 %vm7611_vm11, %v9445_v13  ;;  %vm225_vm8 = vmand %vm9432_vm15, %vm7539_vm9  ;;  %s6000_s4 = sld [smem:[#allocation4 + $0x4]]  ;;  %s6001_s5 = sld [smem:[#allocation4 + $0x5]] }
  0x30   :  { %9563 = vst [vmem:[#allocation12_spill] sm:$0xff] %v9562_v18  ;;  %7232 = vmatprep.subr.bf16.mxu0 %v9449_v1  ;;  %vm226_vm2 = vmand %vm9433_vm3, %vm7539_vm9  ;;  %s6024_s6 = sld [smem:[#allocation2 + $0x1c]]  ;;  %s6027_s7 = sld [smem:[#allocation2 + $0x1f]] }
  0x31   :  { %vm7643_vm7 = vmpackc.low %vm226_vm2, %vm225_vm8  ;;  %vm9438_vm2 = vcmp.eq.s32.totalorder %v7616_v19, %v7544_v10  ;;  %s6023_s8 = sld [smem:[#allocation2 + $0x1b]]  ;;  %s6030_s9 = sld [smem:[#allocation2 + $0x22]] }
  0x32   :  { %v9565_v21 = vsel %vm7643_vm7, 4294967295, %v9564_v21  ;;  %7243 = vmatpush3.bf16.msk.msra.mxu1 %vm7643_vm7, %v9445_v13  ;;  %vm80_vm15 = vmand %vm9434_vm10, %vm7539_vm9  ;;  %vm219_vm10 = vcmp.eq.s32.totalorder %v7624_v20, %v7544_v10  ;;  %s6026_s10 = sld [smem:[#allocation2 + $0x1e]] }
  0x33   :  { %9566 = vst [vmem:[#allocation13_spill] sm:$0xff] %v9565_v21  ;;  %vm81_vm3 = vmand %vm62_vm5, %vm7539_vm9  ;;  %7244 = vmatprep.subr.bf16.mxu1 %v9449_v1 }
  0x34   :  { %vm7666_vm8 = vmpackc.low %vm81_vm3, %vm80_vm15  ;;  %vm63_vm15 = vcmp.eq.s32.totalorder %v7656_v22, %v7520_v6 }
  0x35   :  { %v9568_v24 = vsel %vm7666_vm8, 4294967295, %v9567_v24  ;;  %7234 = vmatpush3.bf16.msk.msra.mxu0 %vm7666_vm8, %v9445_v13  ;;  %vm227_vm5 = vmand %vm9438_vm2, %vm7539_vm9 }
  0x36   :  { %9569 = vst [vmem:[#allocation14_spill] sm:$0xff] %v9568_v24  ;;  %7235 = vmatprep.subr.bf16.mxu0 %v9449_v1  ;;  %vm228_vm3 = vmand %vm219_vm10, %vm7539_vm9  ;;  %vm220_vm10 = vcmp.eq.s32.totalorder %v7656_v22, %v7544_v10 }
  0x37   :  { %vm7687_vm0 = vmpackc.low %vm228_vm3, %vm227_vm5  ;;  %vm221_vm5 = vcmp.eq.s32.totalorder %v7664_v23, %v7544_v10 }
  0x38   :  { %v9571_v25 = vsel %vm7687_vm0, 4294967295, %v9570_v25  ;;  %7246 = vmatpush3.bf16.msk.msra.mxu1 %vm7687_vm0, %v9445_v13  ;;  %vm82_vm2 = vmand %vm63_vm15, %vm7539_vm9  ;;  %vm65_vm0 = vcmp.eq.s32.totalorder %v7692_v26, %v7520_v6 }
  0x39   :  { %9572 = vst [vmem:[#allocation15_spill] sm:$0xff] %v9571_v25  ;;  %vm83_vm7 = vmand %vm64_vm1, %vm7539_vm9  ;;  %7247 = vmatprep.subr.bf16.mxu1 %v9449_v1 }
  0x3a   :  { %vm7706_vm3 = vmpackc.low %vm83_vm7, %vm82_vm2  ;;  %vm222_vm7 = vcmp.eq.s32.totalorder %v7692_v26, %v7544_v10 }
  0x3b   :  { %v9574_v27 = vsel %vm7706_vm3, 4294967295, %v9573_v27  ;;  %7237 = vmatpush3.bf16.msk.msra.mxu0 %vm7706_vm3, %v9445_v13  ;;  %vm229_vm15 = vmand %vm220_vm10, %vm7539_vm9 }
  0x3c   :  { %9575 = vst [vmem:[#allocation16_spill] sm:$0xff] %v9574_v27  ;;  %vm230_vm1 = vmand %vm221_vm5, %vm7539_vm9  ;;  %6634 = vmatprep.subr.mxu0 %v9447_v4  ;;  %vm9464_vm5 = vcmask 556032  }
  0x3d   :  { %vm7722_vm2 = vmpackc.low %vm230_vm1, %vm229_vm15  ;;  %vm9466_vm1 = vcmask 1046528  }
  0x3e   :  { %v9577_v28 = vsel %vm7722_vm2, 4294967295, %v9576_v28  ;;  %7249 = vmatpush3.bf16.msk.msra.mxu1 %vm7722_vm2, %v9445_v13  ;;  %vm84_vm10 = vmand %vm65_vm0, %vm7539_vm9  ;;  %vm9581_vm0 = vmmov 0  }
  0x3f   :  { %9578 = vst [vmem:[#allocation17_spill] sm:$0xff] %v9577_v28  ;;  %v7735_v30 = vsel %vm84_vm10, 1.0, %v9447_v4  ;;  %6667 = vmatprep.subr.mxu1 %v9447_v4  ;;  %vm231_vm15 = vmand %vm222_vm7, %vm7539_vm9  ;;  %vm9465_vm7 = vcmask 1045504   ;;  %vm7477_vm10 = vmmov 1  }
  0x40   :  { %9579 = vst [vmem:[#allocation18_spill] sm:$0xff] %v7735_v30  ;;  %6635 = vmatpush3.msk.msra.mxu0 %vm9467_vm6, %v7735_v30  ;;  %v7743_v31 = vsel %vm231_vm15, 1.0, %v9447_v4  ;;  %vm7881_vm15 = vmpackc.low %vm9466_vm1, %vm7477_vm10 }
  0x41   :  { %9580 = vst [vmem:[#allocation19_spill] sm:$0xff] %v7743_v31  ;;  %6637 = vmatmul.mubr.msk.f32.vlgmr.msra.gmra.mrb[0].mxu0 %vm9464_vm5, %v39_v29  ;;  %7250 = vmatprep.subr.bf16.mxu0 %v9449_v1 }
  0x42   :  { %6668 = vmatpush3.msk.msra.mxu1 %vm9467_vm6, %v7743_v31  ;;  %6639 = vmatprep.mubr.msk.f32.mxu0 %vm9581_vm0, %v9447_v4 }
  0x43   :  { %6670 = vmatmul.mubr.msk.f32.vlgmr.msra.gmra.mrb[0].mxu1 %vm9464_vm5, %v39_v29  ;;  %7257 = vmatprep.subr.bf16.mxu1 %v9449_v1 }
  0x44   :  { %6672 = vmatprep.mubr.msk.f32.mxu1 %vm9581_vm0, %v9447_v4 }
  0x45   :  { %6640 = vmatmul.mubr.msk.f32.gmra.mrb[2].mxu0 %vm9464_vm5, %v40_v32 }
  0x46   :  { %6642 = vmatprep.mubr.msk.f32.mxu0 %vm9581_vm0, %v9447_v4 }
  0x47   :  { %6673 = vmatmul.mubr.msk.f32.gmra.mrb[2].mxu1 %vm9464_vm5, %v40_v32 }
  0x48   :  { %6675 = vmatprep.mubr.msk.f32.mxu1 %vm9581_vm0, %v9447_v4 }
  0x49   :  { %6643 = vmatmul.mubr.msk.f32.gmra.mrb[4].mxu0 %vm9464_vm5, %v41_v33 }
  0x4a   :  { %6645 = vmatprep.mubr.msk.f32.mxu0 %vm9581_vm0, %v9447_v4 }
  0x4b   :  { %6676 = vmatmul.mubr.msk.f32.gmra.mrb[4].mxu1 %vm9464_vm5, %v41_v33 }
  0x4c   :  { %6678 = vmatprep.mubr.msk.f32.mxu1 %vm9581_vm0, %v9447_v4 }
  0x4d   :  { %6646 = vmatmul.mubr.msk.f32.gmra.mrb[6].mxu0 %vm9464_vm5, %v42_v34 }
  0x4e   :  { %6648 = vmatprep.mubr.msk.f32.mxu0 %vm9581_vm0, %v9447_v4 }
  0x4f   :  { %6679 = vmatmul.mubr.msk.f32.gmra.mrb[6].mxu1 %vm9464_vm5, %v42_v34 }
  0x50   :  { %6681 = vmatprep.mubr.msk.f32.mxu1 %vm9581_vm0, %v9447_v4 }
  0x51   :  { %6649 = vmatmul.mubr.msk.f32.gmra.mrb[8].mxu0 %vm9464_vm5, %v7782_v35 }
  0x52   :  { %6692 = vmatprep.mubr.msk.f32.mxu0 %vm9581_vm0, %v9447_v4 }
  0x53   :  { %6682 = vmatmul.mubr.msk.f32.gmra.mrb[8].mxu1 %vm9464_vm5, %v7782_v35 }
  0x54   :  { %6719 = vmatprep.mubr.msk.f32.mxu1 %vm9581_vm0, %v9447_v4  ;;  %v412_v4 = vmul.f32 %v408_v38, %v42_v34 }
 0x114   :  { %v189_v46 = vpop.f32.mrb[0].mxu0 }
 0x115   :  { %v345_v51 = vmul.f32 %v7795_v39, %v189_v46  ;;  %v371_v52 = vmul.f32 %v7797_v40, %v189_v46  ;;  %v402_v53 = vmul.f32 %v7799_v41, %v189_v46  ;;  %v6638_v54 = vpop.f32.mrb[1].mxu0 }
 0x116   :  { %v319_v56 = vpop.f32.mrb[0].mxu1  ;;  %v381_v54 = vmul.f32 %v377_v37, %v42_v34 }
 0x117   :  { %v361_v61 = vadd.f32 %v351_v42, %v345_v51  ;;  %v390_v62 = vadd.f32 %v378_v43, %v371_v52  ;;  %v421_v63 = vadd.f32 %v409_v44, %v402_v53  ;;  %v357_v0 = vmul.f32 %v7803_v45, %v319_v56  ;;  %v6671_v29 = vpop.f32.mrb[1].mxu1 }
 0x118   :  { %v385_v13 = vmul.f32 %v7805_v47, %v319_v56  ;;  %v416_v46 = vmul.f32 %v7807_v48, %v319_v56  ;;  %v194_v32 = vpop.f32.mrb[2].mxu0  ;;  %v7823_v53 = vstv %s7801_s11  ;;  %v7826_v29 = vmul.f32 %v377_v37, %v7782_v35  ;;  %s6029_s11 = sld [smem:[#allocation2 + $0x21]] }
 0x119   :  { %v365_v1 = vadd.f32 %v361_v61, %v357_v0  ;;  %v346_v33 = vmul.f32 %v7795_v39, %v194_v32  ;;  %v372_v36 = vmul.f32 %v7797_v40, %v194_v32  ;;  %v403_v42 = vmul.f32 %v7799_v41, %v194_v32  ;;  %v6641_v43 = vpop.f32.mrb[3].mxu0 }
 0x11a   :  { %v395_v44 = vadd.f32 %v390_v62, %v385_v13  ;;  %v426_v51 = vadd.f32 %v421_v63, %v416_v46  ;;  %v324_v52 = vpop.f32.mrb[2].mxu1  ;;  %v7832_v43 = vstv %s7809_s12  ;;  %v413_v13 = vmul.f32 %v408_v38, %v7782_v35  ;;  %s6025_s12 = sld [smem:[#allocation2 + $0x1d]] }
 0x11b   :  { %v362_v56 = vadd.f32 %v352_v49, %v346_v33  ;;  %v391_v9 = vadd.f32 %v379_v50, %v372_v36  ;;  %v422_v34 = vadd.f32 %v410_v55, %v403_v42  ;;  %v358_v61 = vmul.f32 %v7803_v45, %v324_v52  ;;  %v6674_v0 = vpop.f32.mrb[3].mxu1 }
 0x11c   :  { %v386_v31 = vmul.f32 %v7805_v47, %v324_v52  ;;  %v417_v28 = vmul.f32 %v7807_v48, %v324_v52  ;;  %v199_v32 = vpop.f32.mrb[4].mxu0  ;;  %v437_v55 = vrot.slane %v395_v44, 1  ;;  %v460_v46 = vrot.slane %v426_v51, 2 }
 0x11d   :  { %v366_v62 = vadd.f32 %v362_v56, %v358_v61  ;;  %v347_v63 = vmul.f32 %v7795_v39, %v199_v32  ;;  %v373_v37 = vmul.f32 %v7797_v40, %v199_v32  ;;  %v404_v49 = vmul.f32 %v7799_v41, %v199_v32  ;;  %v6644_v50 = vpop.f32.mrb[5].mxu0 }
 0x11e   :  { %v396_v33 = vadd.f32 %v391_v9, %v386_v31  ;;  %v427_v36 = vadd.f32 %v422_v34, %v417_v28  ;;  %v329_v42 = vpop.f32.mrb[4].mxu1 }
 0x11f   :  { %v363_v0 = vadd.f32 %v353_v57, %v347_v63  ;;  %v392_v52 = vadd.f32 %v380_v58, %v373_v37  ;;  %v423_v25 = vadd.f32 %v411_v59, %v404_v49  ;;  %v359_v21 = vmul.f32 %v7803_v45, %v329_v42  ;;  %v6677_v17 = vpop.f32.mrb[5].mxu1 }
 0x120   :  { %v438_v35 = vrot.slane %v396_v33, 1  ;;  %v461_v38 = vrot.slane %v427_v36, 2  ;;  %v387_v56 = vmul.f32 %v7805_v47, %v329_v42  ;;  %v418_v61 = vmul.f32 %v7807_v48, %v329_v42  ;;  %v204_v30 = vpop.f32.mrb[6].mxu0 }
 0x121   :  { %v367_v32 = vadd.f32 %v363_v0, %v359_v21  ;;  %v348_v44 = vmul.f32 %v7795_v39, %v204_v30  ;;  %v374_v9 = vmul.f32 %v7797_v40, %v204_v30  ;;  %v405_v28 = vmul.f32 %v7799_v41, %v204_v30  ;;  %v6647_v31 = vpop.f32.mrb[7].mxu0 }
 0x122   :  { %v439_v57 = vsel %vm9466_vm1, %v437_v55, %v438_v35  ;;  %v462_v58 = vsel %vm9465_vm7, %v460_v46, %v461_v38  ;;  %v397_v17 = vadd.f32 %v392_v52, %v387_v56  ;;  %v428_v59 = vadd.f32 %v423_v25, %v418_v61  ;;  %v334_v51 = vpop.f32.mrb[6].mxu1 }
 0x123   :  { %v450_v34 = vadd.f32 %v439_v57, %v365_v1  ;;  %v364_v63 = vadd.f32 %v7814_v60, %v348_v44  ;;  %v393_v37 = vadd.f32 %v381_v54, %v374_v9  ;;  %v424_v49 = vadd.f32 %v412_v4, %v405_v28  ;;  %v6680_v21 = vpop.f32.mrb[7].mxu1 }
 0x124   :  { %v440_v50 = vrot.slane %v397_v17, 1  ;;  %v463_v39 = vrot.slane %v428_v59, 2  ;;  %v360_v33 = vmul.f32 %v7803_v45, %v334_v51  ;;  %v388_v30 = vmul.f32 %v7805_v47, %v334_v51  ;;  %v209_v36 = vpop.f32.mrb[8].mxu0 }
 0x125   :  { %v473_v42 = vadd.f32 %v462_v58, %v450_v34  ;;  %v419_v55 = vmul.f32 %v7807_v48, %v334_v51  ;;  %v375_v46 = vmul.f32 %v7797_v40, %v209_v36  ;;  %v406_v25 = vmul.f32 %v7799_v41, %v209_v36  ;;  %v6650_v1 = vpop.f32.mrb[9].mxu0 }
 0x126   :  { %v441_v60 = vsel %vm9466_vm1, %v438_v35, %v440_v50  ;;  %v464_v4 = vsel %vm9465_vm7, %v461_v38, %v463_v39  ;;  %v368_v54 = vadd.f32 %v364_v63, %v360_v33  ;;  %v398_v0 = vadd.f32 %v393_v37, %v388_v30  ;;  %v339_v52 = vpop.f32.mrb[8].mxu1 }
 0x127   :  { %v479_v45 = vmul.f32 %v7823_v53, %v473_v42  ;;  %v451_v56 = vadd.f32 %v441_v60, %v366_v62  ;;  %v429_v61 = vadd.f32 %v424_v49, %v419_v55  ;;  %v394_v44 = vadd.f32 %v7826_v29, %v375_v46  ;;  %v6683_v9 = vpop.f32.mrb[9].mxu1 }
 0x128   :  { %v442_v28 = vrot.slane %v398_v0, 1  ;;  %v425_v31 = vadd.f32 %v413_v13, %v406_v25  ;;  %v389_v40 = vmul.f32 %v7805_v47, %v339_v52  ;;  %v420_v41 = vmul.f32 %v7807_v48, %v339_v52 }
 0x129   :  { %v474_v57 = vadd.f32 %v464_v4, %v451_v56  ;;  %v465_v35 = vrot.slane %v429_v61, 2  ;;  %v485_v38 = vadd.f32 %v7832_v43, %v479_v45  ;;  %v7871_v4 = vmul.u32 2, %v7508_v2 }
 0x12a   :  { %v443_v58 = vsel %vm9466_vm1, %v440_v50, %v442_v28  ;;  %v399_v17 = vadd.f32 %v394_v44, %v389_v40  ;;  %v430_v59 = vadd.f32 %v425_v31, %v420_v41  ;;  %v7876_v61 = vmul.u32 2, %v7517_v5 }
 0x12b   :  { %v480_v62 = vmul.f32 %v7823_v53, %v474_v57  ;;  %v452_v51 = vadd.f32 %v443_v58, %v367_v32  ;;  %v466_v29 = vsel %vm9465_vm7, %v463_v39, %v465_v35  ;;  %v489_v37 = vmax.f32 %v485_v38, 0.0 }
 0x12c   :  { %v444_v34 = vrot.slane %v399_v17, 1  ;;  %v467_v63 = vrot.slane %v430_v59, 2  ;;  %v5887_v56 = vadd.s32 4294967294, %v7871_v4  ;;  %v9583_v31 = vmov 0 }
 0x12d   :  { %v475_v13 = vadd.f32 %v466_v29, %v452_v51  ;;  %v486_v47 = vadd.f32 %v7832_v43, %v480_v62  ;;  %v497_v32 = vrot.slane %v489_v37, 1  ;;  %v9584_v31 = vsel %vm7881_vm15, 4294967295, %v9583_v31 }
 0x12e   :  { %v445_v48 = vsel %vm9466_vm1, %v442_v28, %v444_v34  ;;  %v468_v49 = vsel %vm9465_vm7, %v465_v35, %v467_v63  ;;  %v9582_v28 = vmov 0.0|0.0   ;;  %vm518_vm5 = vcmp.eq.s32.totalorder %v7510_v3, %v5887_v56 }
 0x12f   :  { %v481_v21 = vmul.f32 %v7823_v53, %v475_v13  ;;  %v453_v50 = vadd.f32 %v445_v48, %v368_v54  ;;  %v490_v33 = vmax.f32 %v486_v47, 0.0  ;;  %v5888_v40 = vadd.s32 4294967294, %v7876_v61 }
 0x130   :  { %v7888_v41 = vmul.u32 2, %v7560_v12  ;;  %v9586_v35 = vmov 0.0   ;;  %vm527_vm7 = vcmask 252928   ;;  %v7912_v62 = vadd.s32 4294967278, %v7510_v3 }
 0x131   :  { %v487_v30 = vadd.f32 %v7832_v43, %v481_v21  ;;  %v476_v36 = vadd.f32 %v468_v49, %v453_v50  ;;  %v498_v42 = vrot.slane %v490_v33, 1  ;;  %v7893_v38 = vsel %vm518_vm5, 1.0, %v9586_v35 }
 0x132   :  { %9585 = vst [vmem:[#allocation20_spill] sm:$0xff] %v7888_v41  ;;  %vm519_vm10 = vcmp.eq.s32.totalorder %v7510_v3, %v5888_v40  ;;  %v5889_v58 = vadd.s32 4294967294, %v7888_v41  ;;  %vm635_vm5 = vcmp.le.s32.totalorder %v7510_v3, 16  ;;  %v7916_v51 = vmul.u32 2, %v7510_v3 }
 0x133   :  { %v491_v39 = vmax.f32 %v487_v30, 0.0  ;;  %v482_v55 = vmul.f32 %v7823_v53, %v476_v36  ;;  %v499_v46 = vsel %vm9466_vm1, %v497_v32, %v498_v42  ;;  %v7902_v17 = vsel %vm519_vm10, 1.0, %v9586_v35 }
 0x134   :  { %v508_v25 = vmax.f32 %v489_v37, %v499_v46  ;;  %v661_v29 = vmul.u32 2, %v7912_v62  ;;  %vm658_vm10 = vcmp.ge.s32.totalorder %v7912_v62, 1  ;;  %vm659_vm6 = vcmp.le.s32.totalorder %v7912_v62, 16 }
 0x135   :  { %v488_v1 = vadd.f32 %v7832_v43, %v482_v55  ;;  %v500_v60 = vrot.slane %v491_v39, 1  ;;  %v7928_v63 = vadd.s32 4294967295, %v7916_v51  ;;  %vm7930_vm9 = vmand %vm658_vm10, %vm659_vm6  ;;  %v9592_v37 = vmov 0 }
 0x136   :  { %v662_v13 = vadd.s32 34, %v661_v29  ;;  %v9594_v49 = vmov 1.0|1.0   ;;  %v9601_v50 = vmov 0  ;;  %v9604_v30 = vmov 0 }
 0x137   :  { %v492_v0 = vmax.f32 %v488_v1, 0.0  ;;  %v501_v54 = vsel %vm9466_vm1, %v498_v42, %v500_v60  ;;  %vm7936_vm2 = vcmp.eq.s32.totalorder %v7508_v2, %v7928_v63  ;;  %v9609_v55 = vmov 0 }
 0x138   :  { %v509_v52 = vmax.f32 %v490_v33, %v501_v54  ;;  %v9593_v37 = vsel %vm7936_vm2, 4294967295, %v9592_v37  ;;  %v5899_v48 = vadd.s32 4294967295, %v662_v13  ;;  %v9617_v1 = vmov 0 }
 0x139   :  { %v502_v45 = vrot.slane %v492_v0, 1  ;;  %v1013_v29 = vstv %s8179_s16  ;;  %v1029_v34 = vstv %s5950_s18  ;;  %v1050_v13 = vstv %s5953_s19  ;;  %s6032_s16 = sld [smem:[#allocation4 + $0x6]]  ;;  %s6050_s18 = sld [smem:[#allocation2 + $0x25]] }
 0x13a   :  { %v7251_v53 = vpack.c.bf16 %v509_v52, %v508_v25  ;;  %vm664_vm10 = vcmp.eq.s32.totalorder %v7508_v2, %v5899_v48  ;;  %vm665_vm3 = vcmp.eq.s32.totalorder %v7517_v5, %v5899_v48  ;;  %vm668_vm13 = vcmp.eq.s32.totalorder %v7616_v19, %v5899_v48  ;;  %s6053_s19 = sld [smem:[#allocation2 + $0x28]] }
 0x13b   :  { %v503_v44 = vsel %vm9466_vm1, %v500_v60, %v502_v45  ;;  %v511_v9 = vmax.f32 %v492_v0, %v502_v45  ;;  %vm520_vm1 = vcmp.eq.s32.totalorder %v7510_v3, %v5889_v58  ;;  %vm673_vm8 = vmand %vm7930_vm9, %vm664_vm10  ;;  %v9613_v25 = vmov 0 }
 0x13c   :  { %7252 = vmatpush3.bf16.msra.mxu0 %v7251_v53  ;;  %v510_v43 = vmax.f32 %v491_v39, %v503_v44  ;;  %v5892_v59 = vsel %vm520_vm1, 1.0, %v9586_v35  ;;  %vm9587_vm1 = vcmp.ge.s32.totalorder %v7510_v3, 1  ;;  %vm674_vm11 = vmand %vm7930_vm9, %vm665_vm3  ;;  %v1017_v58 = vstv %s8177_s14  ;;  %s6028_s14 = sld [smem:[#allocation2 + $0x20]] }
 0x13d   :  { %7253 = vmatprep.subr.bf16.mxu0 %v9582_v28  ;;  %v1055_v47 = vstv %s5954_s17  ;;  %s6033_s17 = sld [smem:[#allocation4 + $0x7]] }
 0x13e   :  { %v7254_v57 = vpack.c.bf16 %v511_v9, %v510_v43 }
 0x140   :  { %7256 = vmatpush3.bf16.msk.msra.mxu0 %vm7881_vm15, %v7254_v57 }
 0x141   :  { %7269 = vmatprep.subr.bf16.mxu0 %v9582_v28 }
 0x143   :  { %6693 = vmatmul.mubr.msk.f32.vlgmr.msra.gmra.mrb[10].mxu0 %vm527_vm7, %v7893_v38 }
 0x144   :  { %6695 = vmatprep.mubr.msk.f32.mxu0 %vm9581_vm0, %v9586_v35 }
 0x147   :  { %6696 = vmatmul.mubr.msk.f32.gmra.mrb[12].mxu0 %vm527_vm7, %v7902_v17 }
 0x148   :  { %6698 = vmatprep.mubr.msk.f32.mxu0 %vm9581_vm0, %v9586_v35 }
 0x14b   :  { %6699 = vmatmul.mubr.msk.f32.gmra.mrb[14].mxu0 %vm527_vm7, %v5892_v59  ;;  %vm7923_vm7 = vmand %vm9587_vm1, %vm635_vm5  ;;  %vm9486_vm5 = vcmp.eq.s32.totalorder %v7517_v5, %v7928_v63  ;;  %v1034_v59 = vstv %s5951_s15  ;;  %s6031_s15 = sld [smem:[#allocation2 + $0x23]] }
 0x14c   :  { %6738 = vmatprep.mubr.msk.f32.mxu0 %vm9581_vm0, %v9586_v35  ;;  %vm648_vm1 = vmand %vm7923_vm7, %vm7936_vm2  ;;  %vm9487_vm2 = vcmp.eq.s32.totalorder %v7560_v12, %v7928_v63  ;;  %vm9491_vm0 = vcmp.eq.s32.totalorder %v7572_v15, %v7928_v63 }
 0x14d   :  { %vm649_vm6 = vmand %vm7923_vm7, %vm9486_vm5  ;;  %vm666_vm5 = vcmp.eq.s32.totalorder %v7560_v12, %v5899_v48 }
 0x14e   :  { %vm682_vm12 = vmor %vm648_vm1, %vm673_vm8  ;;  %vm667_vm8 = vcmp.eq.s32.totalorder %v7572_v15, %v5899_v48 }
 0x14f   :  { %vm683_vm15 = vmor %vm649_vm6, %vm674_vm11  ;;  %vm644_vm6 = vcmp.eq.s32.totalorder %v7624_v20, %v7928_v63 }
 0x150   :  { %vm7258_vm14 = vmpackc.low %vm683_vm15, %vm682_vm12  ;;  %vm9490_vm15 = vcmp.eq.s32.totalorder %v7616_v19, %v7928_v63 }
 0x151   :  { %7259 = vmatpush3.bf16.msk.msra.mxu1 %vm7258_vm14, %v9594_v49  ;;  %vm650_vm10 = vmand %vm7923_vm7, %vm9487_vm2 }
 0x152   :  { %7260 = vmatprep.subr.bf16.mxu1 %v9582_v28  ;;  %vm651_vm12 = vmand %vm7923_vm7, %vm9491_vm0  ;;  %vm670_vm0 = vcmp.eq.s32.totalorder %v7656_v22, %v5899_v48 }
 0x153   :  { %vm675_vm11 = vmand %vm7930_vm9, %vm666_vm5 }
 0x154   :  { %vm676_vm14 = vmand %vm7930_vm9, %vm667_vm8 }
 0x155   :  { %vm684_vm3 = vmor %vm650_vm10, %vm675_vm11  ;;  %vm669_vm10 = vcmp.eq.s32.totalorder %v7624_v20, %v5899_v48 }
 0x156   :  { %vm685_vm1 = vmor %vm651_vm12, %vm676_vm14  ;;  %vm645_vm14 = vcmp.eq.s32.totalorder %v7656_v22, %v7928_v63 }
 0x157   :  { %vm7261_vm2 = vmpackc.low %vm685_vm1, %vm684_vm3  ;;  %vm646_vm1 = vcmp.eq.s32.totalorder %v7664_v23, %v7928_v63 }
 0x158   :  { %7262 = vmatpush3.bf16.msk.msra.mxu1 %vm7261_vm2, %v9594_v49  ;;  %vm652_vm5 = vmand %vm7923_vm7, %vm9490_vm15 }
 0x159   :  { %7263 = vmatprep.subr.bf16.mxu1 %v9582_v28  ;;  %vm653_vm8 = vmand %vm7923_vm7, %vm644_vm6 }
 0x15a   :  { %vm677_vm12 = vmand %vm7930_vm9, %vm668_vm13  ;;  %vm671_vm13 = vcmp.eq.s32.totalorder %v7664_v23, %v5899_v48 }
 0x15b   :  { %vm678_vm11 = vmand %vm7930_vm9, %vm669_vm10 }
 0x15c   :  { %vm686_vm2 = vmor %vm652_vm5, %vm677_vm12 }
 0x15d   :  { %vm687_vm3 = vmor %vm653_vm8, %vm678_vm11 }
 0x15e   :  { %vm7264_vm15 = vmpackc.low %vm687_vm3, %vm686_vm2 }
 0x15f   :  { %7265 = vmatpush3.bf16.msk.msra.mxu1 %vm7264_vm15, %v9594_v49  ;;  %vm654_vm6 = vmand %vm7923_vm7, %vm645_vm14  ;;  %vm647_vm15 = vcmp.eq.s32.totalorder %v7692_v26, %v7928_v63  ;;  %vm672_vm14 = vcmp.eq.s32.totalorder %v7692_v26, %v5899_v48  ;;  %v9598_v26 = vmov 0  ;;  %v1021_v48 = vstv %s8181_s20  ;;  %s6049_s20 = sld [smem:[#allocation2 + $0x24]] }
 0x160   :  { %7266 = vmatprep.subr.bf16.mxu1 %v9582_v28  ;;  %vm655_vm5 = vmand %vm7923_vm7, %vm646_vm1  ;;  %vm9493_vm1 = vcmask 1042432  }
 0x161   :  { %vm679_vm10 = vmand %vm7930_vm9, %vm670_vm0 }
 0x162   :  { %vm680_vm8 = vmand %vm7930_vm9, %vm671_vm13 }
 0x163   :  { %vm688_vm12 = vmor %vm654_vm6, %vm679_vm10  ;;  %vm9597_vm10 = vcmp.eq.s32.totalorder %v7517_v5, %v7520_v6 }
 0x164   :  { %vm689_vm11 = vmor %vm655_vm5, %vm680_vm8 }
 0x165   :  { %vm7267_vm2 = vmpackc.low %vm689_vm11, %vm688_vm12  ;;  %vm9603_vm11 = vcmp.eq.s32.totalorder %v7560_v12, %v7520_v6 }
 0x166   :  { %7268 = vmatpush3.bf16.msk.msra.mxu1 %vm7267_vm2, %v9594_v49  ;;  %vm656_vm3 = vmand %vm7923_vm7, %vm647_vm15 }
 0x167   :  { %6717 = vmatprep.subr.mxu1 %v9586_v35  ;;  %vm681_vm0 = vmand %vm7930_vm9, %vm672_vm14  ;;  %vm9607_vm14 = vnez %v9555_v14 }
 0x168   :  { %vm690_vm13 = vmor %vm656_vm3, %vm681_vm0  ;;  %vm9608_vm0 = vnez %v9557_v16 }
 0x169   :  { %v5908_v20 = vsel %vm690_vm13, 1.0, %v9586_v35  ;;  %vm8030_vm6 = vmor %vm7923_vm7, %vm7930_vm9  ;;  %vm9600_vm9 = vcmp.eq.s32.totalorder %v7572_v15, %v7520_v6 }
 0x16a   :  { %6718 = vmatpush3.msk.msra.mxu1 %vm9493_vm1, %v5908_v20  ;;  %vm806_vm5 = vmand %vm7531_vm4, %vm8030_vm6  ;;  %vm9622_vm1 = vcmp.eq.s32.totalorder %v7616_v19, %v7544_v10  ;;  %v1039_v20 = vstv %s5952_s0  ;;  %s6056_s0 = sld [smem:[#allocation2 + $0x2b]] }
 0x16b   :  { %7275 = vmatprep.subr.bf16.mxu1 %v9582_v28  ;;  %vm807_vm8 = vmand %vm9597_vm10, %vm8030_vm6 }
 0x16c   :  { %vm8043_vm12 = vmpackc.low %vm807_vm8, %vm806_vm5  ;;  %vm709_vm5 = vcmask 547840   ;;  %vm9612_vm8 = vcmp.eq.s32.totalorder %v7560_v12, %v7544_v10 }
 0x16d   :  { %v9599_v26 = vsel %vm8043_vm12, 4294967295, %v9598_v26  ;;  %7271 = vmatpush3.bf16.msk.msra.mxu0 %vm8043_vm12, %v9594_v49  ;;  %vm8056_vm7 = vmand %vm9600_vm9, %vm8030_vm6 }
 0x16e   :  { %v9602_v50 = vsel %vm8056_vm7, 4294967295, %v9601_v50  ;;  %7272 = vmatprep.subr.bf16.mxu0 %v9582_v28  ;;  %vm8066_vm2 = vmand %vm9603_vm11, %vm8030_vm6  ;;  %vm9616_vm11 = vcmp.eq.s32.totalorder %v7572_v15, %v7544_v10 }
 0x16f   :  { %v9605_v30 = vsel %vm8066_vm2, 4294967295, %v9604_v30  ;;  %vm9492_vm15 = vmpackc.low %vm8056_vm7, %vm8066_vm2 }
 0x170   :  { %9606 = vst [vmem:[#allocation21_spill] sm:$0xff] %v9605_v30  ;;  %vm914_vm3 = vmand %vm9607_vm14, %vm8030_vm6 }
 0x171   :  { %7274 = vmatpush3.bf16.msk.msra.mxu0 %vm9492_vm15, %v9594_v49  ;;  %vm915_vm13 = vmand %vm9608_vm0, %vm8030_vm6 }
 0x172   :  { %6736 = vmatprep.subr.mxu0 %v9586_v35  ;;  %vm8091_vm10 = vmpackc.low %vm915_vm13, %vm914_vm3  ;;  %vm9620_vm3 = vmmov 0  }
 0x173   :  { %v9610_v55 = vsel %vm8091_vm10, 4294967295, %v9609_v55  ;;  %vm8100_vm9 = vmand %vm9612_vm8, %vm8030_vm6  ;;  %vm9621_vm8 = vcmp.eq.s32.totalorder %v7616_v19, %v7520_v6 }
 0x174   :  { %9611 = vst [vmem:[#allocation22_spill] sm:$0xff] %v9610_v55  ;;  %v9614_v25 = vsel %vm8100_vm9, 4294967295, %v9613_v25  ;;  %vm8109_vm15 = vmand %vm9616_vm11, %vm8030_vm6 }
 0x175   :  { %9615 = vst [vmem:[#allocation23_spill] sm:$0xff] %v9614_v25  ;;  %v9618_v1 = vsel %vm8109_vm15, 4294967295, %v9617_v1  ;;  %vm9494_vm13 = vmpackc.low %vm8109_vm15, %vm8100_vm9  ;;  %vm9515_vm15 = vcmask 293888  }
 0x176   :  { %9619 = vst [vmem:[#allocation24_spill] sm:$0xff] %v9618_v1  ;;  %vm810_vm11 = vmand %vm9621_vm8, %vm8030_vm6 }
 0x177   :  { %v8148_v45 = vsel %vm810_vm11, 1.0, %v9586_v35 }
 0x178   :  { %9623 = vst [vmem:[#allocation25_spill] sm:$0xff] %v8148_v45 }
 0x216   :  { %v606_v23 = vpop.f32.mrb[10].mxu0 }
 0x217   :  { %623 = vrot.lane.b32.xlu0 %v606_v23, %s7478_s13  ;;  %v6694_v21 = vpop.f32.mrb[11].mxu0 }
 0x21a   :  { %v611_v33 = vpop.f32.mrb[12].mxu0 }
 0x21b   :  { %625 = vrot.lane.b32.xlu0 %v611_v33, %s7478_s13  ;;  %v6697_v36 = vpop.f32.mrb[13].mxu0 }
 0x21c   :  { %v1060_v36 = vstv %s5955_s1  ;;  %s6052_s1 = sld [smem:[#allocation2 + $0x27]] }
 0x21e   :  { %v616_v32 = vpop.f32.mrb[14].mxu0 }
 0x21f   :  { %627 = vrot.lane.b32.xlu1 %v616_v32, %s7478_s13  ;;  %v6700_v42 = vpop.f32.mrb[15].mxu0 }
 0x289   :  { %v624_v39 = vpop.permute.xlu0 %623 }
 0x28a   :  { %v632_v46 = vmax.f32 %v606_v23, %v624_v39 }
 0x28c   :  { %6720 = vmatmul.mubr.msk.f32.vlgmr.msra.gmra.mrb[10].mxu1 %vm709_vm5, %v632_v46 }
 0x28d   :  { %v626_v60 = vpop.permute.xlu0 %625  ;;  %6722 = vmatprep.mubr.msk.f32.mxu1 %vm9620_vm3, %v9586_v35  ;;  %7277 = vmatpush3.bf16.msk.msra.mxu1 %vm8091_vm10, %v9594_v49  ;;  %vm9640_vm10 = vcmp.eq.s32.totalorder %v7560_v12, %v7928_v63 }
 0x28e   :  { %v633_v0 = vmax.f32 %v611_v33, %v626_v60  ;;  %7278 = vmatprep.subr.bf16.mxu1 %v9582_v28 }
 0x290   :  { %6723 = vmatmul.mubr.msk.f32.gmra.mrb[12].mxu1 %vm709_vm5, %v633_v0 }
 0x291   :  { %v628_v54 = vpop.permute.xlu1 %627  ;;  %6725 = vmatprep.mubr.msk.f32.mxu1 %vm9620_vm3, %v9586_v35  ;;  %7280 = vmatpush3.bf16.msk.msra.mxu1 %vm9494_vm13, %v9594_v49  ;;  %vm918_vm13 = vmand %vm9622_vm1, %vm8030_vm6  ;;  %vm1113_vm1 = vcmask 121856   ;;  %vm9627_vm6 = vcmask 1046528  }
 0x292   :  { %v634_v52 = vmax.f32 %v616_v32, %v628_v54  ;;  %6755 = vmatprep.subr.mxu1 %v9586_v35  ;;  %v8151_v56 = vsel %vm918_vm13, 1.0, %v9586_v35  ;;  %vm9629_vm13 = vmmov %vm9627_vm6 }
 0x293   :  { %9624 = vst [vmem:[#allocation26_spill] sm:$0xff] %v8151_v56  ;;  %vm9631_vm11 = vmmov %vm9627_vm6 }
 0x294   :  { %6726 = vmatmul.mubr.msk.f32.gmra.mrb[14].mxu1 %vm709_vm5, %v634_v52  ;;  %vm9625_vm5 = vcmask 1043456  }
 0x295   :  { %6757 = vmatprep.mubr.msk.f32.mxu1 %vm9620_vm3, %v9586_v35  ;;  %6737 = vmatpush3.msk.msra.mxu0 %vm9625_vm5, %v8148_v45  ;;  %vm9626_vm9 = vmmov %vm9625_vm5  ;;  %vm9632_vm5 = vnez %v9584_v31 }
 0x296   :  { %6756 = vmatpush3.msk.msra.mxu1 %vm9626_vm9, %v8151_v56  ;;  %vm9628_vm9 = vcmask 1045504  }
 0x297   :  { %vm9630_vm8 = vmmov %vm9628_vm9 }
 0x35f   :  { %v789_v53 = vpop.f32.mrb[10].mxu1 }
 0x360   :  { %v6721_v44 = vpop.f32.mrb[11].mxu1  ;;  %6739 = vmatmul.mubr.msk.f32.vlgmr.msra.gmra.mrb[16].mxu0 %vm9515_vm15, %v789_v53  ;;  %6758 = vmatmul.mubr.msk.f32.vlgmr.msra.gmra.mrb[16].mxu1 %vm9515_vm15, %v789_v53  ;;  %v1018_v23 = vmul.f32 %v1017_v58, %v789_v53  ;;  %v1035_v21 = vmul.f32 %v1034_v59, %v789_v53  ;;  %v1056_v46 = vmul.f32 %v1055_v47, %v789_v53 }
 0x361   :  { %6741 = vmatprep.mubr.msk.f32.mxu0 %vm9620_vm3, %v9586_v35  ;;  %6760 = vmatprep.mubr.msk.f32.mxu1 %vm9620_vm3, %v9586_v35 }
 0x363   :  { %v794_v9 = vpop.f32.mrb[12].mxu1 }
 0x364   :  { %v6724_v43 = vpop.f32.mrb[13].mxu1  ;;  %6742 = vmatmul.mubr.msk.f32.gmra.mrb[18].mxu0 %vm9515_vm15, %v794_v9  ;;  %6761 = vmatmul.mubr.msk.f32.gmra.mrb[18].mxu1 %vm9515_vm15, %v794_v9  ;;  %v1019_v18 = vmul.f32 %v1017_v58, %v794_v9 }
 0x365   :  { %6744 = vmatprep.mubr.msk.f32.mxu0 %vm9620_vm3, %v9586_v35  ;;  %6763 = vmatprep.mubr.msk.f32.mxu1 %vm9620_vm3, %v9586_v35 }
 0x367   :  { %v8169_v40 = vpop.f32.mrb[14].mxu1 }
 0x368   :  { %v6727_v57 = vpop.f32.mrb[15].mxu1  ;;  %6745 = vmatmul.mubr.msk.f32.gmra.mrb[20].mxu0 %vm9515_vm15, %v8169_v40  ;;  %6764 = vmatmul.mubr.msk.f32.gmra.mrb[20].mxu1 %vm9515_vm15, %v8169_v40  ;;  %vm9637_vm15 = vcmp.eq.s32.totalorder %v7517_v5, %v7928_v63 }
 0x369   :  { %6770 = vmatprep.mubr.msk.f32.mxu0 %vm1113_vm1, %v7893_v38 }
 0x433   :  { %v900_v22 = vpop.f32.mrb[16].mxu0  ;;  %v998_v33 = vpop.f32.mrb[16].mxu1 }
 0x434   :  { %v1014_v32 = vmul.f32 %v1013_v29, %v900_v22  ;;  %v1030_v42 = vmul.f32 %v1029_v34, %v900_v22  ;;  %v1051_v39 = vmul.f32 %v1050_v13, %v900_v22  ;;  %v6740_v60 = vpop.f32.mrb[17].mxu0  ;;  %v6759_v0 = vpop.f32.mrb[17].mxu1  ;;  %v1022_v54 = vmul.f32 %v1021_v48, %v998_v33 }
 0x435   :  { %v1040_v52 = vmul.f32 %v1039_v20, %v998_v33  ;;  %v1061_v27 = vmul.f32 %v1060_v36, %v998_v33  ;;  %v1036_v22 = vmul.f32 %v1034_v59, %v794_v9  ;;  %v1057_v60 = vmul.f32 %v1055_v47, %v794_v9 }
 0x436   :  { %v1024_v44 = vadd.f32 %v1018_v23, %v1014_v32  ;;  %v1043_v43 = vadd.f32 %v1035_v21, %v1030_v42  ;;  %v1064_v57 = vadd.f32 %v1056_v46, %v1051_v39  ;;  %v1037_v23 = vmul.f32 %v1034_v59, %v8169_v40 }
 0x437   :  { %v905_v24 = vpop.f32.mrb[18].mxu0  ;;  %v1003_v11 = vpop.f32.mrb[18].mxu1 }
 0x438   :  { %v1026_v7 = vadd.f32 %v1024_v44, %v1022_v54  ;;  %v1046_v41 = vadd.f32 %v1043_v43, %v1040_v52  ;;  %v1067_v56 = vadd.f32 %v1064_v57, %v1061_v27  ;;  %v1015_v25 = vmul.f32 %v1013_v29, %v905_v24  ;;  %v6743_v1 = vpop.f32.mrb[19].mxu0  ;;  %v6762_v55 = vpop.f32.mrb[19].mxu1 }
 0x439   :  { %v1031_v45 = vmul.f32 %v1029_v34, %v905_v24  ;;  %v1052_v53 = vmul.f32 %v1050_v13, %v905_v24  ;;  %v1023_v30 = vmul.f32 %v1021_v48, %v1003_v11  ;;  %v1041_v33 = vmul.f32 %v1039_v20, %v1003_v11 }
 0x43a   :  { %v1025_v0 = vadd.f32 %v1019_v18, %v1015_v25  ;;  %v1062_v42 = vmul.f32 %v1060_v36, %v1003_v11  ;;  %v1058_v55 = vmul.f32 %v1055_v47, %v8169_v40  ;;  %v1073_v11 = vrot.slane %v1046_v41, 1 }
 0x43b   :  { %v1044_v21 = vadd.f32 %v1036_v22, %v1031_v45  ;;  %v1065_v32 = vadd.f32 %v1057_v60, %v1052_v53  ;;  %v910_v58 = vpop.f32.mrb[20].mxu0  ;;  %v1008_v39 = vpop.f32.mrb[20].mxu1  ;;  %v1085_v54 = vrot.slane %v1067_v56, 2  ;;  %v1095_v22 = vstv %s8187_s21  ;;  %s6055_s21 = sld [smem:[#allocation2 + $0x2a]] }
 0x43c   :  { %v1027_v27 = vadd.f32 %v1025_v0, %v1023_v30  ;;  %v1032_v29 = vmul.f32 %v1029_v34, %v910_v58  ;;  %v1053_v1 = vmul.f32 %v1050_v13, %v910_v58  ;;  %v6746_v46 = vpop.f32.mrb[21].mxu0  ;;  %v6765_v24 = vpop.f32.mrb[21].mxu1  ;;  %v1042_v59 = vmul.f32 %v1039_v20, %v1008_v39 }
 0x43d   :  { %v1047_v9 = vadd.f32 %v1044_v21, %v1041_v33  ;;  %v1068_v18 = vadd.f32 %v1065_v32, %v1062_v42  ;;  %v1063_v48 = vmul.f32 %v1060_v36, %v1008_v39  ;;  %v1099_v41 = vstv %s5957_s22  ;;  %s6051_s22 = sld [smem:[#allocation2 + $0x26]] }
 0x43e   :  { %v1045_v25 = vadd.f32 %v1037_v23, %v1032_v29  ;;  %v1066_v45 = vadd.f32 %v1058_v55, %v1053_v1 }
 0x43f   :  { %v1074_v52 = vrot.slane %v1047_v9, 1  ;;  %v1086_v44 = vrot.slane %v1068_v18, 2 }
 0x440   :  { %v1048_v43 = vadd.f32 %v1045_v25, %v1042_v59  ;;  %v1069_v30 = vadd.f32 %v1066_v45, %v1063_v48  ;;  %v9653_v48 = vmov 0 }
 0x441   :  { %v1075_v34 = vsel %vm9627_vm6, %v1073_v11, %v1074_v52  ;;  %v1087_v40 = vsel %vm9628_vm9, %v1085_v54, %v1086_v44  ;;  %vm1206_vm6 = vcmp.le.s32.totalorder %v7510_v3, 8  ;;  %vm9633_vm9 = vcmp.ge.s32.totalorder %v7510_v3, 1 }
 0x442   :  { %v1080_v13 = vadd.f32 %v1075_v34, %v1026_v7  ;;  %v1076_v47 = vrot.slane %v1048_v43, 1  ;;  %v1088_v57 = vrot.slane %v1069_v30, 2  ;;  %v9657_v11 = vmov 0 }
 0x444   :  { %v1092_v53 = vadd.f32 %v1087_v40, %v1080_v13  ;;  %v1077_v60 = vsel %vm9629_vm13, %v1074_v52, %v1076_v47  ;;  %v1089_v20 = vsel %vm9630_vm8, %v1086_v44, %v1088_v57  ;;  %vm8208_vm13 = vmand %vm9633_vm9, %vm1206_vm6 }
 0x445   :  { %v1081_v36 = vadd.f32 %v1077_v60, %v1027_v27  ;;  %v8204_v27 = vadd.s32 4294967286, %v7510_v3  ;;  %vm1209_vm6 = vmand %vm8208_vm13, %vm9637_vm15  ;;  %vm9643_vm15 = vcmp.eq.s32.totalorder %v7572_v15, %v7928_v63  ;;  %v1518_v60 = vstv %s5992_s26  ;;  %s6059_s26 = sld [smem:[#allocation4 + $0x9]] }
 0x446   :  { %v1096_v56 = vmul.f32 %v1095_v22, %v1092_v53  ;;  %vm8233_vm2 = vmand %vm8208_vm13, %vm9640_vm10  ;;  %v1546_v53 = vstv %s5998_s24  ;;  %s6057_s24 = sld [smem:[#allocation2 + $0x2c]] }
 0x447   :  { %v1093_v0 = vadd.f32 %v1089_v20, %v1081_v36  ;;  %v1217_v24 = vmul.u32 2, %v8204_v27  ;;  %vm1214_vm8 = vcmp.ge.s32.totalorder %v8204_v27, 1  ;;  %v1526_v20 = vstv %s5994_s25  ;;  %s6058_s25 = sld [smem:[#allocation4 + $0x8]] }
 0x448   :  { %v1100_v23 = vadd.f32 %v1099_v41, %v1096_v56  ;;  %v1542_v36 = vstv %s5997_s27  ;;  %s6077_s27 = sld [smem:[#allocation2 + $0x31]] }
 0x449   :  { %v1097_v21 = vmul.f32 %v1095_v22, %v1093_v0  ;;  %v1218_v31 = vadd.s32 18, %v1217_v24  ;;  %v1530_v22 = vstv %s5995_s23  ;;  %v1550_v0 = vstv %s8360_s29  ;;  %s6054_s23 = sld [smem:[#allocation2 + $0x29]]  ;;  %s6080_s29 = sld [smem:[#allocation2 + $0x34]] }
 0x44a   :  { %v1102_v33 = vmax.f32 %v1100_v23, 0.0  ;;  %v1515_v23 = vstv %s5991_s30  ;;  %s6076_s30 = sld [smem:[#allocation2 + $0x30]] }
 0x44b   :  { %v1101_v32 = vadd.f32 %v1099_v41, %v1097_v21  ;;  %v5962_v9 = vadd.s32 4294967295, %v1218_v31  ;;  %v1534_v41 = vstv %s8358_s28  ;;  %s6073_s28 = sld [smem:[#allocation2 + $0x2d]] }
 0x44c   :  { %v1106_v58 = vrot.slane %v1102_v33, 1 }
 0x44d   :  { %v1103_v42 = vmax.f32 %v1101_v32, 0.0  ;;  %vm1220_vm7 = vcmp.eq.s32.totalorder %v7508_v2, %v5962_v9  ;;  %vm1221_vm12 = vcmp.eq.s32.totalorder %v7517_v5, %v5962_v9  ;;  %vm1222_vm3 = vcmp.eq.s32.totalorder %v7560_v12, %v5962_v9 }
 0x44e   :  { %vm1223_vm14 = vcmp.eq.s32.totalorder %v7572_v15, %v5962_v9 }
 0x44f   :  { %v1107_v39 = vrot.slane %v1103_v42, 1 }
 0x451   :  { %v1108_v7 = vsel %vm9631_vm11, %v1106_v58, %v1107_v39  ;;  %v1112_v29 = vmax.f32 %v1103_v42, %v1107_v39  ;;  %vm1215_vm11 = vcmp.le.s32.totalorder %v8204_v27, 8  ;;  %v1521_v39 = vstv %s5993_s2  ;;  %s6079_s2 = sld [smem:[#allocation2 + $0x33]] }
 0x452   :  { %v1111_v1 = vmax.f32 %v1102_v33, %v1108_v7  ;;  %vm8224_vm9 = vmand %vm1214_vm8, %vm1215_vm11 }
 0x453   :  { %vm8244_vm8 = vmand %vm8208_vm13, %vm9643_vm15 }
 0x454   :  { %v7281_v55 = vpack.c.bf16 %v1112_v29, %v1111_v1  ;;  %vm1225_vm11 = vmand %vm8224_vm9, %vm1220_vm7 }
 0x455   :  { %vm1226_vm10 = vmand %vm8224_vm9, %vm1221_vm12 }
 0x456   :  { %7283 = vmatprep.subr.msk.bf16.mxu0 %vm9632_vm5, %v7281_v55  ;;  %vm1231_vm0 = vmor %vm1209_vm6, %vm1226_vm10 }
 0x457   :  { %7286 = vmatpush3.bf16.msk.msra.mxu0 %vm9632_vm5, %v7281_v55  ;;  %vm9636_vm5 = vnez %v9593_v37  ;;  %vm1227_vm15 = vmand %vm8224_vm9, %vm1222_vm3  ;;  %vm9646_vm3 = vcmp.eq.s32.totalorder %v7616_v19, %v7928_v63 }
 0x458   :  { %vm1228_vm7 = vmand %vm8224_vm9, %vm1223_vm14 }
 0x459   :  { %vm1232_vm12 = vmor %vm8233_vm2, %vm1227_vm15 }
 0x45a   :  { %6771 = vmatmul.mubr.msk.f32.vlgmr.msra.gmra.mrb[22].mxu0 %vm1113_vm1, %v7902_v17  ;;  %vm1208_vm1 = vmand %vm8208_vm13, %vm9636_vm5 }
 0x45b   :  { %vm1230_vm5 = vmor %vm1208_vm1, %vm1225_vm11  ;;  %vm9650_vm11 = vnez %v9547_v8 }
 0x45c   :  { %vm7287_vm4 = vmpackc.low %vm1231_vm0, %vm1230_vm5  ;;  %vm1224_vm0 = vcmp.eq.s32.totalorder %v7616_v19, %v5962_v9 }
 0x45d   :  { %7288 = vmatprep.subr.msk.bf16.mxu1 %vm7287_vm4, %v9594_v49  ;;  %vm1233_vm1 = vmor %vm8244_vm8, %vm1228_vm7  ;;  %vm9649_vm8 = vcmask 1042432   ;;  %vm9652_vm7 = vcmp.eq.s32.totalorder %v7517_v5, %v7520_v6 }
 0x45e   :  { %7290 = vmatpush3.bf16.msk.msra.mxu1 %vm7287_vm4, %v9594_v49  ;;  %vm7291_vm6 = vmpackc.low %vm1233_vm1, %vm1232_vm12 }
 0x45f   :  { %7292 = vmatprep.subr.msk.bf16.mxu1 %vm7291_vm6, %v9594_v49  ;;  %vm1212_vm4 = vmand %vm8208_vm13, %vm9646_vm3 }
 0x460   :  { %vm1229_vm14 = vmand %vm8224_vm9, %vm1224_vm0 }
 0x461   :  { %vm1234_vm2 = vmor %vm1212_vm4, %vm1229_vm14  ;;  %vm1245_vm4 = vcmask 285696   ;;  %vm9659_vm14 = vcmp.eq.s32.totalorder %v7560_v12, %v7520_v6 }
 0x462   :  { %7294 = vmatpush3.bf16.msk.msra.mxu1 %vm7291_vm6, %v9594_v49  ;;  %v5967_v45 = vsel %vm1234_vm2, 1.0, %v9586_v35  ;;  %vm8279_vm5 = vmor %vm8208_vm13, %vm8224_vm9  ;;  %vm9655_vm13 = vnez %v9555_v14  ;;  %vm9656_vm6 = vnez %v9557_v16 }
 0x463   :  { %6781 = vmatprep.subr.msk.mxu1 %vm9649_vm8, %v5967_v45  ;;  %vm1333_vm10 = vmand %vm9650_vm11, %vm8279_vm5 }
 0x464   :  { %vm9651_vm15 = vmmov %vm9649_vm8  ;;  %vm9660_vm8 = vcmp.eq.s32.totalorder %v7560_v12, %v7544_v10 }
 0x465   :  { %vm1334_vm12 = vmand %vm9652_vm7, %vm8279_vm5 }
 0x466   :  { %6782 = vmatpush3.msk.msra.mxu1 %vm9651_vm15, %v5967_v45  ;;  %vm8294_vm1 = vmpackc.low %vm1334_vm12, %vm1333_vm10  ;;  %vm9661_vm15 = vcmask 1043456  }
 0x467   :  { %v9654_v48 = vsel %vm8294_vm1, 4294967295, %v9653_v48  ;;  %7296 = vmatprep.subr.msk.bf16.mxu0 %vm8294_vm1, %v9594_v49  ;;  %vm1427_vm9 = vmand %vm9655_vm13, %vm8279_vm5 }
 0x468   :  { %vm1428_vm0 = vmand %vm9656_vm6, %vm8279_vm5  ;;  %7298 = vmatpush3.bf16.msk.msra.mxu0 %vm8294_vm1, %v9594_v49 }
 0x469   :  { %vm8312_vm3 = vmpackc.low %vm1428_vm0, %vm1427_vm9  ;;  %vm9665_vm0 = vmmov 0  }
 0x46a   :  { %v9658_v11 = vsel %vm8312_vm3, 4294967295, %v9657_v11  ;;  %7300 = vmatprep.subr.msk.bf16.mxu1 %vm8312_vm3, %v9594_v49  ;;  %vm1335_vm2 = vmand %vm9659_vm14, %vm8279_vm5  ;;  %vm9667_vm14 = vcmask 1045504  }
 0x46b   :  { %v8330_v40 = vsel %vm1335_vm2, 1.0, %v9586_v35  ;;  %vm1429_vm10 = vmand %vm9660_vm8, %vm8279_vm5  ;;  %vm9523_vm5 = vcmask 162816   ;;  %vm9524_vm2 = vcmask 56320  }
 0x46c   :  { %6790 = vmatprep.subr.msk.mxu0 %vm9661_vm15, %v8330_v40  ;;  %v8340_v13 = vsel %vm1429_vm10, 1.0, %v9586_v35  ;;  %vm9662_vm7 = vmmov %vm9661_vm15  ;;  %vm1663_vm10 = vcmp.le.s32.totalorder %v7510_v3, 4 }
 0x46d   :  { %vm9663_vm12 = vmmov %vm9662_vm7 }
 0x46e   :  { %6791 = vmatpush3.msk.msra.mxu0 %vm9663_vm12, %v8330_v40  ;;  %vm9664_vm9 = vmmov %vm9662_vm7  ;;  %vm9669_vm12 = vcmp.ge.s32.totalorder %v7510_v3, 1 }
 0x46f   :  { %6804 = vmatprep.subr.mxu0 %v9586_v35 }
 0x52d   :  { %v6772_v54 = vpop.f32.mrb[22].mxu0 }
 0x52e   :  { %1200 = vrot.lane.b32.xlu0 %v6772_v54, %s7478_s13  ;;  %v1187_v52 = vpop.f32.mrb[23].mxu0 }
 0x52f   :  { %1198 = vrot.lane.b32.xlu1 %v1187_v52, %s7478_s13 }
 0x5a0   :  { %v1201_v44 = vpop.permute.xlu0 %1200 }
 0x5a1   :  { %v1199_v43 = vpop.permute.xlu1 %1198  ;;  %v1205_v34 = vmax.f32 %v6772_v54, %v1201_v44 }
 0x5a2   :  { %v1204_v30 = vmax.f32 %v1187_v52, %v1199_v43 }
 0x5a4   :  { %6783 = vmatprep.mubr.msk.f32.mxu1 %vm1245_vm4, %v1204_v30 }
 0x5a5   :  { %6784 = vmatmul.mubr.msk.f32.vlgmr.msra.gmra.mrb[22].mxu1 %vm1245_vm4, %v1205_v34  ;;  %vm9666_vm4 = vcmask 1046528  }
 0x5a6   :  { %7302 = vmatpush3.bf16.msk.msra.mxu1 %vm8312_vm3, %v9594_v49  ;;  %vm9668_vm8 = vmmov %vm9666_vm4 }
 0x5a7   :  { %6799 = vmatprep.subr.msk.mxu1 %vm9662_vm7, %v8340_v13 }
 0x5aa   :  { %6800 = vmatpush3.msk.msra.mxu1 %vm9664_vm9, %v8340_v13  ;;  %vm8381_vm9 = vmand %vm9669_vm12, %vm1663_vm10 }
 0x5ab   :  { %7303 = vmatprep.subr.bf16.mxu1 %v9582_v28 }
 0x678   :  { %v6785_v47 = vpop.f32.mrb[22].mxu1 }
 0x679   :  { %v1321_v57 = vpop.f32.mrb[23].mxu1  ;;  %v1532_v56 = vmul.f32 %v6785_v47, %v1530_v22  ;;  %v1548_v32 = vmul.f32 %v6785_v47, %v1546_v53 }
 0x67a   :  { %6792 = vmatprep.mubr.msk.f32.mxu0 %vm9523_vm5, %v1321_v57  ;;  %6801 = vmatprep.mubr.msk.f32.mxu1 %vm9523_vm5, %v1321_v57  ;;  %v1519_v42 = vmul.f32 %v1518_v60, %v1321_v57  ;;  %v1531_v58 = vmul.f32 %v1530_v22, %v1321_v57  ;;  %v1547_v46 = vmul.f32 %v1546_v53, %v1321_v57 }
 0x67b   :  { %6793 = vmatmul.mubr.msk.f32.vlgmr.msra.gmra.mrb[24].mxu0 %vm9523_vm5, %v6785_v47  ;;  %6802 = vmatmul.mubr.msk.f32.vlgmr.msra.gmra.mrb[24].mxu1 %vm9523_vm5, %v6785_v47  ;;  %vm9675_vm5 = vcmp.eq.s32.totalorder %v7517_v5, %v7928_v63 }
 0x67c   :  { %6806 = vmatprep.mubr.msk.f32.mxu0 %vm9665_vm0, %v9586_v35  ;;  %6815 = vmatprep.mubr.msk.f32.mxu1 %vm9665_vm0, %v9586_v35  ;;  %vm1666_vm10 = vmand %vm8381_vm9, %vm9675_vm5 }
 0x74e   :  { %v6794_v21 = vpop.f32.mrb[24].mxu0  ;;  %v6803_v33 = vpop.f32.mrb[24].mxu1 }
 0x74f   :  { %v1528_v7 = vmul.f32 %v6794_v21, %v1526_v20  ;;  %v1544_v29 = vmul.f32 %v6794_v21, %v1542_v36  ;;  %v1536_v1 = vmul.f32 %v6803_v33, %v1534_v41  ;;  %v1418_v55 = vpop.f32.mrb[25].mxu0  ;;  %v1505_v24 = vpop.f32.mrb[25].mxu1  ;;  %v1552_v31 = vmul.f32 %v6803_v33, %v1550_v0 }
 0x750   :  { %v1516_v17 = vmul.f32 %v1515_v23, %v1418_v55  ;;  %v1527_v9 = vmul.f32 %v1526_v20, %v1418_v55  ;;  %v1543_v18 = vmul.f32 %v1542_v36, %v1418_v55  ;;  %v1522_v59 = vmul.f32 %v1521_v39, %v1505_v24 }
 0x751   :  { %v1538_v25 = vadd.f32 %v1532_v56, %v1528_v7  ;;  %v1554_v45 = vadd.f32 %v1548_v32, %v1544_v29  ;;  %v1535_v54 = vmul.f32 %v1534_v41, %v1505_v24  ;;  %v1551_v30 = vmul.f32 %v1550_v0, %v1505_v24 }
 0x752   :  { %v1523_v52 = vadd.f32 %v1519_v42, %v1516_v17  ;;  %v1537_v44 = vadd.f32 %v1531_v58, %v1527_v9  ;;  %v1553_v43 = vadd.f32 %v1547_v46, %v1543_v18  ;;  %v1572_v32 = vstv %s6000_s4  ;;  %s6075_s4 = sld [smem:[#allocation2 + $0x2f]] }
 0x753   :  { %v1540_v34 = vadd.f32 %v1538_v25, %v1536_v1  ;;  %v1556_v47 = vadd.f32 %v1554_v45, %v1552_v31  ;;  %v1575_v42 = vstv %s6001_s5  ;;  %v8373_v1 = vadd.s32 4294967290, %v7510_v3  ;;  %s6078_s5 = sld [smem:[#allocation2 + $0x32]] }
 0x754   :  { %v1524_v22 = vadd.f32 %v1523_v52, %v1522_v59  ;;  %v1539_v60 = vadd.f32 %v1537_v44, %v1535_v54  ;;  %v1555_v21 = vadd.f32 %v1553_v43, %v1551_v30  ;;  %v9682_v59 = vmov 0 }
 0x755   :  { %v1560_v57 = vrot.slane %v1540_v34, 1  ;;  %v1567_v53 = vrot.slane %v1556_v47, 2  ;;  %v1672_v55 = vmul.u32 2, %v8373_v1  ;;  %vm1669_vm15 = vcmp.ge.s32.totalorder %v8373_v1, 1 }
 0x756   :  { %v1559_v23 = vrot.slane %v1539_v60, 1  ;;  %v1566_v20 = vrot.slane %v1555_v21, 2  ;;  %vm1670_vm7 = vcmp.le.s32.totalorder %v8373_v1, 4  ;;  %v9685_v47 = vmov 0 }
 0x757   :  { %v1673_v24 = vadd.s32 10, %v1672_v55  ;;  %v1936_v21 = vstv %s6024_s6  ;;  %s6081_s6 = sld [smem:[#allocation2 + $0x35]] }
 0x758   :  { %v1561_v36 = vsel %vm9666_vm4, %v1559_v23, %v1560_v57  ;;  %v1568_v56 = vsel %vm9667_vm14, %v1566_v20, %v1567_v53  ;;  %vm8385_vm4 = vmand %vm1669_vm15, %vm1670_vm7  ;;  %vm9674_vm14 = vnez %v9593_v37  ;;  %v1947_v57 = vstv %s6027_s7  ;;  %s6082_s7 = sld [smem:[#allocation4 + $0xa]] }
 0x759   :  { %v1563_v41 = vadd.f32 %v1561_v36, %v1524_v22  ;;  %v6005_v17 = vadd.s32 4294967295, %v1673_v24  ;;  %vm8410_vm5 = vmor %vm8381_vm9, %vm8385_vm4  ;;  %v1933_v53 = vstv %s6023_s8  ;;  %v1944_v23 = vstv %s6026_s10  ;;  %s6083_s8 = sld [smem:[#allocation4 + $0xb]]  ;;  %s6096_s10 = sld [smem:[#allocation2 + $0x3a]] }
 0x75a   :  { %v1955_v20 = vstv %s6029_s11  ;;  %v1958_v36 = vstv %s6030_s9  ;;  %s6093_s9 = sld [smem:[#allocation2 + $0x37]]  ;;  %s6092_s11 = sld [smem:[#allocation2 + $0x36]] }
 0x75b   :  { %v1570_v33 = vadd.f32 %v1568_v56, %v1563_v41  ;;  %vm1675_vm12 = vcmp.eq.s32.totalorder %v7508_v2, %v6005_v17  ;;  %v1939_v56 = vstv %s6025_s12  ;;  %v1950_v41 = vstv %s6028_s14  ;;  %s6099_s12 = sld [smem:[#allocation2 + $0x3d]]  ;;  %s6095_s14 = sld [smem:[#allocation2 + $0x39]] }
 0x75c   :  { %vm1678_vm15 = vmand %vm8385_vm4, %vm1675_vm12 }
 0x75d   :  { %v1573_v0 = vmul.f32 %v1572_v32, %v1570_v33 }
 0x75f   :  { %v1576_v58 = vadd.f32 %v1575_v42, %v1573_v0 }
 0x761   :  { %v1577_v39 = vmax.f32 %v1576_v58, 0.0  ;;  %v1961_v58 = vstv %s6031_s15  ;;  %s6098_s15 = sld [smem:[#allocation2 + $0x3c]] }
 0x763   :  { %v1579_v7 = vrot.slane %v1577_v39, 1 }
 0x765   :  { %v1581_v29 = vmax.f32 %v1577_v39, %v1579_v7 }
 0x767   :  { %6805 = vmatpush3.msk.msra.mxu0 %vm9668_vm8, %v1581_v29  ;;  %vm1665_vm8 = vmand %vm8381_vm9, %vm9674_vm14 }
 0x768   :  { %6807 = vmatmul.mubr.msk.f32.vlgmr.msra.gmra.mrb[26].mxu0 %vm9524_vm2, %v7893_v38  ;;  %7306 = vmatprep.subr.bf16.mxu0 %v9582_v28  ;;  %vm1676_vm2 = vcmp.eq.s32.totalorder %v7517_v5, %v6005_v17  ;;  %vm1681_vm1 = vmor %vm1665_vm8, %vm1678_vm15 }
 0x769   :  { %6822 = vmatprep.mubr.msk.f32.mxu0 %vm9665_vm0, %v9586_v35  ;;  %vm1679_vm7 = vmand %vm8385_vm4, %vm1676_vm2  ;;  %vm9678_vm2 = vcmp.eq.s32.totalorder %v7517_v5, %v7520_v6  ;;  %v9535_v6 = vmov 1.0  }
 0x76a   :  { %vm1682_vm3 = vmor %vm1666_vm10, %vm1679_vm7  ;;  %vm9680_vm7 = vcmask 1042432  }
 0x76b   :  { %vm7304_vm0 = vmpackc.low %vm1682_vm3, %vm1681_vm1  ;;  %vm1677_vm1 = vcmp.eq.s32.totalorder %v7560_v12, %v6005_v17  ;;  %vm9679_vm3 = vcmp.eq.s32.totalorder %v7560_v12, %v7928_v63 }
 0x76c   :  { %7305 = vmatpush3.bf16.msk.msra.mxu1 %vm7304_vm0, %v9594_v49  ;;  %vm1771_vm8 = vmand %vm9678_vm2, %vm8410_vm5  ;;  %vm9681_vm2 = vcmask 1043456  }
 0x76d   :  { %6813 = vmatprep.subr.mxu1 %v9586_v35  ;;  %v6014_v18 = vsel %vm1771_vm8, 1.0, %v9586_v35  ;;  %vm1667_vm0 = vmand %vm8381_vm9, %vm9679_vm3 }
 0x76e   :  { %vm1680_vm10 = vmand %vm8385_vm4, %vm1677_vm1  ;;  %v8434_v45 = vpack.c.bf16 %v6014_v18, %v9535_v6  ;;  %vm1690_vm1 = vcmask 154624  }
 0x76f   :  { %vm1683_vm12 = vmor %vm1667_vm0, %vm1680_vm10  ;;  %vm9687_vm10 = vmmov 0  }
 0x770   :  { %v6008_v25 = vsel %vm1683_vm12, 1.0, %v9586_v35  ;;  %vm1770_vm15 = vmand %vm9650_vm11, %vm8410_vm5  ;;  %vm1984_vm12 = vcmask 23552  }
 0x771   :  { %6814 = vmatpush3.msk.msra.mxu1 %vm9680_vm7, %v6008_v25  ;;  %vm8438_vm8 = vmpackc.low %vm9681_vm2, %vm1770_vm15 }
 0x772   :  { %v9683_v59 = vsel %vm8438_vm8, 4294967295, %v9682_v59  ;;  %7310 = vmatprep.subr.bf16.mxu1 %v9582_v28  ;;  %7309 = vmatpush3.bf16.msk.msra.mxu0 %vm8438_vm8, %v8434_v45  ;;  %vm1854_vm9 = vmand %vm9656_vm6, %vm8410_vm5  ;;  %vm9695_vm8 = vcmask 1042432  }
 0x773   :  { %6832 = vmatprep.subr.mxu0 %v9586_v35  ;;  %v6019_v44 = vsel %vm1854_vm9, 1.0, %v9586_v35  ;;  %vm1853_vm4 = vmand %vm9655_vm13, %vm8410_vm5  ;;  %vm9530_vm5 = vcmask 97280  }
 0x774   :  { %v8458_v30 = vpack.c.bf16 %v6019_v44, %v9535_v6  ;;  %vm9684_vm3 = vmmov %vm9681_vm2 }
 0x775   :  { %vm8461_vm0 = vmpackc.low %vm9684_vm3, %vm1853_vm4  ;;  %vm9689_vm4 = vcmp.ge.s32.totalorder %v7510_v3, 1 }
 0x776   :  { %v9686_v47 = vsel %vm8461_vm0, 4294967295, %v9685_v47  ;;  %vm9688_vm15 = vmmov %vm9680_vm7  ;;  %vm2065_vm7 = vcmp.le.s32.totalorder %v7510_v3, 2 }
 0x83b   :  { %v1654_v54 = vpop.f32.mrb[26].mxu0 }
 0x83c   :  { %1659 = vrot.lane.b32.xlu1 %v1654_v54, %s7478_s13  ;;  %v6808_v52 = vpop.f32.mrb[27].mxu0 }
 0x8ae   :  { %v1660_v43 = vpop.permute.xlu1 %1659 }
 0x8af   :  { %v1662_v34 = vmax.f32 %v1654_v54, %v1660_v43 }
 0x8b1   :  { %6816 = vmatmul.mubr.msk.f32.vlgmr.msra.gmra.mrb[26].mxu1 %vm1690_vm1, %v1662_v34  ;;  %vm8491_vm1 = vmand %vm9689_vm4, %vm2065_vm7 }
 0x8b2   :  { %7313 = vmatpush3.bf16.msk.msra.mxu1 %vm8461_vm0, %v8458_v30  ;;  %6829 = vmatprep.mubr.msk.f32.mxu1 %vm9687_vm10, %v9586_v35  ;;  %vm2067_vm3 = vmand %vm8491_vm1, %vm9674_vm14 }
 0x8b3   :  { %7314 = vmatprep.subr.bf16.mxu1 %v9582_v28 }
 0x984   :  { %v1763_v22 = vpop.f32.mrb[26].mxu1 }
 0x985   :  { %v6817_v60 = vpop.f32.mrb[27].mxu1  ;;  %6823 = vmatmul.mubr.msk.f32.vlgmr.msra.gmra.mrb[28].mxu0 %vm9530_vm5, %v1763_v22  ;;  %6830 = vmatmul.mubr.msk.f32.vlgmr.msra.gmra.mrb[28].mxu1 %vm9530_vm5, %v1763_v22  ;;  %v1937_v33 = vmul.f32 %v1936_v21, %v1763_v22  ;;  %v1948_v42 = vmul.f32 %v1947_v57, %v1763_v22  ;;  %v1959_v55 = vmul.f32 %v1958_v36, %v1763_v22  ;;  %v1974_v57 = vstv %s6032_s16  ;;  %s6094_s16 = sld [smem:[#allocation2 + $0x38]] }
 0x986   :  { %6834 = vmatprep.mubr.msk.f32.mxu0 %vm9687_vm10, %v9586_v35  ;;  %6841 = vmatprep.mubr.msk.f32.mxu1 %vm9687_vm10, %v9586_v35 }
 0xa58   :  { %v1849_v32 = vpop.f32.mrb[28].mxu0  ;;  %v1928_v0 = vpop.f32.mrb[28].mxu1 }
 0xa59   :  { %v1934_v39 = vmul.f32 %v1933_v53, %v1849_v32  ;;  %v1945_v7 = vmul.f32 %v1944_v23, %v1849_v32  ;;  %v1956_v29 = vmul.f32 %v1955_v20, %v1849_v32  ;;  %v6824_v46 = vpop.f32.mrb[29].mxu0  ;;  %v6831_v24 = vpop.f32.mrb[29].mxu1  ;;  %v1940_v31 = vmul.f32 %v1939_v56, %v1928_v0 }
 0xa5a   :  { %v1951_v17 = vmul.f32 %v1950_v41, %v1928_v0  ;;  %v1962_v54 = vmul.f32 %v1961_v58, %v1928_v0  ;;  %v1977_v23 = vstv %s6033_s17  ;;  %v8483_v32 = vadd.s32 4294967292, %v7510_v3  ;;  %s6097_s17 = sld [smem:[#allocation2 + $0x3b]] }
 0xa5b   :  { %v1941_v9 = vadd.f32 %v1937_v33, %v1934_v39  ;;  %v1952_v18 = vadd.f32 %v1948_v42, %v1945_v7  ;;  %v1963_v25 = vadd.f32 %v1959_v55, %v1956_v29 }
 0xa5c   :  { %v2073_v33 = vmul.u32 2, %v8483_v32  ;;  %vm2070_vm2 = vcmp.ge.s32.totalorder %v8483_v32, 1  ;;  %vm2071_vm9 = vcmp.le.s32.totalorder %v8483_v32, 2 }
 0xa5d   :  { %v1942_v52 = vadd.f32 %v1941_v9, %v1940_v31  ;;  %v1953_v44 = vadd.f32 %v1952_v18, %v1951_v17  ;;  %v1964_v43 = vadd.f32 %v1963_v25, %v1962_v54  ;;  %v9698_v17 = vmov 0 }
 0xa5e   :  { %v2074_v42 = vadd.s32 6, %v2073_v33  ;;  %v2320_v25 = vstv %s6050_s18  ;;  %v2331_v54 = vstv %s6053_s19  ;;  %s6100_s18 = sld [smem:[#allocation2 + $0x3e]]  ;;  %s6101_s19 = sld [smem:[#allocation4 + $0xc]] }
 0xa5f   :  { %v1966_v34 = vrot.slane %v1953_v44, 1  ;;  %v1970_v21 = vrot.slane %v1964_v43, 2  ;;  %v2328_v44 = vstv %s6052_s1  ;;  %v2339_v43 = vstv %s6055_s21  ;;  %s6120_s1 = sld [smem:[#allocation2 + $0x43]]  ;;  %s6116_s21 = sld [smem:[#allocation2 + $0x3f]] }
 0xa60   :  { %v6037_v58 = vadd.s32 4294967295, %v2074_v42 }
 0xa61   :  { %v1968_v60 = vadd.f32 %v1966_v34, %v1942_v52  ;;  %v2317_v52 = vstv %s6049_s20  ;;  %v2342_v34 = vstv %s6056_s0  ;;  %s6102_s20 = sld [smem:[#allocation4 + $0xd]]  ;;  %s6117_s0 = sld [smem:[#allocation2 + $0x40]] }
 0xa62   :  { %vm2076_vm7 = vcmp.eq.s32.totalorder %v7508_v2, %v6037_v58  ;;  %vm2077_vm4 = vcmp.eq.s32.totalorder %v7517_v5, %v6037_v58 }
 0xa63   :  { %v1972_v53 = vadd.f32 %v1970_v21, %v1968_v60  ;;  %v2323_v60 = vstv %s6051_s22  ;;  %v2334_v21 = vstv %s6054_s23  ;;  %s6123_s22 = sld [smem:[#allocation2 + $0x46]]  ;;  %s6119_s23 = sld [smem:[#allocation2 + $0x42]] }
 0xa65   :  { %v1975_v22 = vmul.f32 %v1974_v57, %v1972_v53 }
 0xa67   :  { %v1978_v20 = vadd.f32 %v1977_v23, %v1975_v22 }
 0xa69   :  { %v1979_v36 = vmax.f32 %v1978_v20, 0.0  ;;  %v2345_v20 = vstv %s6057_s24  ;;  %s6122_s24 = sld [smem:[#allocation2 + $0x45]] }
 0xa6b   :  { %v1981_v56 = vrot.slane %v1979_v36, 1 }
 0xa6d   :  { %v1983_v41 = vmax.f32 %v1979_v36, %v1981_v56 }
 0xa6f   :  { %6833 = vmatpush3.msk.msra.mxu0 %vm9688_vm15, %v1983_v41  ;;  %vm9694_vm15 = vcmp.eq.s32.totalorder %v7517_v5, %v7928_v63 }
 0xa70   :  { %6835 = vmatmul.mubr.msk.f32.vlgmr.msra.gmra.mrb[30].mxu0 %vm1984_vm12, %v7893_v38  ;;  %6844 = vmatprep.subr.mxu0 %v9586_v35  ;;  %vm8499_vm12 = vmand %vm2070_vm2, %vm2071_vm9 }
 0xa71   :  { %6846 = vmatprep.mubr.msk.f32.mxu0 %vm9687_vm10, %v9586_v35  ;;  %vm2068_vm5 = vmand %vm8491_vm1, %vm9694_vm15  ;;  %vm2086_vm15 = vcmask 89088  }
 0xa72   :  { %vm2078_vm6 = vmand %vm8499_vm12, %vm2076_vm7 }
 0xa73   :  { %vm2079_vm0 = vmand %vm8499_vm12, %vm2077_vm4  ;;  %vm9700_vm4 = vcmp.ge.s32.totalorder %v7510_v3, 1 }
 0xa74   :  { %vm2080_vm2 = vmor %vm2067_vm3, %vm2078_vm6  ;;  %vm2450_vm3 = vcmp.le.s32.totalorder %v7510_v3, 1 }
 0xa75   :  { %vm2081_vm9 = vmor %vm2068_vm5, %vm2079_vm0  ;;  %vm9537_vm0 = vcmask 64512   ;;  %vm9539_vm5 = vcmask 1040384  }
 0xa76   :  { %v6039_v7 = vsel %vm2081_vm9, 1.0, %v9586_v35  ;;  %vm7316_vm14 = vmpackc.low %vm9695_vm8, %vm2080_vm2 }
 0xa77   :  { %v7315_v63 = vpack.c.bf16 %v6039_v7, %v9535_v6  ;;  %vm2163_vm6 = vmor %vm8491_vm1, %vm8499_vm12  ;;  %vm9538_vm1 = vcmask 7168  }
 0xa78   :  { %vm8536_vm8 = vmand %vm9655_vm13, %vm2163_vm6 }
 0xa79   :  { %7317 = vmatpush3.bf16.msk.msra.mxu1 %vm7316_vm14, %v7315_v63  ;;  %vm8527_vm14 = vmand %vm9650_vm11, %vm2163_vm6  ;;  %v9699_v17 = vsel %vm8536_vm8, 4294967295, %v9698_v17 }
 0xa7a   :  { %6849 = vmatprep.subr.mxu1 %v9586_v35  ;;  %6845 = vmatpush3.msk.msra.mxu0 %vm8527_vm14, %v9535_v6  ;;  %vm8561_vm2 = vmand %vm9700_vm4, %vm2450_vm3  ;;  %vm9705_vm3 = vcmask 56320   ;;  %vm9711_vm4 = vcmask 1040384  }
 0xa7b   :  { %6854 = vmatprep.subr.mxu0 %v9586_v35 }
 0xb43   :  { %v2056_v29 = vpop.f32.mrb[30].mxu0 }
 0xb44   :  { %2061 = vrot.lane.b32.xlu0 %v2056_v29, %s7478_s13  ;;  %v6836_v55 = vpop.f32.mrb[31].mxu0 }
 0xbb6   :  { %v2062_v46 = vpop.permute.xlu0 %2061 }
 0xbb7   :  { %v2064_v24 = vmax.f32 %v2056_v29, %v2062_v46 }
 0xbb9   :  { %6842 = vmatmul.mubr.msk.f32.vlgmr.msra.gmra.mrb[30].mxu1 %vm2086_vm15, %v2064_v24  ;;  %vm9703_vm15 = vnez %v9593_v37 }
 0xbba   :  { %6851 = vmatprep.mubr.msk.f32.mxu1 %vm9687_vm10, %v9586_v35  ;;  %6850 = vmatpush3.msk.msra.mxu1 %vm8536_vm8, %v9535_v6  ;;  %vm2452_vm6 = vmand %vm8561_vm2, %vm9703_vm15  ;;  %vm9704_vm8 = vcmask 1046528  }
 0xbbb   :  { %6859 = vmatprep.subr.mxu1 %v9586_v35 }
 0xc8c   :  { %v2159_v9 = vpop.f32.mrb[30].mxu1 }
 0xc8d   :  { %v6843_v18 = vpop.f32.mrb[31].mxu1  ;;  %6847 = vmatmul.mubr.msk.f32.vlgmr.msra.gmra.mrb[32].mxu0 %vm9537_vm0, %v2159_v9  ;;  %6852 = vmatmul.mubr.msk.f32.vlgmr.msra.gmra.mrb[32].mxu1 %vm9537_vm0, %v2159_v9  ;;  %v2321_v53 = vmul.f32 %v2320_v25, %v2159_v9  ;;  %v2332_v23 = vmul.f32 %v2331_v54, %v2159_v9  ;;  %v2343_v33 = vmul.f32 %v2342_v34, %v2159_v9 }
 0xc8e   :  { %6856 = vmatprep.mubr.msk.f32.mxu0 %vm9687_vm10, %v9586_v35  ;;  %6861 = vmatprep.mubr.msk.f32.mxu1 %vm9687_vm10, %v9586_v35 }
 0xd60   :  { %v2239_v57 = vpop.f32.mrb[32].mxu0  ;;  %v2312_v22 = vpop.f32.mrb[32].mxu1 }
 0xd61   :  { %v2318_v36 = vmul.f32 %v2317_v52, %v2239_v57  ;;  %v2329_v56 = vmul.f32 %v2328_v44, %v2239_v57  ;;  %v2340_v41 = vmul.f32 %v2339_v43, %v2239_v57  ;;  %v6848_v42 = vpop.f32.mrb[33].mxu0  ;;  %v6853_v0 = vpop.f32.mrb[33].mxu1  ;;  %v2324_v58 = vmul.f32 %v2323_v60, %v2312_v22 }
 0xd62   :  { %v2335_v39 = vmul.f32 %v2334_v21, %v2312_v22  ;;  %v2346_v55 = vmul.f32 %v2345_v20, %v2312_v22  ;;  %v2358_v52 = vstv %s6058_s25  ;;  %v2361_v43 = vstv %s6059_s26  ;;  %s6118_s25 = sld [smem:[#allocation2 + $0x41]]  ;;  %s6121_s26 = sld [smem:[#allocation2 + $0x44]] }
 0xd63   :  { %v2325_v7 = vadd.f32 %v2321_v53, %v2318_v36  ;;  %v2336_v63 = vadd.f32 %v2332_v23, %v2329_v56  ;;  %v2347_v29 = vadd.f32 %v2343_v33, %v2340_v41 }
 0xd65   :  { %v2326_v46 = vadd.f32 %v2325_v7, %v2324_v58  ;;  %v2337_v24 = vadd.f32 %v2336_v63, %v2335_v39  ;;  %v2348_v18 = vadd.f32 %v2347_v29, %v2346_v55  ;;  %v2715_v7 = vstv %s6077_s27  ;;  %s6125_s27 = sld [smem:[#allocation4 + $0xe]] }
 0xd66   :  { %v2701_v63 = vstv %s6073_s28  ;;  %v2712_v29 = vstv %s6076_s30  ;;  %v2723_v55 = vstv %s6079_s2  ;;  %s6126_s28 = sld [smem:[#allocation4 + $0xf]]  ;;  %s6144_s30 = sld [smem:[#allocation2 + $0x4c]] }
 0xd67   :  { %v2350_v25 = vrot.slane %v2337_v24, 1  ;;  %v2354_v6 = vrot.slane %v2348_v18, 2  ;;  %v2707_v24 = vstv %s6075_s4  ;;  %v2718_v18 = vstv %s6078_s5  ;;  %s6140_s2 = sld [smem:[#allocation2 + $0x48]]  ;;  %s6147_s4 = sld [smem:[#allocation2 + $0x4f]] }
 0xd68   :  { %s6143_s5 = sld [smem:[#allocation2 + $0x4b]] }
 0xd69   :  { %v2352_v54 = vadd.f32 %v2350_v25, %v2326_v46  ;;  %v2726_v46 = vstv %s6080_s29  ;;  %s6141_s29 = sld [smem:[#allocation2 + $0x49]] }
 0xd6b   :  { %v2356_v44 = vadd.f32 %v2354_v6, %v2352_v54  ;;  %v6062_v6 = vadd.s32 4294967293, %v7510_v3 }
 0xd6d   :  { %v2359_v9 = vmul.f32 %v2358_v52, %v2356_v44  ;;  %v2457_v53 = vmul.u32 2, %v6062_v6  ;;  %vm2454_vm12 = vcmp.ge.s32.totalorder %v6062_v6, 1  ;;  %vm2455_vm7 = vcmp.le.s32.totalorder %v6062_v6, 1 }
 0xd6e   :  { %vm2456_vm0 = vmand %vm2454_vm12, %vm2455_vm7  ;;  %vm9708_vm12 = vcmask 1045504  }
 0xd6f   :  { %v2362_v34 = vadd.f32 %v2361_v43, %v2359_v9  ;;  %v2458_v23 = vadd.s32 4, %v2457_v53  ;;  %v2729_v43 = vstv %s6081_s6  ;;  %s6146_s6 = sld [smem:[#allocation2 + $0x4e]] }
 0xd71   :  { %v2363_v57 = vmax.f32 %v2362_v34, 0.0  ;;  %v6063_v22 = vadd.s32 4294967295, %v2458_v23 }
 0xd73   :  { %v2365_v60 = vrot.slane %v2363_v57, 1  ;;  %vm2460_vm9 = vcmp.eq.s32.totalorder %v7508_v2, %v6063_v22 }
 0xd75   :  { %v2367_v21 = vmax.f32 %v2363_v57, %v2365_v60 }
 0xd77   :  { %6855 = vmatpush3.msk.msra.mxu0 %vm9539_vm5, %v2367_v21 }
 0xd78   :  { %6857 = vmatmul.mubr.msk.f32.vlgmr.msra.gmra.mrb[34].mxu0 %vm9538_vm1, %v7893_v38  ;;  %6864 = vmatprep.subr.mxu0 %v9586_v35  ;;  %vm2461_vm1 = vmand %vm2456_vm0, %vm2460_vm9 }
 0xd79   :  { %6866 = vmatprep.mubr.msk.f32.mxu0 %vm9687_vm10, %v9586_v35  ;;  %vm2462_vm5 = vmor %vm2452_vm6, %vm2461_vm1 }
 0xd7a   :  { %v6064_v38 = vsel %vm2462_vm5, 1.0, %v9586_v35  ;;  %vm8579_vm1 = vmor %vm8561_vm2, %vm2456_vm0  ;;  %vm9712_vm2 = vcmask 7168  }
 0xd7b   :  { %6860 = vmatpush3.msk.msra.mxu1 %vm9704_vm8, %v6064_v38  ;;  %vm2544_vm8 = vmand %vm9650_vm11, %vm8579_vm1  ;;  %vm9541_vm11 = vcmask 48128  }
 0xd7c   :  { %6869 = vmatprep.subr.mxu1 %v9586_v35  ;;  %v6067_v42 = vsel %vm2544_vm8, 1.0, %v9586_v35  ;;  %vm2624_vm5 = vmand %vm9655_vm13, %vm8579_vm1  ;;  %vm9542_vm8 = vcmp.ge.s32.totalorder %v7508_v2, 1 }
 0xd7d   :  { %6865 = vmatpush3.msk.msra.mxu0 %vm9708_vm12, %v6067_v42  ;;  %v8594_v0 = vsel %vm2624_vm5, 1.0, %v9586_v35  ;;  %vm9709_vm0 = vmmov %vm9708_vm12  ;;  %vm3027_vm5 = vcmp.le.s32.totalorder %v7508_v2, 1 }
 0xd7e   :  { %6874 = vmatprep.subr.mxu0 %v9586_v35  ;;  %vm9710_vm7 = vmmov %vm9709_vm0 }
 0xd7f   :  { %vm9713_vm9 = vmmov %vm9709_vm0 }
 0xe4b   :  { %v2441_v36 = vpop.f32.mrb[34].mxu0 }
 0xe4c   :  { %2446 = vrot.lane.b32.xlu1 %v2441_v36, %s7478_s13  ;;  %v6858_v56 = vpop.f32.mrb[35].mxu0  ;;  %s6074_s13 = sld [smem:[#allocation2 + $0x2e]] }
 0xe52   :  { %v2704_v39 = vstv %s6074_s13  ;;  %s6124_s13 = sld [smem:[#allocation2 + $0x47]] }
 0xebe   :  { %v2447_v41 = vpop.permute.xlu1 %2446 }
 0xebf   :  { %v2449_v33 = vmax.f32 %v2441_v36, %v2447_v41 }
 0xec1   :  { %6862 = vmatmul.mubr.msk.f32.vlgmr.msra.gmra.mrb[34].mxu1 %vm9705_vm3, %v2449_v33  ;;  %vm9714_vm3 = vmmov %vm9711_vm4 }
 0xec2   :  { %6871 = vmatprep.mubr.msk.f32.mxu1 %vm9687_vm10, %v9586_v35  ;;  %6870 = vmatpush3.msk.msra.mxu1 %vm9709_vm0, %v8594_v0  ;;  %vm3028_vm0 = vmand %vm9542_vm8, %vm3027_vm5  ;;  %vm9719_vm5 = vcmask 1045504  }
 0xec3   :  { %6879 = vmatprep.subr.mxu1 %v9586_v35 }
 0xf94   :  { %v2537_v8 = vpop.f32.mrb[34].mxu1 }
 0xf95   :  { %v6863_v58 = vpop.f32.mrb[35].mxu1  ;;  %6867 = vmatmul.mubr.msk.f32.vlgmr.msra.gmra.mrb[36].mxu0 %vm9541_vm11, %v2537_v8  ;;  %6872 = vmatmul.mubr.msk.f32.vlgmr.msra.gmra.mrb[36].mxu1 %vm9541_vm11, %v2537_v8  ;;  %v2705_v54 = vmul.f32 %v2704_v39, %v2537_v8  ;;  %v2716_v52 = vmul.f32 %v2715_v7, %v2537_v8  ;;  %v2727_v60 = vmul.f32 %v2726_v46, %v2537_v8  ;;  %v2742_v7 = vstv %s6082_s7  ;;  %s6142_s7 = sld [smem:[#allocation2 + $0x4a]] }
 0xf96   :  { %6876 = vmatprep.mubr.msk.f32.mxu0 %vm9687_vm10, %v9586_v35  ;;  %6880 = vmatpush3.msk.msra.mxu1 %vm9710_vm7, %v6067_v42  ;;  %v6085_v46 = vsel %vm8579_vm1, 1.0, %v9586_v35  ;;  %vm9715_vm1 = vmmov %vm9712_vm2 }
 0xf97   :  { %6881 = vmatprep.mubr.msk.f32.mxu1 %vm9687_vm10, %v9586_v35  ;;  %6889 = vmatprep.subr.mxu1 %v9586_v35 }
0x1068   :  { %v2620_v25 = vpop.f32.mrb[36].mxu0  ;;  %v2696_v44 = vpop.f32.mrb[36].mxu1 }
0x1069   :  { %v2702_v9 = vmul.f32 %v2701_v63, %v2620_v25  ;;  %v2713_v34 = vmul.f32 %v2712_v29, %v2620_v25  ;;  %v2724_v57 = vmul.f32 %v2723_v55, %v2620_v25  ;;  %v6868_v21 = vpop.f32.mrb[37].mxu0  ;;  %v6873_v6 = vpop.f32.mrb[37].mxu1  ;;  %v2708_v53 = vmul.f32 %v2707_v24, %v2696_v44 }
0x106a   :  { %v2719_v23 = vmul.f32 %v2718_v18, %v2696_v44  ;;  %v2730_v36 = vmul.f32 %v2729_v43, %v2696_v44  ;;  %v2745_v29 = vstv %s6083_s8  ;;  %v8614_v25 = vsel %vm9655_vm13, 1.0, %v9586_v35  ;;  %s6145_s8 = sld [smem:[#allocation2 + $0x4d]] }
0x106b   :  { %v2709_v22 = vadd.f32 %v2705_v54, %v2702_v9  ;;  %v2720_v20 = vadd.f32 %v2716_v52, %v2713_v34  ;;  %v2731_v38 = vadd.f32 %v2727_v60, %v2724_v57  ;;  %v2986_v54 = vstv %s6096_s10  ;;  %s6149_s10 = sld [smem:[#allocation4 + $0x10]] }
0x106c   :  { %v2972_v52 = vstv %s6092_s11  ;;  %v2983_v44 = vstv %s6095_s14  ;;  %v2994_v43 = vstv %s6098_s15  ;;  %v2997_v9 = vstv %s6099_s12  ;;  %s6150_s11 = sld [smem:[#allocation4 + $0x11]]  ;;  %s6180_s12 = sld [smem:[#allocation2 + $0x55]] }
0x106d   :  { %v2710_v56 = vadd.f32 %v2709_v22, %v2708_v53  ;;  %v2721_v41 = vadd.f32 %v2720_v20, %v2719_v23  ;;  %v2732_v33 = vadd.f32 %v2731_v38, %v2730_v36  ;;  %v2978_v34 = vstv %s6094_s16  ;;  %s6183_s14 = sld [smem:[#allocation2 + $0x58]]  ;;  %s6179_s15 = sld [smem:[#allocation2 + $0x54]] }
0x106e   :  { %v2989_v57 = vstv %s6097_s17  ;;  %v3000_v23 = vstv %s6100_s18  ;;  %s6177_s16 = sld [smem:[#allocation2 + $0x52]]  ;;  %s6182_s17 = sld [smem:[#allocation2 + $0x57]] }
0x106f   :  { %v2734_v42 = vrot.slane %v2721_v41, 1  ;;  %v2738_v39 = vrot.slane %v2732_v33, 2  ;;  %s8803_s18 = sld [smem:[#allocation2 + $0x56]] }
0x1071   :  { %v2736_v58 = vadd.f32 %v2734_v42, %v2710_v56 }
0x1073   :  { %v2740_v63 = vadd.f32 %v2738_v39, %v2736_v58 }
0x1074   :  { %v4117_v31 = vstv %s6177_s16  ;;  %s6346_s16 = sld [smem:[#allocation2 + $0x6d]] }
0x1075   :  { %v2743_v8 = vmul.f32 %v2742_v7, %v2740_v63 }
0x1077   :  { %v2746_v55 = vadd.f32 %v2745_v29, %v2743_v8 }
0x1079   :  { %v2747_v24 = vmax.f32 %v2746_v55, 0.0 }
0x107b   :  { %v2751_v18 = vmul.f32 %v6085_v46, %v2747_v24  ;;  %v8632_v24 = vadd.s32 1, %v7916_v51 }
0x107d   :  { %6875 = vmatpush3.msk.msra.mxu0 %vm9711_vm4, %v2751_v18  ;;  %v8635_v18 = vadd.s32 2, %v7916_v51  ;;  %vm3020_vm13 = vcmp.eq.s32.totalorder %v7508_v2, %v8632_v24  ;;  %v9716_v51 = vmov 1.0  }
0x107e   :  { %6877 = vmatmul.mubr.msk.f32.vlgmr.msra.gmra.mrb[38].mxu0 %vm9712_vm2, %v8614_v25  ;;  %6884 = vmatprep.subr.mxu0 %v9586_v35 }
0x107f   :  { %6885 = vmatpush3.msk.msra.mxu0 %vm9713_vm9, %v8594_v0  ;;  %6886 = vmatprep.mubr.msk.f32.mxu0 %vm9687_vm10, %v9586_v35  ;;  %v2975_v0 = vstv %s6093_s9  ;;  %vm3022_vm15 = vcmp.eq.s32.totalorder %v7508_v2, %v8635_v18  ;;  %s6148_s9 = sld [smem:[#allocation2 + $0x50]] }
0x1080   :  { %6894 = vmatprep.subr.mxu0 %v9586_v35  ;;  %vm3023_vm6 = vmor %vm3020_vm13, %vm3022_vm15 }
0x1151   :  { %v2824_v37 = vpop.f32.mrb[38].mxu0 }
0x1152   :  { %6882 = vmatmul.mubr.msk.f32.vlgmr.msra.gmra.mrb[38].mxu1 %vm9541_vm11, %v2824_v37  ;;  %6887 = vmatmul.mubr.msk.f32.vlgmr.msra.gmra.mrb[40].mxu0 %vm9541_vm11, %v2824_v37  ;;  %v6878_v14 = vpop.f32.mrb[39].mxu0  ;;  %v2976_v21 = vmul.f32 %v2975_v0, %v2824_v37  ;;  %v2987_v6 = vmul.f32 %v2986_v54, %v2824_v37  ;;  %v2998_v36 = vmul.f32 %v2997_v9, %v2824_v37  ;;  %v3013_v0 = vstv %s6101_s19  ;;  %s8805_s19 = sld [smem:[#allocation2 + $0x59]] }
0x1153   :  { %6891 = vmatprep.mubr.msk.f32.mxu1 %vm9687_vm10, %v9586_v35  ;;  %6896 = vmatprep.mubr.msk.f32.mxu0 %vm9687_vm10, %v9586_v35 }
0x1225   :  { %v2897_v60 = vpop.f32.mrb[38].mxu1  ;;  %v2967_v53 = vpop.f32.mrb[40].mxu0 }
0x1226   :  { %v2973_v22 = vmul.f32 %v2972_v52, %v2897_v60  ;;  %v2984_v20 = vmul.f32 %v2983_v44, %v2897_v60  ;;  %v2995_v38 = vmul.f32 %v2994_v43, %v2897_v60  ;;  %v6883_v56 = vpop.f32.mrb[39].mxu1  ;;  %v6888_v41 = vpop.f32.mrb[41].mxu0  ;;  %v2979_v33 = vmul.f32 %v2978_v34, %v2967_v53 }
0x1227   :  { %v2990_v42 = vmul.f32 %v2989_v57, %v2967_v53  ;;  %v3001_v63 = vmul.f32 %v3000_v23, %v2967_v53  ;;  %v3016_v52 = vstv %s6102_s20  ;;  %v8642_v34 = vsel %vm3023_vm6, 1.0, %v9586_v35  ;;  %s6176_s20 = sld [smem:[#allocation2 + $0x51]] }
0x1228   :  { %v2980_v58 = vadd.f32 %v2976_v21, %v2973_v22  ;;  %v2991_v39 = vadd.f32 %v2987_v6, %v2984_v20  ;;  %v3002_v7 = vadd.f32 %v2998_v36, %v2995_v38  ;;  %v6105_v57 = vadd.s32 4294967293, %v7508_v2 }
0x1229   :  { %v6104_v21 = vadd.s32 4294967295, %v7871_v4  ;;  %v3357_v20 = vstv %s6120_s1  ;;  %v3343_v38 = vstv %s6116_s21  ;;  %v3354_v36 = vstv %s6119_s23  ;;  %s6185_s1 = sld [smem:[#allocation4 + $0x12]]  ;;  %s6186_s21 = sld [smem:[#allocation4 + $0x13]] }
0x122a   :  { %v2981_v29 = vadd.f32 %v2980_v58, %v2979_v33  ;;  %v2992_v8 = vadd.f32 %v2991_v39, %v2990_v42  ;;  %v3003_v55 = vadd.f32 %v3002_v7, %v3001_v63  ;;  %v3038_v60 = vmul.u32 2, %v6105_v57  ;;  %s6227_s23 = sld [smem:[#allocation2 + $0x5e]] }
0x122b   :  { %vm3030_vm12 = vcmp.eq.s32.totalorder %v7510_v3, %v6104_v21  ;;  %vm3035_vm7 = vcmp.ge.s32.totalorder %v6105_v57, 1  ;;  %vm3036_vm4 = vcmp.le.s32.totalorder %v6105_v57, 1  ;;  %v3365_v56 = vstv %s6122_s24  ;;  %s8925_s24 = sld [smem:[#allocation2 + $0x5a]] }
0x122c   :  { %v3005_v46 = vrot.slane %v2992_v8, 1  ;;  %v3009_v14 = vrot.slane %v3003_v55, 2  ;;  %v6106_v6 = vadd.s32 4294967295, %v3038_v60  ;;  %vm3041_vm13 = vcmp.eq.s32.totalorder %v8483_v32, %v3038_v60  ;;  %vm3037_vm6 = vmand %vm3035_vm7, %vm3036_vm4 }
0x122d   :  { %v3368_v41 = vstv %s6123_s22  ;;  %v3349_v33 = vstv %s6118_s25  ;;  %v3360_v42 = vstv %s6121_s26  ;;  %vm3409_vm7 = vcmask 1041408   ;;  %s8923_s22 = sld [smem:[#allocation2 + $0x5b]]  ;;  %s6230_s25 = sld [smem:[#allocation2 + $0x61]] }
0x122e   :  { %v3007_v37 = vadd.f32 %v3005_v46, %v2981_v29  ;;  %vm3040_vm9 = vcmp.eq.s32.totalorder %v8483_v32, %v6106_v6  ;;  %v3371_v29 = vstv %s6124_s13  ;;  %vm3406_vm4 = vcmask 15360   ;;  %s6226_s26 = sld [smem:[#allocation2 + $0x5d]]  ;;  %s6229_s13 = sld [smem:[#allocation2 + $0x60]] }
0x1230   :  { %v3011_v54 = vadd.f32 %v3009_v14, %v3007_v37 }
0x1232   :  { %v3014_v44 = vmul.f32 %v3013_v0, %v3011_v54 }
0x1234   :  { %v3017_v43 = vadd.f32 %v3016_v52, %v3014_v44 }
0x1236   :  { %v3018_v9 = vmax.f32 %v3017_v43, 0.0 }
0x1238   :  { %6890 = vmatpush3.msk.msra.mxu1 %vm9714_vm3, %v3018_v9  ;;  %vm3042_vm3 = vmor %vm3040_vm9, %vm3041_vm13  ;;  %vm9724_vm9 = vnez %v9683_v59  ;;  %vm3390_vm13 = vcmp.le.s32.totalorder %v7508_v2, 2 }
0x1239   :  { %6892 = vmatmul.mubr.msk.f32.vlgmr.msra.gmra.mrb[40].mxu1 %vm9715_vm1, %v8642_v34  ;;  %6899 = vmatprep.subr.mxu1 %v9586_v35  ;;  %vm3043_vm1 = vmand %vm3037_vm6, %vm3042_vm3 }
0x123a   :  { %6900 = vmatpush3.msk.msra.mxu1 %vm8527_vm14, %v9716_v51  ;;  %6901 = vmatprep.mubr.msk.f32.mxu1 %vm9687_vm10, %v9586_v35  ;;  %vm3031_vm14 = vcmp.eq.s32.totalorder %v7510_v3, %v7871_v4  ;;  %vm3391_vm3 = vmand %vm9542_vm8, %vm3390_vm13  ;;  %vm9727_vm13 = vcmask 97280  }
0x123b   :  { %6909 = vmatprep.subr.mxu1 %v9586_v35  ;;  %vm8663_vm2 = vmor %vm3030_vm12, %vm3031_vm14  ;;  %vm9720_vm12 = vcmask 48128   ;;  %vm9721_vm14 = vnez %v9699_v17  ;;  %v3346_v17 = vstv %s6117_s0  ;;  %s6178_s0 = sld [smem:[#allocation2 + $0x53]] }
0x123c   :  { %vm3033_vm15 = vmand %vm3028_vm0, %vm8663_vm2  ;;  %vm9722_vm0 = vcmask 64512  }
0x123d   :  { %vm3044_vm11 = vmor %vm3033_vm15, %vm3043_vm1 }
0x123e   :  { %v6107_v4 = vsel %vm3044_vm11, 1.0, %v9586_v35  ;;  %vm9723_vm11 = vmmov %vm9722_vm0 }
0x123f   :  { %6895 = vmatpush3.msk.msra.mxu0 %vm9719_vm5, %v6107_v4 }
0x1240   :  { %6904 = vmatprep.subr.mxu0 %v9586_v35 }
0x130c   :  { %v3119_v53 = vpop.f32.mrb[40].mxu1 }
0x130d   :  { %6897 = vmatmul.mubr.msk.f32.vlgmr.msra.gmra.mrb[42].mxu0 %vm9720_vm12, %v3119_v53  ;;  %v6893_v23 = vpop.f32.mrb[41].mxu1  ;;  %vm3392_vm12 = vmand %vm3391_vm3, %vm8663_vm2  ;;  %vm3753_vm3 = vcmp.le.s32.totalorder %v7508_v2, 4 }
0x130e   :  { %6905 = vmatpush3.msk.msra.mxu0 %vm9721_vm14, %v9716_v51  ;;  %6906 = vmatprep.mubr.msk.f32.mxu0 %vm9687_vm10, %v9586_v35 }
0x130f   :  { %6914 = vmatprep.subr.mxu0 %v9586_v35 }
0x13e0   :  { %v3195_v32 = vpop.f32.mrb[42].mxu0 }
0x13e1   :  { %6902 = vmatmul.mubr.msk.f32.vlgmr.msra.gmra.mrb[42].mxu1 %vm9722_vm0, %v3195_v32  ;;  %6907 = vmatmul.mubr.msk.f32.vlgmr.msra.gmra.mrb[44].mxu0 %vm9723_vm11, %v3195_v32  ;;  %v6898_v22 = vpop.f32.mrb[43].mxu0  ;;  %v3347_v39 = vmul.f32 %v3346_v17, %v3195_v32  ;;  %v3358_v7 = vmul.f32 %v3357_v20, %v3195_v32  ;;  %v3369_v37 = vmul.f32 %v3368_v41, %v3195_v32  ;;  %v3387_v20 = vstv %s6126_s28  ;;  %s6228_s28 = sld [smem:[#allocation2 + $0x5f]] }
0x13e2   :  { %6911 = vmatprep.mubr.msk.f32.mxu1 %vm9687_vm10, %v9586_v35  ;;  %6916 = vmatprep.mubr.msk.f32.mxu0 %vm9687_vm10, %v9586_v35  ;;  %v3384_v22 = vstv %s6125_s27  ;;  %s8927_s27 = sld [smem:[#allocation2 + $0x5c]] }
0x14b4   :  { %v3268_v58 = vpop.f32.mrb[42].mxu1  ;;  %v3338_v63 = vpop.f32.mrb[44].mxu0 }
0x14b5   :  { %v3344_v8 = vmul.f32 %v3343_v38, %v3268_v58  ;;  %v3355_v55 = vmul.f32 %v3354_v36, %v3268_v58  ;;  %v3366_v46 = vmul.f32 %v3365_v56, %v3268_v58  ;;  %v6903_v14 = vpop.f32.mrb[43].mxu1  ;;  %v6908_v0 = vpop.f32.mrb[45].mxu0  ;;  %v3350_v54 = vmul.f32 %v3349_v33, %v3338_v63 }
0x14b6   :  { %v3361_v52 = vmul.f32 %v3360_v42, %v3338_v63  ;;  %v3372_v57 = vmul.f32 %v3371_v29, %v3338_v63  ;;  %v6127_v56 = vadd.s32 4294967292, %v7508_v2  ;;  %v6153_v58 = vadd.s32 4294967290, %v7508_v2 }
0x14b7   :  { %v3351_v44 = vadd.f32 %v3347_v39, %v3344_v8  ;;  %v3362_v43 = vadd.f32 %v3358_v7, %v3355_v55  ;;  %v3373_v9 = vadd.f32 %v3369_v37, %v3366_v46  ;;  %v3714_v46 = vstv %s6144_s30  ;;  %s8939_s30 = sld [smem:[#allocation4 + $0x14]] }
0x14b8   :  { %v3397_v41 = vmul.u32 2, %v6127_v56  ;;  %vm3394_vm15 = vcmp.ge.s32.totalorder %v6127_v56, 1  ;;  %vm3395_vm6 = vcmp.le.s32.totalorder %v6127_v56, 2  ;;  %v3711_v37 = vstv %s6143_s5  ;;  %s6300_s5 = sld [smem:[#allocation2 + $0x67]] }
0x14b9   :  { %v3352_v60 = vadd.f32 %v3351_v44, %v3350_v54  ;;  %v3363_v21 = vadd.f32 %v3362_v43, %v3361_v52  ;;  %v3374_v6 = vadd.f32 %v3373_v9, %v3372_v57  ;;  %vm3396_vm14 = vmand %vm3394_vm15, %vm3395_vm6  ;;  %vm9543_vm6 = vcmask 31744  }
0x14ba   :  { %v6128_v33 = vadd.s32 4294967295, %v3397_v41  ;;  %vm3400_vm5 = vcmp.eq.s32.totalorder %v8373_v1, %v3397_v41  ;;  %vm9728_vm15 = vmmov %vm9727_vm13  ;;  %v3722_v14 = vstv %s6146_s6  ;;  %v3725_v0 = vstv %s6147_s4  ;;  %s6297_s4 = sld [smem:[#allocation2 + $0x64]]  ;;  %s6296_s6 = sld [smem:[#allocation2 + $0x63]] }
0x14bb   :  { %v3376_v4 = vrot.slane %v3363_v21, 1  ;;  %v3380_v23 = vrot.slane %v3374_v6, 2  ;;  %v3706_v54 = vstv %s6142_s7  ;;  %v3717_v52 = vstv %s6145_s8  ;;  %s6303_s7 = sld [smem:[#allocation2 + $0x6a]]  ;;  %s6299_s8 = sld [smem:[#allocation2 + $0x66]] }
0x14bc   :  { %vm3399_vm1 = vcmp.eq.s32.totalorder %v8373_v1, %v6128_v33 }
0x14bd   :  { %v3378_v53 = vadd.f32 %v3376_v4, %v3352_v60  ;;  %vm3401_vm0 = vmor %vm3399_vm1, %vm3400_vm5  ;;  %v3728_v60 = vstv %s6148_s9  ;;  %s6302_s9 = sld [smem:[#allocation2 + $0x69]] }
0x14be   :  { %vm3402_vm11 = vmand %vm3396_vm14, %vm3401_vm0  ;;  %vm3765_vm0 = vcmp.ge.s32.totalorder %v6153_v58, 1 }
0x14bf   :  { %v3382_v17 = vadd.f32 %v3380_v23, %v3378_v53  ;;  %vm8719_vm1 = vmand %vm9542_vm8, %vm3753_vm3 }
0x14c0   :  { %vm3761_vm14 = vmand %vm8719_vm1, %vm8663_vm2  ;;  %vm9732_vm1 = vnez %v9658_v11  ;;  %v6152_v11 = vadd.s32 4294967295, %v7876_v61 }
0x14c1   :  { %v3385_v32 = vmul.f32 %v3384_v22, %v3382_v17 }
0x14c3   :  { %v3388_v38 = vadd.f32 %v3387_v20, %v3385_v32 }
0x14c5   :  { %v3389_v36 = vmax.f32 %v3388_v38, 0.0 }
0x14c7   :  { %6910 = vmatpush3.msk.msra.mxu1 %vm3409_vm7, %v3389_v36  ;;  %vm3403_vm7 = vmor %vm3392_vm12, %vm3402_vm11 }
0x14c8   :  { %6912 = vmatmul.mubr.msk.f32.vlgmr.msra.gmra.mrb[44].mxu1 %vm3406_vm4, %v8642_v34  ;;  %7318 = vmatprep.subr.bf16.mxu1 %v9582_v28  ;;  %vm9725_vm4 = vcmask 64512  }
0x14c9   :  { %7321 = vmatpush3.bf16.msk.msra.mxu1 %vm9724_vm9, %v8434_v45  ;;  %6923 = vmatprep.mubr.msk.f32.mxu1 %vm9687_vm10, %v9586_v35  ;;  %vm9726_vm9 = vnez %v9686_v47  ;;  %v6154_v47 = vadd.s32 4294967290, %v7517_v5 }
0x14ca   :  { %6915 = vmatpush3.msk.msra.mxu0 %vm3403_vm7, %v9716_v51 }
0x14cb   :  { %7322 = vmatprep.subr.bf16.mxu0 %v9582_v28  ;;  %v3772_v39 = vmul.u32 2, %v6154_v47 }
0x14cd   :  { %v6156_v29 = vadd.s32 4294967295, %v3772_v39  ;;  %vm3778_vm12 = vcmp.eq.s32.totalorder %v8204_v27, %v3772_v39  ;;  %v3744_v39 = vstv %s6150_s11  ;;  %s6301_s11 = sld [smem:[#allocation2 + $0x68]] }
0x14cf   :  { %vm3776_vm7 = vcmp.eq.s32.totalorder %v8204_v27, %v6156_v29 }
0x159b   :  { %v3479_v45 = vpop.f32.mrb[44].mxu1 }
0x159c   :  { %6917 = vmatmul.mubr.msk.f32.vlgmr.msra.gmra.mrb[46].mxu0 %vm9725_vm4, %v3479_v45  ;;  %v6913_v59 = vpop.f32.mrb[45].mxu1  ;;  %vm3768_vm4 = vcmp.le.s32.totalorder %v6154_v47, 4  ;;  %v3741_v47 = vstv %s6149_s10  ;;  %s6298_s10 = sld [smem:[#allocation2 + $0x65]] }
0x159d   :  { %7325 = vmatpush3.bf16.msk.msra.mxu0 %vm9726_vm9, %v8458_v30  ;;  %6930 = vmatprep.mubr.msk.f32.mxu0 %vm9687_vm10, %v9586_v35  ;;  %v3771_v30 = vmul.u32 2, %v6153_v58 }
0x159f   :  { %v6155_v63 = vadd.s32 4294967295, %v3771_v30  ;;  %vm3777_vm5 = vcmp.eq.s32.totalorder %v8204_v27, %v3771_v30 }
0x15a1   :  { %vm3775_vm11 = vcmp.eq.s32.totalorder %v8204_v27, %v6155_v63  ;;  %v3703_v27 = vstv %s6141_s29  ;;  %s6231_s29 = sld [smem:[#allocation2 + $0x62]] }
0x15a2   :  { %vm3779_vm9 = vmor %vm3775_vm11, %vm3777_vm5  ;;  %vm9733_vm5 = vcmask 1043456  }
0x15a3   :  { %vm9737_vm11 = vmmov %vm9733_vm5 }
0x166f   :  { %v3552_v1 = vpop.f32.mrb[46].mxu0 }
0x1670   :  { %6924 = vmatmul.mubr.msk.f32.vlgmr.msra.gmra.mrb[46].mxu1 %vm9727_vm13, %v3552_v1  ;;  %6931 = vmatmul.mubr.msk.f32.vlgmr.msra.gmra.mrb[48].mxu0 %vm9728_vm15, %v3552_v1  ;;  %v6918_v42 = vpop.f32.mrb[47].mxu0  ;;  %vm3780_vm13 = vmor %vm3776_vm7, %vm3778_vm12  ;;  %v3704_v43 = vmul.f32 %v3703_v27, %v3552_v1  ;;  %v3715_v9 = vmul.f32 %v3714_v46, %v3552_v1  ;;  %v3726_v53 = vmul.f32 %v3725_v0, %v3552_v1  ;;  %v4133_v0 = vstv %s8803_s18  ;;  %s6345_s18 = sld [smem:[#allocation2 + $0x6c]] }
0x1671   :  { %6935 = vmatprep.mubr.msk.f32.mxu1 %vm9543_vm6, %v8642_v34  ;;  %vm3781_vm15 = vmand %vm3765_vm0, %vm3779_vm9  ;;  %vm9731_vm6 = vcmask 1043456   ;;  %vm9736_vm0 = vnez %v9654_v48 }
0x1672   :  { %vm3782_vm3 = vmand %vm3768_vm4, %vm3780_vm13  ;;  %vm9739_vm4 = vcmask 97280  }
0x1673   :  { %vm3783_vm8 = vmor %vm3761_vm14, %vm3781_vm15  ;;  %v6158_v8 = vsel %vm3782_vm3, 1.0, %v9586_v35  ;;  %vm9735_vm14 = vcmask 31744   ;;  %vm9743_vm3 = vcmask 162816  }
0x1674   :  { %v7326_v55 = vpack.c.bf16 %v6158_v8, %v9716_v51  ;;  %vm7327_vm10 = vmpackc.low %vm9731_vm6, %vm3783_vm8  ;;  %v3700_v51 = vstv %s6140_s2  ;;  %vm3748_vm8 = vcmp.eq.s32.totalorder %v7517_v5, %v8635_v18  ;;  %s6233_s2 = sld [smem:[#allocation4 + $0x15]] }
0x1675   :  { %vm9734_vm12 = vmmov %vm9733_vm5 }
0x1676   :  { %7328 = vmatprep.subr.msk.bf16.mxu0 %vm7327_vm10, %v7326_v55  ;;  %vm9738_vm7 = vmmov %vm9733_vm5 }
0x1677   :  { %7331 = vmatpush3.bf16.msk.msra.mxu0 %vm7327_vm10, %v7326_v55  ;;  %vm3747_vm10 = vcmp.eq.s32.totalorder %v7517_v5, %v8632_v24  ;;  %vm9740_vm9 = vmmov %vm9739_vm4 }
0x1678   :  { %7337 = vmatprep.subr.msk.bf16.mxu0 %vm9732_vm1, %v9594_v49  ;;  %vm3749_vm6 = vmor %vm3747_vm10, %vm3748_vm8 }
0x1679   :  { %v8742_v29 = vsel %vm3749_vm6, 1.0, %v9586_v35  ;;  %vm9741_vm13 = vmmov %vm9733_vm5 }
0x167a   :  { %vm9742_vm15 = vmmov %vm9733_vm5 }
0x167b   :  { %vm9744_vm10 = vmmov %vm9743_vm3 }
0x167c   :  { %vm9745_vm8 = vmmov %vm9743_vm3 }
0x167d   :  { %vm9746_vm6 = vmmov %vm9743_vm3 }
0x1743   :  { %v3625_v44 = vpop.f32.mrb[46].mxu1  ;;  %v3695_v57 = vpop.f32.mrb[48].mxu0 }
0x1744   :  { %v3701_v21 = vmul.f32 %v3700_v51, %v3625_v44  ;;  %v3712_v6 = vmul.f32 %v3711_v37, %v3625_v44  ;;  %v3723_v4 = vmul.f32 %v3722_v14, %v3625_v44  ;;  %v6925_v23 = vpop.f32.mrb[47].mxu1  ;;  %v6932_v22 = vpop.f32.mrb[49].mxu0  ;;  %v3707_v17 = vmul.f32 %v3706_v54, %v3695_v57 }
0x1745   :  { %v3718_v20 = vmul.f32 %v3717_v52, %v3695_v57  ;;  %v3729_v56 = vmul.f32 %v3728_v60, %v3695_v57  ;;  %v4125_v37 = vstv %s6179_s15  ;;  %v4141_v14 = vstv %s6182_s17  ;;  %s9114_s15 = sld [smem:[#allocation4 + $0x17]]  ;;  %s6349_s17 = sld [smem:[#allocation2 + $0x70]] }
0x1746   :  { %v3708_v32 = vadd.f32 %v3704_v43, %v3701_v21  ;;  %v3719_v38 = vadd.f32 %v3715_v9, %v3712_v6  ;;  %v3730_v36 = vadd.f32 %v3726_v53, %v3723_v4  ;;  %v4149_v52 = vstv %s8805_s19  ;;  %s6352_s19 = sld [smem:[#allocation2 + $0x73]] }
0x1747   :  { %v4114_v44 = vstv %s6176_s20  ;;  %v4120_v6 = vstv %s6178_s0  ;;  %s6348_s20 = sld [smem:[#allocation2 + $0x6f]]  ;;  %s6351_s0 = sld [smem:[#allocation2 + $0x72]] }
0x1748   :  { %v3709_v41 = vadd.f32 %v3708_v32, %v3707_v17  ;;  %v3720_v33 = vadd.f32 %v3719_v38, %v3718_v20  ;;  %v3731_v45 = vadd.f32 %v3730_v36, %v3729_v56 }
0x174a   :  { %v3733_v59 = vrot.slane %v3720_v33, 1  ;;  %v3737_v58 = vrot.slane %v3731_v45, 2 }
0x174c   :  { %v3735_v42 = vadd.f32 %v3733_v59, %v3709_v41 }
0x174e   :  { %v3739_v30 = vadd.f32 %v3737_v58, %v3735_v42 }
0x1750   :  { %v3742_v1 = vmul.f32 %v3741_v47, %v3739_v30 }
0x1752   :  { %v3745_v7 = vadd.f32 %v3744_v39, %v3742_v1 }
0x1754   :  { %v3746_v63 = vmax.f32 %v3745_v7, 0.0 }
0x1756   :  { %6933 = vmatprep.subr.msk.mxu1 %vm9733_vm5, %v3746_v63  ;;  %vm3759_vm5 = vcmp.eq.s32.totalorder %v7510_v3, %v7876_v61 }
0x1757   :  { %6934 = vmatpush3.msk.msra.mxu1 %vm9734_vm12, %v3746_v63  ;;  %vm3758_vm12 = vcmp.eq.s32.totalorder %v7510_v3, %v6152_v11 }
0x1758   :  { %6936 = vmatmul.mubr.msk.f32.vlgmr.msra.gmra.mrb[48].mxu1 %vm9735_vm14, %v8742_v29  ;;  %7333 = vmatprep.subr.msk.bf16.mxu1 %vm9736_vm0, %v9594_v49  ;;  %vm8782_vm14 = vmor %vm3758_vm12, %vm3759_vm5  ;;  %vm9754_vm5 = vcmask 1045504   ;;  %vm4177_vm12 = vcmp.eq.s32.totalorder %v7560_v12, %v8632_v24 }
0x1759   :  { %7335 = vmatpush3.bf16.msk.msra.mxu1 %vm9736_vm0, %v9594_v49  ;;  %vm4184_vm0 = vcmp.le.s32.totalorder %v7517_v5, 8 }
0x175a   :  { %6949 = vmatprep.subr.msk.mxu1 %vm9737_vm11, %v8330_v40 }
0x175d   :  { %6950 = vmatpush3.msk.msra.mxu1 %vm9738_vm7, %v8330_v40  ;;  %vm9750_vm7 = vcmp.ge.s32.totalorder %v7508_v2, 1  ;;  %v4129_v2 = vstv %s6180_s12  ;;  %s6304_s12 = sld [smem:[#allocation2 + $0x6b]] }
0x175e   :  { %6963 = vmatprep.subr.mxu1 %v9586_v35 }
0x182b   :  { %v6937_v8 = vpop.f32.mrb[48].mxu1 }
0x182c   :  { %v3864_v55 = vpop.f32.mrb[49].mxu1 }
0x182d   :  { %6942 = vmatprep.mubr.msk.f32.mxu0 %vm9739_vm4, %v3864_v55  ;;  %vm8792_vm4 = vmand %vm9750_vm7, %vm8663_vm2  ;;  %vm9753_vm2 = vcmask 1046528   ;;  %vm9756_vm7 = vnez %v9599_v26  ;;  %v9763_v26 = vld [vmem:[#allocation25_spill] sm:$0xff] }
0x182e   :  { %6943 = vmatmul.mubr.msk.f32.vlgmr.msra.gmra.mrb[50].mxu0 %vm9740_vm9, %v6937_v8 }
0x182f   :  { %7339 = vmatpush3.bf16.msk.msra.mxu0 %vm9732_vm1, %v9594_v49  ;;  %vm9747_vm1 = vmmov 0  }
0x1830   :  { %6958 = vmatprep.subr.msk.mxu0 %vm9741_vm13, %v8340_v13  ;;  %vm4194_vm13 = vmand %vm4184_vm0, %vm8782_vm14  ;;  %vm4178_vm0 = vcmp.eq.s32.totalorder %v7560_v12, %v8635_v18 }
0x1833   :  { %6959 = vmatpush3.msk.msra.mxu0 %vm9742_vm15, %v8340_v13  ;;  %v6190_v13 = vadd.s32 4294967286, %v7517_v5  ;;  %v4145_v5 = vstv %s6183_s14  ;;  %s9112_s14 = sld [smem:[#allocation4 + $0x16]] }
0x1834   :  { %7340 = vmatprep.subr.bf16.mxu0 %v9582_v28 }
0x1835   :  { %v4209_v27 = vmul.u32 2, %v6190_v13  ;;  %vm4200_vm9 = vcmp.ge.s32.totalorder %v6190_v13, 1 }
0x1837   :  { %v6193_v51 = vadd.s32 4294967295, %v4209_v27  ;;  %vm4218_vm11 = vcmp.eq.s32.totalorder %v7912_v62, %v4209_v27 }
0x1839   :  { %vm4215_vm15 = vcmp.eq.s32.totalorder %v7912_v62, %v6193_v51 }
0x1901   :  { %v6944_v48 = vpop.f32.mrb[50].mxu0 }
0x1902   :  { %v3948_v40 = vpop.f32.mrb[51].mxu0  ;;  %v4131_v54 = vmul.f32 %v6944_v48, %v4129_v2  ;;  %v4147_v9 = vmul.f32 %v6944_v48, %v4145_v5 }
0x1903   :  { %6951 = vmatprep.mubr.msk.f32.mxu1 %vm9743_vm3, %v3948_v40  ;;  %6960 = vmatprep.mubr.msk.f32.mxu0 %vm9744_vm10, %v3948_v40  ;;  %vm4221_vm3 = vmor %vm4215_vm15, %vm4218_vm11  ;;  %v4118_v60 = vmul.f32 %v4117_v31, %v3948_v40  ;;  %v4130_v21 = vmul.f32 %v4129_v2, %v3948_v40  ;;  %v4146_v17 = vmul.f32 %v4145_v5, %v3948_v40  ;;  %v4171_v2 = vstv %s6185_s1  ;;  %s6347_s1 = sld [smem:[#allocation2 + $0x6e]] }
0x1904   :  { %6952 = vmatmul.mubr.msk.f32.vlgmr.msra.gmra.mrb[50].mxu1 %vm9745_vm8, %v6944_v48  ;;  %6961 = vmatmul.mubr.msk.f32.vlgmr.msra.gmra.mrb[52].mxu0 %vm9746_vm6, %v6944_v48  ;;  %vm4224_vm10 = vmand %vm4200_vm9, %vm4221_vm3  ;;  %v4174_v31 = vstv %s6186_s21  ;;  %vm9755_vm11 = vcmask 64512   ;;  %vm9758_vm15 = vnez %v9602_v50  ;;  %s6350_s21 = sld [smem:[#allocation2 + $0x71]] }
0x1905   :  { %6965 = vmatprep.mubr.msk.f32.mxu1 %vm9747_vm1, %v9586_v35  ;;  %6980 = vmatprep.mubr.msk.f32.mxu0 %vm9747_vm1, %v9586_v35  ;;  %vm4227_vm8 = vmor %vm4194_vm13, %vm4224_vm10 }
0x1906   :  { %vm7341_vm6 = vmpackc.low %vm4227_vm8, %vm8792_vm4 }
0x1907   :  { %7342 = vmatpush3.bf16.msk.msra.mxu0 %vm7341_vm6, %v9594_v49  ;;  %vm4179_vm9 = vmor %vm4177_vm12, %vm4178_vm0  ;;  %vm9764_vm6 = vcmask 1043456  }
0x1908   :  { %6978 = vmatprep.subr.mxu0 %v9586_v35  ;;  %vm9757_vm13 = vmmov %vm9755_vm11 }
0x1909   :  { %vm9762_vm8 = vmmov %vm9755_vm11 }
0x19d7   :  { %v6953_v43 = vpop.f32.mrb[50].mxu1  ;;  %v6962_v57 = vpop.f32.mrb[52].mxu0 }
0x19d8   :  { %v4127_v4 = vmul.f32 %v6953_v43, %v4125_v37  ;;  %v4143_v53 = vmul.f32 %v6953_v43, %v4141_v14  ;;  %v4135_v23 = vmul.f32 %v6962_v57, %v4133_v0  ;;  %v4029_v22 = vpop.f32.mrb[51].mxu1  ;;  %v4104_v20 = vpop.f32.mrb[53].mxu0  ;;  %v4151_v32 = vmul.f32 %v6962_v57, %v4149_v52 }
0x19d9   :  { %v4115_v38 = vmul.f32 %v4114_v44, %v4029_v22  ;;  %v4126_v36 = vmul.f32 %v4125_v37, %v4029_v22  ;;  %v4142_v56 = vmul.f32 %v4141_v14, %v4029_v22  ;;  %v4121_v45 = vmul.f32 %v4120_v6, %v4104_v20 }
0x19da   :  { %v4137_v41 = vadd.f32 %v4131_v54, %v4127_v4  ;;  %v4153_v33 = vadd.f32 %v4147_v9, %v4143_v53  ;;  %v4134_v59 = vmul.f32 %v4133_v0, %v4104_v20  ;;  %v4150_v30 = vmul.f32 %v4149_v52, %v4104_v20  ;;  %v9759_v52 = vld [vmem:[#allocation21_spill] sm:$0xff]  ;;  %v9770_v4 = vld [vmem:[#allocation24_spill] sm:$0xff]  ;;  %v9772_v53 = vld [vmem:[#allocation23_spill] sm:$0xff] }
0x19db   :  { %v4122_v42 = vadd.f32 %v4118_v60, %v4115_v38  ;;  %v4136_v58 = vadd.f32 %v4130_v21, %v4126_v36  ;;  %v4152_v47 = vadd.f32 %v4146_v17, %v4142_v56  ;;  %v8829_v54 = vsel %vm4179_vm9, 1.0, %v9586_v35  ;;  %v9767_v21 = vld [vmem:[#allocation22_spill] sm:$0xff] }
0x19dc   :  { %v4139_v39 = vadd.f32 %v4137_v41, %v4135_v23  ;;  %v4155_v1 = vadd.f32 %v4153_v33, %v4151_v32  ;;  %vm9760_vm3 = vnez %v9759_v52  ;;  %v6191_v44 = vadd.s32 4294967286, %v7560_v12  ;;  %v9776_v17 = vld [vmem:[#allocation26_spill] sm:$0xff]  ;;  %v9784_v33 = vld [vmem:[#allocation20_spill] sm:$0xff] }
0x19dd   :  { %v4123_v7 = vadd.f32 %v4122_v42, %v4121_v45  ;;  %v4138_v63 = vadd.f32 %v4136_v58, %v4134_v59  ;;  %v4154_v8 = vadd.f32 %v4152_v47, %v4150_v30  ;;  %vm9761_vm10 = vmpackc.low %vm9758_vm15, %vm9760_vm3  ;;  %vm9766_vm9 = vcmask 162816   ;;  %v9785_v47 = vld [vmem:[#allocation8_spill] sm:$0xff] }
0x19de   :  { %v4159_v55 = vrot.slane %v4139_v39, 1  ;;  %v4166_v48 = vrot.slane %v4155_v1, 2  ;;  %v4210_v50 = vmul.u32 2, %v6191_v44  ;;  %vm4204_vm12 = vcmp.le.s32.totalorder %v6191_v44, 8  ;;  %vm9769_vm15 = vmmov %vm9766_vm9 }
0x19df   :  { %v4158_v40 = vrot.slane %v4138_v63, 1  ;;  %v4165_v11 = vrot.slane %v4154_v8, 2  ;;  %vm9771_vm3 = vnez %v9770_v4  ;;  %v6188_v45 = vadd.s32 4294967295, %v9784_v33 }
0x19e0   :  { %v6194_v43 = vadd.s32 4294967295, %v4210_v50  ;;  %v6240_v59 = vadd.s32 4294967278, %v7560_v12  ;;  %v6241_v42 = vadd.s32 4294967278, %v7572_v15  ;;  %v4605_v39 = vstv %s6227_s23  ;;  %s9370_s23 = sld [smem:[#allocation4 + $0x18]] }
0x19e1   :  { %v4160_v13 = vsel %vm9753_vm2, %v4158_v40, %v4159_v55  ;;  %v4167_v27 = vsel %vm9754_vm5, %v4165_v11, %v4166_v48  ;;  %vm4219_vm5 = vcmp.eq.s32.totalorder %v7912_v62, %v4210_v50  ;;  %v4584_v1 = vstv %s8925_s24  ;;  %s6355_s24 = sld [smem:[#allocation4 + $0x19]] }
0x19e2   :  { %v4162_v51 = vadd.f32 %v4160_v13, %v4123_v7  ;;  %vm4216_vm2 = vcmp.eq.s32.totalorder %v7912_v62, %v6194_v43  ;;  %v4734_v58 = vmul.u32 2, %v6240_v59  ;;  %v4735_v46 = vmul.u32 2, %v6241_v42 }
0x19e3   :  { %vm4222_vm0 = vmor %vm4216_vm2, %vm4219_vm5  ;;  %vm9778_vm5 = vcmask 293888   ;;  %v4600_v7 = vstv %s6226_s26  ;;  %v4621_v63 = vstv %s6229_s13  ;;  %v4626_v8 = vstv %s6230_s25 }
0x19e4   :  { %v4169_v5 = vadd.f32 %v4167_v27, %v4162_v51  ;;  %v6245_v61 = vadd.s32 4294967295, %v4734_v58  ;;  %v6246_v30 = vadd.s32 4294967295, %v4735_v46  ;;  %v4592_v55 = vstv %s8927_s27 }
0x19e5   :  { %v4610_v48 = vstv %s6228_s28  ;;  %v4631_v51 = vstv %s6231_s29 }
0x19e6   :  { %v4172_v37 = vmul.f32 %v4171_v2, %v4169_v5 }
0x19e8   :  { %v4175_v14 = vadd.f32 %v4174_v31, %v4172_v37 }
0x19ea   :  { %v4176_v0 = vmax.f32 %v4175_v14, 0.0 }
0x19ec   :  { %6964 = vmatpush3.msra.mxu1 %v4176_v0 }
0x19ed   :  { %6966 = vmatmul.mubr.msk.f32.vlgmr.msra.gmra.mrb[52].mxu1 %vm9755_vm11, %v8642_v34  ;;  %7343 = vmatprep.subr.bf16.mxu1 %v9582_v28  ;;  %vm4225_vm11 = vmand %vm4204_vm12, %vm4222_vm0 }
0x19ee   :  { %6968 = vmatprep.mubr.msk.f32.mxu1 %vm9747_vm1, %v9586_v35  ;;  %7345 = vmatpush3.bf16.msk.msra.mxu1 %vm9756_vm7, %v9594_v49  ;;  %v6197_v9 = vsel %vm4225_vm11, 1.0, %v9586_v35  ;;  %vm9765_vm7 = vmmov %vm9764_vm6 }
0x19ef   :  { %7346 = vmatprep.subr.bf16.mxu1 %v9582_v28  ;;  %6979 = vmatpush3.msk.msra.mxu0 %vm9765_vm7, %v6197_v9  ;;  %vm9777_vm2 = vmmov %vm9765_vm7 }
0x19f0   :  { %7349 = vmatprep.subr.bf16.mxu0 %v9582_v28  ;;  %vm9779_vm12 = vmmov %vm9778_vm5 }
0x19f1   :  { %6969 = vmatmul.mubr.msk.f32.gmra.mrb[54].mxu1 %vm9757_vm13, %v8742_v29  ;;  %vm9768_vm13 = vnez %v9767_v21  ;;  %vm9780_vm0 = vmmov %vm9778_vm5 }
0x19f2   :  { %6971 = vmatprep.mubr.msk.f32.mxu1 %vm9747_vm1, %v9586_v35  ;;  %7348 = vmatpush3.bf16.msk.msra.mxu1 %vm9761_vm10, %v9594_v49  ;;  %vm9773_vm10 = vnez %v9772_v53  ;;  %vm9781_vm11 = vmmov %vm9780_vm0 }
0x19f3   :  { %6997 = vmatprep.subr.mxu1 %v9586_v35  ;;  %vm9782_vm7 = vmmov %vm9780_vm0 }
0x19f5   :  { %6972 = vmatmul.mubr.msk.f32.gmra.mrb[56].mxu1 %vm9762_vm8, %v8829_v54  ;;  %vm9774_vm8 = vmpackc.low %vm9771_vm3, %vm9773_vm10  ;;  %vm4190_vm3 = vcmp.eq.s32.totalorder %v7510_v3, %v6188_v45 }
0x19f6   :  { %6998 = vmatpush3.msk.msra.mxu1 %vm9764_vm6, %v9763_v26  ;;  %6999 = vmatprep.mubr.msk.f32.mxu1 %vm9747_vm1, %v9586_v35  ;;  %vm9775_vm6 = vmmov %vm9766_vm9 }
0x19f7   :  { %7355 = vmatprep.subr.bf16.mxu1 %v9582_v28 }
0x1ac0   :  { %v4308_v57 = vpop.f32.mrb[52].mxu1 }
0x1ac1   :  { %6981 = vmatmul.mubr.msk.f32.vlgmr.msra.gmra.mrb[54].mxu0 %vm9766_vm9, %v4308_v57  ;;  %v6967_v60 = vpop.f32.mrb[53].mxu1  ;;  %vm9783_vm9 = vmmov %vm9780_vm0 }
0x1ac2   :  { %6983 = vmatprep.mubr.msk.f32.mxu0 %vm9747_vm1, %v9586_v35  ;;  %7351 = vmatpush3.bf16.msk.msra.mxu0 %vm9768_vm13, %v9594_v49  ;;  %vm7359_vm13 = vmpackc.low %vm8782_vm14, %vm8792_vm4  ;;  %vm4749_vm14 = vcmp.eq.s32.totalorder %v9785_v47, %v4734_v58  ;;  %vm4750_vm4 = vcmp.eq.s32.totalorder %v9785_v47, %v4735_v46 }
0x1ac3   :  { %7352 = vmatprep.subr.bf16.mxu0 %v9582_v28 }
0x1ac4   :  { %v4313_v62 = vpop.f32.mrb[54].mxu1 }
0x1ac5   :  { %6984 = vmatmul.mubr.msk.f32.gmra.mrb[56].mxu0 %vm9769_vm15, %v4313_v62  ;;  %v6970_v6 = vpop.f32.mrb[55].mxu1  ;;  %vm4191_vm15 = vcmp.eq.s32.totalorder %v7510_v3, %v9784_v33  ;;  %v4588_v3 = vstv %s8923_s22  ;;  %s6353_s22 = sld [smem:[#allocation2 + $0x74]] }
0x1ac6   :  { %6986 = vmatprep.mubr.msk.f32.mxu0 %vm9747_vm1, %v9586_v35  ;;  %7354 = vmatpush3.bf16.msk.msra.mxu0 %vm9774_vm8, %v9594_v49  ;;  %vm4192_vm10 = vmor %vm4190_vm3, %vm4191_vm15  ;;  %vm4689_vm8 = vcmp.le.s32.totalorder %v7560_v12, 16  ;;  %vm9786_vm15 = vcmask 1046528   ;;  %vm9787_vm3 = vcmask 1045504  }
0x1ac7   :  { %7016 = vmatprep.subr.mxu0 %v9586_v35 }
0x1ac8   :  { %v4318_v23 = vpop.f32.mrb[56].mxu1 }
0x1ac9   :  { %6987 = vmatmul.mubr.msk.f32.gmra.mrb[58].mxu0 %vm9775_vm6, %v4318_v23  ;;  %v6973_v22 = vpop.f32.mrb[57].mxu1  ;;  %vm4709_vm6 = vmand %vm4689_vm8, %vm4192_vm10 }
0x1aca   :  { %7017 = vmatpush3.msk.msra.mxu0 %vm9777_vm2, %v9776_v17  ;;  %7018 = vmatprep.mubr.msk.f32.mxu0 %vm9747_vm1, %v9586_v35  ;;  %vm4719_vm2 = vcmp.ge.s32.totalorder %v6240_v59, 1  ;;  %vm9788_vm10 = vmmov %vm9786_vm15 }
0x1acb   :  { %7358 = vmatprep.subr.bf16.mxu0 %v9582_v28  ;;  %vm9789_vm8 = vmmov %vm9787_vm3 }
0x1b94   :  { %v8874_v20 = vpop.f32.mrb[54].mxu0 }
0x1b95   :  { %7000 = vmatmul.mubr.msk.f32.vlgmr.msra.gmra.mrb[58].mxu1 %vm9778_vm5, %v8874_v20  ;;  %v6982_v32 = vpop.f32.mrb[55].mxu0  ;;  %7019 = vmatmul.mubr.msk.f32.vlgmr.msra.gmra.mrb[60].mxu0 %vm9779_vm12, %v8874_v20  ;;  %vm4744_vm5 = vcmp.eq.s32.totalorder %v9785_v47, %v6245_v61  ;;  %vm4745_vm12 = vcmp.eq.s32.totalorder %v9785_v47, %v6246_v30  ;;  %v4589_v11 = vmul.f32 %v4588_v3, %v8874_v20 }
0x1b96   :  { %7002 = vmatprep.mubr.msk.f32.mxu1 %vm9747_vm1, %v9586_v35  ;;  %7021 = vmatprep.mubr.msk.f32.mxu0 %vm9747_vm1, %v9586_v35  ;;  %v4606_v13 = vmul.f32 %v4605_v39, %v8874_v20  ;;  %v4627_v37 = vmul.f32 %v4626_v8, %v8874_v20 }
0x1b97   :  { %7360 = vmatpush3.bf16.msk.msra.mxu0 %vm7359_vm13, %v9594_v49 }
0x1b98   :  { %v8884_v38 = vpop.f32.mrb[56].mxu0  ;;  %7361 = vmatprep.subr.bf16.mxu0 %v9582_v28 }
0x1b99   :  { %7003 = vmatmul.mubr.msk.f32.gmra.mrb[60].mxu1 %vm9780_vm0, %v8884_v38  ;;  %v6985_v36 = vpop.f32.mrb[57].mxu0  ;;  %7022 = vmatmul.mubr.msk.f32.gmra.mrb[62].mxu0 %vm9781_vm11, %v8884_v38  ;;  %vm4754_vm0 = vmor %vm4744_vm5, %vm4749_vm14  ;;  %v4590_v60 = vmul.f32 %v4588_v3, %v8884_v38  ;;  %v4607_v20 = vmul.f32 %v4605_v39, %v8884_v38  ;;  %vm4777_vm14 = vcmask 130048  }
0x1b9a   :  { %7005 = vmatprep.mubr.msk.f32.mxu1 %vm9747_vm1, %v9586_v35  ;;  %7024 = vmatprep.mubr.msk.f32.mxu0 %vm9747_vm1, %v9586_v35  ;;  %vm4755_vm11 = vmor %vm4745_vm12, %vm4750_vm4  ;;  %v4628_v36 = vmul.f32 %v4626_v8, %v8884_v38 }
0x1b9c   :  { %v8894_v56 = vpop.f32.mrb[58].mxu0 }
0x1b9d   :  { %7006 = vmatmul.mubr.msk.f32.gmra.mrb[62].mxu1 %vm9782_vm7, %v8894_v56  ;;  %7025 = vmatmul.mubr.msk.f32.gmra.mrb[64].mxu0 %vm9783_vm9, %v8894_v56  ;;  %v6988_v41 = vpop.f32.mrb[59].mxu0  ;;  %vm4759_vm7 = vmand %vm4719_vm2, %vm4754_vm0  ;;  %v4608_v45 = vmul.f32 %v4605_v39, %v8894_v56  ;;  %vm4677_vm2 = vcmp.eq.s32.totalorder %v7572_v15, %v8635_v18  ;;  %vm4676_vm0 = vcmp.eq.s32.totalorder %v7616_v19, %v8632_v24 }
0x1b9e   :  { %7031 = vmatprep.mubr.msk.f32.mxu1 %vm9747_vm1, %v9586_v35  ;;  %7056 = vmatprep.mubr.msk.f32.mxu0 %vm9747_vm1, %v9586_v35  ;;  %vm4764_vm9 = vmor %vm4709_vm6, %vm4759_vm7  ;;  %vm4675_vm6 = vcmp.eq.s32.totalorder %v7572_v15, %v8632_v24 }
0x1b9f   :  { %vm7362_vm13 = vmpackc.low %vm4755_vm11, %vm4764_vm9  ;;  %vm4678_vm11 = vcmp.eq.s32.totalorder %v7616_v19, %v8635_v18  ;;  %v9796_v18 = vld [vmem:[#allocation16_spill] sm:$0xff] }
0x1ba0   :  { %7363 = vmatpush3.bf16.msk.msra.mxu0 %vm7362_vm13, %v9594_v49  ;;  %vm4679_vm12 = vmor %vm4675_vm6, %vm4677_vm2  ;;  %vm9797_vm13 = vnez %v9796_v18 }
0x1ba1   :  { %7054 = vmatprep.subr.mxu0 %v9586_v35  ;;  %vm4680_vm9 = vmor %vm4676_vm0, %vm4678_vm11 }
0x1ba2   :  { %v6235_v24 = vsel %vm4680_vm9, 1.0, %v9586_v35 }
0x1c68   :  { %v4489_v40 = vpop.f32.mrb[58].mxu1  ;;  %v4569_v27 = vpop.f32.mrb[60].mxu0 }
0x1c69   :  { %v4585_v2 = vmul.f32 %v4584_v1, %v4489_v40  ;;  %v4601_v5 = vmul.f32 %v4600_v7, %v4489_v40  ;;  %v4622_v31 = vmul.f32 %v4621_v63, %v4489_v40  ;;  %v7001_v14 = vpop.f32.mrb[59].mxu1  ;;  %v7020_v0 = vpop.f32.mrb[61].mxu0  ;;  %v4593_v52 = vmul.f32 %v4592_v55, %v4569_v27 }
0x1c6a   :  { %v4611_v26 = vmul.f32 %v4610_v48, %v4569_v27  ;;  %v4632_v9 = vmul.f32 %v4631_v51, %v4569_v27 }
0x1c6b   :  { %v4595_v44 = vadd.f32 %v4589_v11, %v4585_v2  ;;  %v4614_v50 = vadd.f32 %v4606_v13, %v4601_v5  ;;  %v4635_v43 = vadd.f32 %v4627_v37, %v4622_v31  ;;  %v4629_v11 = vmul.f32 %v4626_v8, %v8894_v56 }
0x1c6c   :  { %v4494_v57 = vpop.f32.mrb[60].mxu1  ;;  %v4574_v21 = vpop.f32.mrb[62].mxu0 }
0x1c6d   :  { %v4597_v62 = vadd.f32 %v4595_v44, %v4593_v52  ;;  %v4617_v6 = vadd.f32 %v4614_v50, %v4611_v26  ;;  %v4638_v4 = vadd.f32 %v4635_v43, %v4632_v9  ;;  %v4586_v53 = vmul.f32 %v4584_v1, %v4494_v57  ;;  %v7004_v23 = vpop.f32.mrb[61].mxu1  ;;  %v7023_v22 = vpop.f32.mrb[63].mxu0 }
0x1c6e   :  { %v4602_v17 = vmul.f32 %v4600_v7, %v4494_v57  ;;  %v4623_v32 = vmul.f32 %v4621_v63, %v4494_v57  ;;  %v4594_v33 = vmul.f32 %v4592_v55, %v4574_v21  ;;  %v4612_v58 = vmul.f32 %v4610_v48, %v4574_v21 }
0x1c6f   :  { %v4596_v41 = vadd.f32 %v4590_v60, %v4586_v53  ;;  %v4633_v46 = vmul.f32 %v4631_v51, %v4574_v21  ;;  %v4644_v37 = vrot.slane %v4617_v6, 1  ;;  %v4656_v14 = vrot.slane %v4638_v4, 2 }
0x1c70   :  { %v4615_v59 = vadd.f32 %v4607_v20, %v4602_v17  ;;  %v4636_v42 = vadd.f32 %v4628_v36, %v4623_v32  ;;  %v4499_v61 = vpop.f32.mrb[62].mxu1  ;;  %v4579_v30 = vpop.f32.mrb[64].mxu0  ;;  %v4666_v43 = vstv %s8939_s30  ;;  %v4670_v21 = vstv %s6233_s2  ;;  %v9794_v32 = vld [vmem:[#allocation14_spill] sm:$0xff] }
0x1c71   :  { %v4598_v3 = vadd.f32 %v4596_v41, %v4594_v33  ;;  %v4603_v1 = vmul.f32 %v4600_v7, %v4499_v61  ;;  %v4624_v40 = vmul.f32 %v4621_v63, %v4499_v61  ;;  %v7007_v13 = vpop.f32.mrb[63].mxu1  ;;  %v7026_v27 = vpop.f32.mrb[65].mxu0  ;;  %v4613_v5 = vmul.f32 %v4610_v48, %v4579_v30  ;;  %v9805_v61 = vld [vmem:[#allocation13_spill] sm:$0xff] }
0x1c72   :  { %v4618_v38 = vadd.f32 %v4615_v59, %v4612_v58  ;;  %v4639_v2 = vadd.f32 %v4636_v42, %v4633_v46  ;;  %v4634_v31 = vmul.f32 %v4631_v51, %v4579_v30  ;;  %vm9795_vm7 = vnez %v9794_v32  ;;  %v9802_v58 = vld [vmem:[#allocation11_spill] sm:$0xff]  ;;  %v9811_v13 = vld [vmem:[#allocation17_spill] sm:$0xff] }
0x1c73   :  { %v4616_v55 = vadd.f32 %v4608_v45, %v4603_v1  ;;  %v4637_v39 = vadd.f32 %v4629_v11, %v4624_v40  ;;  %v6242_v36 = vadd.s32 4294967278, %v7616_v19  ;;  %vm9803_vm0 = vnez %v9802_v58  ;;  %v9808_v1 = vld [vmem:[#allocation15_spill] sm:$0xff] }
0x1c74   :  { %v4645_v0 = vrot.slane %v4618_v38, 1  ;;  %v4657_v52 = vrot.slane %v4639_v2, 2  ;;  %vm9806_vm9 = vnez %v9805_v61  ;;  %v9814_v2 = vld [vmem:[#allocation19_spill] sm:$0xff] }
0x1c75   :  { %v4619_v26 = vadd.f32 %v4616_v55, %v4613_v5  ;;  %v4640_v44 = vadd.f32 %v4637_v39, %v4634_v31  ;;  %v4736_v41 = vmul.u32 2, %v6242_v36 }
0x1c76   :  { %v4646_v7 = vsel %vm9786_vm15, %v4644_v37, %v4645_v0  ;;  %v4658_v56 = vsel %vm9787_vm3, %v4656_v14, %v4657_v52  ;;  %vm9799_vm15 = vcmask 1043456  }
0x1c77   :  { %v4651_v63 = vadd.f32 %v4646_v7, %v4597_v62  ;;  %v4647_v8 = vrot.slane %v4619_v26, 1  ;;  %v4659_v50 = vrot.slane %v4640_v44, 2  ;;  %v9790_v62 = vld [vmem:[#allocation10_spill] sm:$0xff]  ;;  %v6247_v33 = vadd.s32 4294967295, %v4736_v41 }
0x1c78   :  { %vm9791_vm4 = vnez %v9790_v62  ;;  %v5190_v7 = vstv %s6297_s4 }
0x1c79   :  { %v4663_v9 = vadd.f32 %v4658_v56, %v4651_v63  ;;  %v4648_v57 = vsel %vm9788_vm10, %v4645_v0, %v4647_v8  ;;  %v4660_v48 = vsel %vm9789_vm8, %v4657_v52, %v4659_v50  ;;  %vm4746_vm3 = vcmp.eq.s32.totalorder %v9785_v47, %v6247_v33 }
0x1c7a   :  { %v4652_v51 = vadd.f32 %v4648_v57, %v4598_v3  ;;  %vm4751_vm10 = vcmp.eq.s32.totalorder %v9785_v47, %v4736_v41  ;;  %vm4726_vm8 = vcmp.le.s32.totalorder %v6242_v36, 16  ;;  %v5217_v56 = vstv %s6300_s5 }
0x1c7b   :  { %v4667_v60 = vmul.f32 %v4666_v43, %v4663_v9  ;;  %vm4756_vm6 = vmor %vm4746_vm3, %vm4751_vm10  ;;  %vm9809_vm3 = vnez %v9808_v1  ;;  %v9100_v63 = vstv %s6303_s7  ;;  %v9102_v8 = vstv %s6296_s6 }
0x1c7c   :  { %v4664_v6 = vadd.f32 %v4660_v48, %v4652_v51  ;;  %vm4761_vm2 = vmand %vm4726_vm8, %vm4756_vm6  ;;  %vm9812_vm8 = vnez %v9811_v13  ;;  %v9104_v50 = vstv %s6299_s8  ;;  %v9108_v57 = vstv %s6298_s10 }
0x1c7d   :  { %v4671_v53 = vadd.f32 %v4670_v21, %v4667_v60  ;;  %v6252_v45 = vsel %vm4761_vm2, 1.0, %v9586_v35  ;;  %v9110_v48 = vstv %s6301_s11  ;;  %v9307_v13 = vstv %s6349_s17 }
0x1c7e   :  { %v4668_v4 = vmul.f32 %v4666_v43, %v4664_v6  ;;  %v9106_v43 = vstv %s6302_s9 }
0x1c7f   :  { %v4673_v22 = vmax.f32 %v4671_v53, 0.0 }
0x1c80   :  { %v4672_v23 = vadd.f32 %v4670_v21, %v4668_v4  ;;  %v9117_v4 = vstv %s6304_s12 }
0x1c82   :  { %v4674_v17 = vmax.f32 %v4672_v23, 0.0 }
0x1c84   :  { %v7356_v20 = vpack.c.bf16 %v4674_v17, %v4673_v22 }
0x1c86   :  { %7357 = vmatpush3.bf16.msra.mxu1 %v7356_v20 }
0x1c87   :  { %7364 = vmatprep.subr.bf16.mxu1 %v9582_v28 }
0x1c89   :  { %7032 = vmatmul.mubr.msk.f32.vlgmr.msra.gmra.mrb[64].mxu1 %vm4777_vm14, %v8642_v34  ;;  %v9792_v34 = vld [vmem:[#allocation12_spill] sm:$0xff] }
0x1c8a   :  { %7034 = vmatprep.mubr.msk.f32.mxu1 %vm9747_vm1, %v9586_v35  ;;  %7366 = vmatpush3.bf16.msk.msra.mxu1 %vm9791_vm4, %v9594_v49  ;;  %vm9793_vm5 = vnez %v9792_v34 }
0x1c8b   :  { %7367 = vmatprep.subr.bf16.mxu1 %v9582_v28 }
0x1c8d   :  { %7035 = vmatmul.mubr.msk.f32.gmra.mrb[66].mxu1 %vm4777_vm14, %v8742_v29  ;;  %v6234_v29 = vsel %vm4679_vm12, 1.0, %v9586_v35  ;;  %vm9801_vm12 = vcmask 293888  }
0x1c8e   :  { %7037 = vmatprep.mubr.msk.f32.mxu1 %vm9747_vm1, %v9586_v35  ;;  %7369 = vmatpush3.bf16.msk.msra.mxu1 %vm9793_vm5, %v9594_v49  ;;  %vm9804_vm11 = vmmov %vm9801_vm12 }
0x1c8f   :  { %7370 = vmatprep.subr.bf16.mxu1 %v9582_v28  ;;  %vm9810_vm10 = vmmov %vm9804_vm11 }
0x1c90   :  { %vm9813_vm6 = vmmov %vm9810_vm10 }
0x1c91   :  { %7038 = vmatmul.mubr.msk.f32.gmra.mrb[68].mxu1 %vm4777_vm14, %v8829_v54  ;;  %v9798_v54 = vld [vmem:[#allocation18_spill] sm:$0xff] }
0x1c92   :  { %7040 = vmatprep.mubr.msk.f32.mxu1 %vm9747_vm1, %v9586_v35  ;;  %7372 = vmatpush3.bf16.msk.msra.mxu1 %vm9795_vm7, %v9594_v49 }
0x1c93   :  { %7373 = vmatprep.subr.bf16.mxu1 %v9582_v28 }
0x1c95   :  { %7041 = vmatmul.mubr.msk.f32.gmra.mrb[70].mxu1 %vm4777_vm14, %v6234_v29 }
0x1c96   :  { %7043 = vmatprep.mubr.msk.f32.mxu1 %vm9747_vm1, %v9586_v35  ;;  %7375 = vmatpush3.bf16.msk.msra.mxu1 %vm9797_vm13, %v9594_v49 }
0x1c97   :  { %7087 = vmatprep.subr.mxu1 %v9586_v35 }
0x1c99   :  { %7044 = vmatmul.mubr.msk.f32.gmra.mrb[72].mxu1 %vm4777_vm14, %v6235_v24  ;;  %vm9800_vm14 = vmmov %vm9799_vm15 }
0x1c9a   :  { %7088 = vmatpush3.msk.msra.mxu1 %vm9799_vm15, %v9798_v54  ;;  %7089 = vmatprep.mubr.msk.f32.mxu1 %vm9747_vm1, %v9586_v35  ;;  %vm9807_vm15 = vmmov %vm9804_vm11 }
0x1c9b   :  { %7388 = vmatprep.subr.bf16.mxu1 %v9582_v28  ;;  %7055 = vmatpush3.msk.msra.mxu0 %vm9800_vm14, %v6252_v45  ;;  %vm9815_vm2 = vmmov %vm9800_vm14  ;;  %vm9816_vm14 = vcmask 556032  }
0x1c9c   :  { %7376 = vmatprep.subr.bf16.mxu0 %v9582_v28 }
0x1d5c   :  { %v4856_v59 = vpop.f32.mrb[64].mxu1 }
0x1d5d   :  { %7057 = vmatmul.mubr.msk.f32.vlgmr.msra.gmra.mrb[66].mxu0 %vm9801_vm12, %v4856_v59  ;;  %v7033_v42 = vpop.f32.mrb[65].mxu1  ;;  %vm9817_vm12 = vmmov %vm9816_vm14 }
0x1d5e   :  { %7059 = vmatprep.mubr.msk.f32.mxu0 %vm9747_vm1, %v9586_v35  ;;  %7378 = vmatpush3.bf16.msk.msra.mxu0 %vm9803_vm0, %v9594_v49 }
0x1d5f   :  { %7379 = vmatprep.subr.bf16.mxu0 %v9582_v28 }
0x1d60   :  { %v4861_v47 = vpop.f32.mrb[66].mxu1 }
0x1d61   :  { %7060 = vmatmul.mubr.msk.f32.gmra.mrb[68].mxu0 %vm9804_vm11, %v4861_v47  ;;  %v7036_v46 = vpop.f32.mrb[67].mxu1  ;;  %vm9818_vm11 = vmmov %vm9817_vm12 }
0x1d62   :  { %7062 = vmatprep.mubr.msk.f32.mxu0 %vm9747_vm1, %v9586_v35  ;;  %7381 = vmatpush3.bf16.msk.msra.mxu0 %vm9806_vm9, %v9594_v49 }
0x1d63   :  { %7382 = vmatprep.subr.bf16.mxu0 %v9582_v28 }
0x1d64   :  { %v4866_v30 = vpop.f32.mrb[68].mxu1 }
0x1d65   :  { %7063 = vmatmul.mubr.msk.f32.gmra.mrb[70].mxu0 %vm9807_vm15, %v4866_v30  ;;  %v7039_v3 = vpop.f32.mrb[69].mxu1  ;;  %vm9819_vm15 = vmmov %vm9818_vm11 }
0x1d66   :  { %7065 = vmatprep.mubr.msk.f32.mxu0 %vm9747_vm1, %v9586_v35  ;;  %7384 = vmatpush3.bf16.msk.msra.mxu0 %vm9809_vm3, %v9594_v49 }
0x1d67   :  { %7385 = vmatprep.subr.bf16.mxu0 %v9582_v28 }
0x1d68   :  { %v4871_v40 = vpop.f32.mrb[70].mxu1 }
0x1d69   :  { %7066 = vmatmul.mubr.msk.f32.gmra.mrb[72].mxu0 %vm9810_vm10, %v4871_v40  ;;  %v7042_v11 = vpop.f32.mrb[71].mxu1 }
0x1d6a   :  { %7068 = vmatprep.mubr.msk.f32.mxu0 %vm9747_vm1, %v9586_v35  ;;  %7387 = vmatpush3.bf16.msk.msra.mxu0 %vm9812_vm8, %v9594_v49 }
0x1d6b   :  { %7120 = vmatprep.subr.mxu0 %v9586_v35 }
0x1d6c   :  { %v4876_v27 = vpop.f32.mrb[72].mxu1 }
0x1d6d   :  { %7069 = vmatmul.mubr.msk.f32.gmra.mrb[74].mxu0 %vm9813_vm6, %v4876_v27  ;;  %v7045_v38 = vpop.f32.mrb[73].mxu1 }
0x1d6e   :  { %7121 = vmatpush3.msk.msra.mxu0 %vm9815_vm2, %v9814_v2  ;;  %7122 = vmatprep.mubr.msk.f32.mxu0 %vm9747_vm1, %v9586_v35 }
0x1d6f   :  { %7394 = vmatprep.subr.bf16.mxu0 %v9582_v28 }
0x1e30   :  { %v4964_v55 = vpop.f32.mrb[66].mxu0 }
0x1e31   :  { %7090 = vmatmul.mubr.msk.f32.vlgmr.msra.gmra.mrb[74].mxu1 %vm9816_vm14, %v4964_v55  ;;  %v7058_v39 = vpop.f32.mrb[67].mxu0  ;;  %7123 = vmatmul.mubr.msk.f32.vlgmr.msra.gmra.mrb[76].mxu0 %vm9817_vm12, %v4964_v55  ;;  %vm9826_vm14 = vcmask 1043456   ;;  %v5191_v9 = vmul.f32 %v5190_v7, %v4964_v55  ;;  %v5218_v60 = vmul.f32 %v5217_v56, %v4964_v55  ;;  %v5249_v21 = vmul.f32 %v9100_v63, %v4964_v55 }
0x1e32   :  { %7092 = vmatprep.mubr.msk.f32.mxu1 %vm9747_vm1, %v9586_v35  ;;  %7125 = vmatprep.mubr.msk.f32.mxu0 %vm9747_vm1, %v9586_v35  ;;  %vm9828_vm12 = vcmask 1045504  }
0x1e33   :  { %7396 = vmatpush3.bf16.msk.msra.mxu0 %vm9791_vm4, %v9594_v49  ;;  %vm9820_vm4 = vmmov %vm9818_vm11 }
0x1e34   :  { %v9044_v5 = vpop.f32.mrb[68].mxu0  ;;  %7397 = vmatprep.subr.bf16.mxu0 %v9582_v28  ;;  %vm9821_vm10 = vmmov %vm9820_vm4 }
0x1e35   :  { %7093 = vmatmul.mubr.msk.f32.gmra.mrb[76].mxu1 %vm9818_vm11, %v9044_v5  ;;  %v7061_v31 = vpop.f32.mrb[69].mxu0  ;;  %7126 = vmatmul.mubr.msk.f32.gmra.mrb[78].mxu0 %vm9819_vm15, %v9044_v5  ;;  %vm9823_vm6 = vmmov %vm9820_vm4  ;;  %v5192_v53 = vmul.f32 %v5190_v7, %v9044_v5  ;;  %v5219_v62 = vmul.f32 %v5217_v56, %v9044_v5  ;;  %v5250_v24 = vmul.f32 %v9100_v63, %v9044_v5 }
0x1e36   :  { %7095 = vmatprep.mubr.msk.f32.mxu1 %vm9747_vm1, %v9586_v35  ;;  %7128 = vmatprep.mubr.msk.f32.mxu0 %vm9747_vm1, %v9586_v35  ;;  %vm9825_vm2 = vmmov %vm9820_vm4 }
0x1e37   :  { %7399 = vmatpush3.bf16.msk.msra.mxu0 %vm9793_vm5, %v9594_v49  ;;  %vm9822_vm5 = vmmov %vm9820_vm4 }
0x1e38   :  { %v9058_v37 = vpop.f32.mrb[70].mxu0  ;;  %7400 = vmatprep.subr.bf16.mxu0 %v9582_v28  ;;  %vm9830_vm15 = vmmov %vm9828_vm12 }
0x1e39   :  { %7096 = vmatmul.mubr.msk.f32.gmra.mrb[78].mxu1 %vm9820_vm4, %v9058_v37  ;;  %v7064_v14 = vpop.f32.mrb[71].mxu0  ;;  %7129 = vmatmul.mubr.msk.f32.gmra.mrb[80].mxu0 %vm9821_vm10, %v9058_v37  ;;  %v5193_v18 = vmul.f32 %v5190_v7, %v9058_v37  ;;  %v5220_v42 = vmul.f32 %v5217_v56, %v9058_v37  ;;  %v5251_v47 = vmul.f32 %v9100_v63, %v9058_v37  ;;  %vm9832_vm10 = vmmov %vm9828_vm12 }
0x1e3a   :  { %7098 = vmatprep.mubr.msk.f32.mxu1 %vm9747_vm1, %v9586_v35  ;;  %7131 = vmatprep.mubr.msk.f32.mxu0 %vm9747_vm1, %v9586_v35 }
0x1e3b   :  { %7402 = vmatpush3.bf16.msk.msra.mxu0 %vm9795_vm7, %v9594_v49  ;;  %vm9824_vm7 = vmmov %vm9820_vm4 }
0x1e3c   :  { %v9072_v0 = vpop.f32.mrb[72].mxu0  ;;  %7403 = vmatprep.subr.bf16.mxu0 %v9582_v28 }
0x1e3d   :  { %7099 = vmatmul.mubr.msk.f32.gmra.mrb[80].mxu1 %vm9822_vm5, %v9072_v0  ;;  %v7067_v52 = vpop.f32.mrb[73].mxu0  ;;  %7132 = vmatmul.mubr.msk.f32.gmra.mrb[82].mxu0 %vm9823_vm6, %v9072_v0  ;;  %v5194_v46 = vmul.f32 %v5190_v7, %v9072_v0  ;;  %v5221_v30 = vmul.f32 %v5217_v56, %v9072_v0  ;;  %v5252_v31 = vmul.f32 %v9100_v63, %v9072_v0  ;;  %v9148_v7 = vstv %s9114_s15 }
0x1e3e   :  { %7101 = vmatprep.mubr.msk.f32.mxu1 %vm9747_vm1, %v9586_v35  ;;  %7134 = vmatprep.mubr.msk.f32.mxu0 %vm9747_vm1, %v9586_v35 }
0x1e3f   :  { %7405 = vmatpush3.bf16.msk.msra.mxu0 %vm9797_vm13, %v9594_v49  ;;  %vm9827_vm13 = vcmask 1046528  }
0x1e40   :  { %v9086_v26 = vpop.f32.mrb[74].mxu0  ;;  %7176 = vmatprep.subr.mxu0 %v9586_v35  ;;  %vm9829_vm11 = vmmov %vm9827_vm13 }
0x1e41   :  { %7102 = vmatmul.mubr.msk.f32.gmra.mrb[82].mxu1 %vm9824_vm7, %v9086_v26  ;;  %7135 = vmatmul.mubr.msk.f32.gmra.mrb[84].mxu0 %vm9825_vm2, %v9086_v26  ;;  %v7070_v44 = vpop.f32.mrb[75].mxu0  ;;  %v9141_v37 = vmul.f32 %v5217_v56, %v9086_v26  ;;  %vm9831_vm4 = vmmov %vm9829_vm11  ;;  %vm5344_vm2 = vcmask 261120  }
0x1e42   :  { %7145 = vmatprep.mubr.msk.f32.mxu1 %vm9747_vm1, %v9586_v35  ;;  %7178 = vmatprep.mubr.msk.f32.mxu0 %vm9747_vm1, %v9586_v35  ;;  %v9145_v44 = vstv %s9112_s14  ;;  %vm9835_vm6 = vmmov %vm9831_vm4 }
0x1e43   :  { %7177 = vmatpush3.msk.msra.mxu0 %vm9826_vm14, %v9798_v54  ;;  %vm9836_vm7 = vmmov %vm9832_vm10  ;;  %vm9837_vm14 = vnez %v9557_v16 }
0x1e44   :  { %7406 = vmatprep.subr.bf16.mxu0 %v9582_v28 }
0x1f04   :  { %v5069_v51 = vpop.f32.mrb[74].mxu1  ;;  %v5159_v6 = vpop.f32.mrb[76].mxu0 }
0x1f05   :  { %v5185_v23 = vmul.f32 %v9102_v8, %v5069_v51  ;;  %v5211_v22 = vmul.f32 %v9104_v50, %v5069_v51  ;;  %v5242_v17 = vmul.f32 %v9106_v43, %v5069_v51  ;;  %v7091_v20 = vpop.f32.mrb[75].mxu1  ;;  %v7124_v34 = vpop.f32.mrb[77].mxu0  ;;  %v5197_v29 = vmul.f32 %v9108_v57, %v5159_v6 }
0x1f06   :  { %v5225_v32 = vmul.f32 %v9110_v48, %v5159_v6  ;;  %v5256_v33 = vmul.f32 %v9117_v4, %v5159_v6 }
0x1f07   :  { %v5201_v54 = vadd.f32 %v5191_v9, %v5185_v23  ;;  %v5230_v36 = vadd.f32 %v5218_v60, %v5211_v22  ;;  %v5261_v41 = vadd.f32 %v5249_v21, %v5242_v17 }
0x1f08   :  { %v5074_v45 = vpop.f32.mrb[76].mxu1  ;;  %v5164_v59 = vpop.f32.mrb[78].mxu0 }
0x1f09   :  { %v5205_v3 = vadd.f32 %v5201_v54, %v5197_v29  ;;  %v5235_v40 = vadd.f32 %v5230_v36, %v5225_v32  ;;  %v5266_v11 = vadd.f32 %v5261_v41, %v5256_v33  ;;  %v5186_v27 = vmul.f32 %v9102_v8, %v5074_v45  ;;  %v7094_v38 = vpop.f32.mrb[77].mxu1  ;;  %v7127_v55 = vpop.f32.mrb[79].mxu0 }
0x1f0a   :  { %v5212_v39 = vmul.f32 %v9104_v50, %v5074_v45  ;;  %v5243_v5 = vmul.f32 %v9106_v43, %v5074_v45  ;;  %v5198_v52 = vmul.f32 %v9108_v57, %v5164_v59  ;;  %v5226_v60 = vmul.f32 %v9110_v48, %v5164_v59 }
0x1f0b   :  { %v5202_v14 = vadd.f32 %v5192_v53, %v5186_v27  ;;  %v5257_v21 = vmul.f32 %v9117_v4, %v5164_v59  ;;  %v5276_v33 = vrot.slane %v5235_v40, 1  ;;  %v5298_v45 = vrot.slane %v5266_v11, 2 }
0x1f0c   :  { %v5231_v9 = vadd.f32 %v5219_v62, %v5212_v39  ;;  %v5262_v51 = vadd.f32 %v5250_v24, %v5243_v5  ;;  %v5079_v6 = vpop.f32.mrb[78].mxu1  ;;  %v5169_v23 = vpop.f32.mrb[80].mxu0 }
0x1f0d   :  { %v5206_v22 = vadd.f32 %v5202_v14, %v5198_v52  ;;  %v5187_v0 = vmul.f32 %v9102_v8, %v5079_v6  ;;  %v5213_v56 = vmul.f32 %v9104_v50, %v5079_v6  ;;  %v5244_v53 = vmul.f32 %v9106_v43, %v5079_v6  ;;  %v7097_v17 = vpop.f32.mrb[79].mxu1  ;;  %v7130_v20 = vpop.f32.mrb[81].mxu0 }
0x1f0e   :  { %v5236_v34 = vadd.f32 %v5231_v9, %v5226_v60  ;;  %v5267_v29 = vadd.f32 %v5262_v51, %v5257_v21  ;;  %v5199_v62 = vmul.f32 %v9108_v57, %v5169_v23  ;;  %v5227_v32 = vmul.f32 %v9110_v48, %v5169_v23 }
0x1f0f   :  { %v5203_v24 = vadd.f32 %v5193_v18, %v5187_v0  ;;  %v5232_v54 = vadd.f32 %v5220_v42, %v5213_v56  ;;  %v5263_v36 = vadd.f32 %v5251_v47, %v5244_v53  ;;  %v5258_v41 = vmul.f32 %v9117_v4, %v5169_v23 }
0x1f10   :  { %v5277_v59 = vrot.slane %v5236_v34, 1  ;;  %v5299_v27 = vrot.slane %v5267_v29, 2  ;;  %v5084_v38 = vpop.f32.mrb[80].mxu1  ;;  %v5174_v55 = vpop.f32.mrb[82].mxu0 }
0x1f11   :  { %v5207_v39 = vadd.f32 %v5203_v24, %v5199_v62  ;;  %v5237_v5 = vadd.f32 %v5232_v54, %v5227_v32  ;;  %v5268_v14 = vadd.f32 %v5263_v36, %v5258_v41  ;;  %v5188_v52 = vmul.f32 %v9102_v8, %v5084_v38  ;;  %v7100_v9 = vpop.f32.mrb[81].mxu1  ;;  %v7133_v51 = vpop.f32.mrb[83].mxu0 }
0x1f12   :  { %v5278_v60 = vsel %vm9827_vm13, %v5276_v33, %v5277_v59  ;;  %v5300_v18 = vsel %vm9828_vm12, %v5298_v45, %v5299_v27  ;;  %v5214_v42 = vmul.f32 %v9104_v50, %v5084_v38  ;;  %v5245_v47 = vmul.f32 %v9106_v43, %v5084_v38 }
0x1f13   :  { %v5289_v40 = vadd.f32 %v5278_v60, %v5205_v3  ;;  %v5279_v11 = vrot.slane %v5237_v5, 1  ;;  %v5301_v21 = vrot.slane %v5268_v14, 2  ;;  %v5204_v6 = vadd.f32 %v5194_v46, %v5188_v52 }
0x1f14   :  { %v5233_v23 = vadd.f32 %v5221_v30, %v5214_v42  ;;  %v5264_v0 = vadd.f32 %v5252_v31, %v5245_v47  ;;  %v5200_v56 = vmul.f32 %v9108_v57, %v5174_v55  ;;  %v5228_v8 = vmul.f32 %v9110_v48, %v5174_v55  ;;  %v5089_v53 = vpop.f32.mrb[82].mxu1  ;;  %v5179_v17 = vpop.f32.mrb[84].mxu0 }
0x1f15   :  { %v5311_v20 = vadd.f32 %v5300_v18, %v5289_v40  ;;  %v5280_v34 = vsel %vm9829_vm11, %v5277_v59, %v5279_v11  ;;  %v5302_v29 = vsel %vm9830_vm15, %v5299_v27, %v5301_v21  ;;  %v5259_v62 = vmul.f32 %v9117_v4, %v5174_v55  ;;  %v7103_v32 = vpop.f32.mrb[83].mxu1  ;;  %v7136_v3 = vpop.f32.mrb[85].mxu0  ;;  %v9833_v18 = vld [vmem:[#allocation9_spill] sm:$0xff] }
0x1f16   :  { %v5290_v24 = vadd.f32 %v5280_v34, %v5206_v22  ;;  %v5208_v54 = vadd.f32 %v5204_v6, %v5200_v56  ;;  %v5238_v46 = vadd.f32 %v5233_v23, %v5228_v8  ;;  %v5215_v30 = vmul.f32 %v9104_v50, %v5089_v53 }
0x1f17   :  { %v5317_v57 = vmul.f32 %v9145_v44, %v5311_v20  ;;  %v5269_v31 = vadd.f32 %v5264_v0, %v5259_v62  ;;  %v5246_v36 = vmul.f32 %v9106_v43, %v5089_v53  ;;  %v5253_v41 = vmul.f32 %v9100_v63, %v9086_v26 }
0x1f18   :  { %v5312_v33 = vadd.f32 %v5302_v29, %v5290_v24  ;;  %v5281_v45 = vrot.slane %v5238_v46, 1  ;;  %v5234_v59 = vadd.f32 %v9141_v37, %v5215_v30  ;;  %v5229_v27 = vmul.f32 %v9110_v48, %v5179_v17 }
0x1f19   :  { %v5303_v38 = vrot.slane %v5269_v31, 2  ;;  %v5265_v22 = vadd.f32 %v5253_v41, %v5246_v36  ;;  %v5260_v55 = vmul.f32 %v9117_v4, %v5179_v17  ;;  %v5323_v50 = vadd.f32 %v9148_v7, %v5317_v57 }
0x1f1a   :  { %v5318_v5 = vmul.f32 %v9145_v44, %v5312_v33  ;;  %v5282_v14 = vsel %vm9831_vm4, %v5279_v11, %v5281_v45  ;;  %v5239_v43 = vadd.f32 %v5234_v59, %v5229_v27  ;;  %vm9834_vm5 = vnez %v9833_v18 }
0x1f1b   :  { %v5291_v52 = vadd.f32 %v5282_v14, %v5207_v39  ;;  %v5304_v26 = vsel %vm9832_vm10, %v5301_v21, %v5303_v38  ;;  %v5270_v63 = vadd.f32 %v5265_v22, %v5260_v55  ;;  %v5327_v51 = vmax.f32 %v5323_v50, 0.0 }
0x1f1c   :  { %v5283_v9 = vrot.slane %v5239_v43, 1  ;;  %v5324_v37 = vadd.f32 %v9148_v7, %v5318_v5  ;;  %v9184_v4 = vsel %vm9834_vm5, 1.0, %v9586_v35  ;;  %vm9838_vm13 = vcmp.eq.s32.totalorder %v7560_v12, %v7544_v10 }
0x1f1d   :  { %v5313_v48 = vadd.f32 %v5304_v26, %v5291_v52  ;;  %v5305_v60 = vrot.slane %v5270_v63, 2  ;;  %v5340_v21 = vmul.f32 %v9184_v4, %v5327_v51  ;;  %vm9839_vm12 = vcmp.eq.s32.totalorder %v7572_v15, %v7544_v10 }
0x1f1e   :  { %v5284_v42 = vsel %vm9835_vm6, %v5281_v45, %v5283_v9  ;;  %v5328_v47 = vmax.f32 %v5324_v37, 0.0  ;;  %v6309_v16 = vsel %vm9839_vm12, 1.0, %v9586_v35  ;;  %vm9840_vm11 = vcmp.eq.s32.totalorder %v7616_v19, %v7544_v10 }
0x1f1f   :  { %v5319_v40 = vmul.f32 %v9145_v44, %v5313_v48  ;;  %v5292_v39 = vadd.f32 %v5284_v42, %v5208_v54  ;;  %v5306_v11 = vsel %vm9836_vm7, %v5303_v38, %v5305_v60  ;;  %v6310_v12 = vsel %vm9840_vm11, 1.0, %v9586_v35 }
0x1f20   :  { %v5341_v6 = vmul.f32 %v9184_v4, %v5328_v47  ;;  %vm9841_vm15 = vcmask 1043456   ;;  %vm9842_vm4 = vcmask 556032   ;;  %v9309_v24 = vstv %s6348_s20 }
0x1f21   :  { %v5314_v23 = vadd.f32 %v5306_v11, %v5292_v39  ;;  %v5325_v0 = vadd.f32 %v9148_v7, %v5319_v40  ;;  %vm9843_vm10 = vmmov %vm9842_vm4  ;;  %v9311_v54 = vstv %s6351_s0  ;;  %v9313_v46 = vstv %s6352_s19 }
0x1f22   :  { %v7389_v56 = vpack.c.bf16 %v5341_v6, %v5340_v21  ;;  %v9332_v63 = vstv %s6347_s1  ;;  %v9340_v48 = vstv %s6350_s21  ;;  %v9345_v40 = vstv %s6353_s22 }
0x1f23   :  { %v5320_v8 = vmul.f32 %v9145_v44, %v5314_v23  ;;  %v5329_v17 = vmax.f32 %v5325_v0, 0.0  ;;  %v6307_v44 = vsel %vm9837_vm14, 1.0, %v9586_v35 }
0x1f24   :  { %7390 = vmatpush3.bf16.msra.mxu1 %v7389_v56 }
0x1f25   :  { %7391 = vmatprep.subr.bf16.mxu1 %v9582_v28  ;;  %v5326_v53 = vadd.f32 %v9148_v7, %v5320_v8  ;;  %v5342_v34 = vmul.f32 %v9184_v4, %v5329_v17 }
0x1f27   :  { %v5330_v20 = vmax.f32 %v5326_v53, 0.0 }
0x1f29   :  { %v5343_v29 = vmul.f32 %v9184_v4, %v5330_v20 }
0x1f2b   :  { %v7392_v62 = vpack.c.bf16 %v5343_v29, %v5342_v34 }
0x1f2d   :  { %7393 = vmatpush3.bf16.msra.mxu1 %v7392_v62 }
0x1f2e   :  { %7418 = vmatprep.subr.bf16.mxu1 %v9582_v28 }
0x1f30   :  { %7146 = vmatmul.mubr.msk.f32.vlgmr.msra.gmra.mrb[84].mxu1 %vm5344_vm2, %v8614_v25  ;;  %v6308_v25 = vsel %vm9838_vm13, 1.0, %v9586_v35  ;;  %vm9854_vm13 = vcmask 1045504  }
0x1f31   :  { %7148 = vmatprep.mubr.msk.f32.mxu1 %vm9747_vm1, %v9586_v35  ;;  %7423 = vmatpush3.bf16.msk.msra.mxu1 %vm9803_vm0, %v9594_v49  ;;  %vm9856_vm11 = vmmov %vm9854_vm13 }
0x1f32   :  { %7419 = vmatprep.subr.bf16.mxu1 %v9582_v28 }
0x1f34   :  { %7149 = vmatmul.mubr.msk.f32.gmra.mrb[86].mxu1 %vm5344_vm2, %v6307_v44 }
0x1f35   :  { %7151 = vmatprep.mubr.msk.f32.mxu1 %vm9747_vm1, %v9586_v35  ;;  %7424 = vmatpush3.bf16.msk.msra.mxu1 %vm9806_vm9, %v9594_v49 }
0x1f36   :  { %7420 = vmatprep.subr.bf16.mxu1 %v9582_v28 }
0x1f38   :  { %7152 = vmatmul.mubr.msk.f32.gmra.mrb[88].mxu1 %vm5344_vm2, %v6308_v25 }
0x1f39   :  { %7154 = vmatprep.mubr.msk.f32.mxu1 %vm9747_vm1, %v9586_v35  ;;  %7425 = vmatpush3.bf16.msk.msra.mxu1 %vm9809_vm3, %v9594_v49 }
0x1f3a   :  { %7421 = vmatprep.subr.bf16.mxu1 %v9582_v28 }
0x1f3c   :  { %7155 = vmatmul.mubr.msk.f32.gmra.mrb[90].mxu1 %vm5344_vm2, %v6309_v16 }
0x1f3d   :  { %7157 = vmatprep.mubr.msk.f32.mxu1 %vm9747_vm1, %v9586_v35  ;;  %7426 = vmatpush3.bf16.msk.msra.mxu1 %vm9812_vm8, %v9594_v49 }
0x1f3e   :  { %7422 = vmatprep.subr.mxu1 %v9586_v35 }
0x1f40   :  { %7158 = vmatmul.mubr.msk.f32.gmra.mrb[92].mxu1 %vm5344_vm2, %v6310_v12  ;;  %vm9850_vm2 = vmmov %vm9841_vm15 }
0x1f41   :  { %7427 = vmatpush3.msk.msra.mxu1 %vm9841_vm15, %v9814_v2  ;;  %7217 = vmatprep.mubr.msk.f32.mxu1 %vm9747_vm1, %v9586_v35 }
0x2003   :  { %v5425_v15 = vpop.f32.mrb[84].mxu1 }
0x2004   :  { %7179 = vmatmul.mubr.msk.f32.vlgmr.msra.gmra.mrb[86].mxu0 %vm9842_vm4, %v5425_v15  ;;  %v7147_v7 = vpop.f32.mrb[85].mxu1  ;;  %v5679_v57 = vmul.f32 %v9307_v13, %v5425_v15  ;;  %v5710_v33 = vmul.f32 %v9313_v46, %v5425_v15 }
0x2005   :  { %7181 = vmatprep.mubr.msk.f32.mxu0 %vm9747_vm1, %v9586_v35  ;;  %7408 = vmatpush3.bf16.msk.msra.mxu0 %vm9803_vm0, %v9594_v49  ;;  %vm9844_vm0 = vmmov %vm9842_vm4 }
0x2006   :  { %7409 = vmatprep.subr.bf16.mxu0 %v9582_v28  ;;  %vm9845_vm5 = vmmov %vm9844_vm0 }
0x2007   :  { %v9254_v10 = vpop.f32.mrb[86].mxu1  ;;  %vm9847_vm6 = vmmov %vm9844_vm0 }
0x2008   :  { %7182 = vmatmul.mubr.msk.f32.gmra.mrb[88].mxu0 %vm9843_vm10, %v9254_v10  ;;  %v7150_v19 = vpop.f32.mrb[87].mxu1  ;;  %vm9849_vm7 = vmmov %vm9844_vm0  ;;  %v5680_v50 = vmul.f32 %v9307_v13, %v9254_v10  ;;  %v5711_v52 = vmul.f32 %v9313_v46, %v9254_v10 }
0x2009   :  { %7184 = vmatprep.mubr.msk.f32.mxu0 %vm9747_vm1, %v9586_v35  ;;  %7411 = vmatpush3.bf16.msk.msra.mxu0 %vm9806_vm9, %v9594_v49  ;;  %vm9846_vm9 = vmmov %vm9844_vm0 }
0x200a   :  { %7412 = vmatprep.subr.bf16.mxu0 %v9582_v28  ;;  %vm9852_vm14 = vmmov %vm9844_vm0 }
0x200b   :  { %v9264_v32 = vpop.f32.mrb[88].mxu1  ;;  %vm9859_vm10 = vmmov %vm9856_vm11 }
0x200c   :  { %7185 = vmatmul.mubr.msk.f32.gmra.mrb[90].mxu0 %vm9844_vm0, %v9264_v32  ;;  %v7153_v58 = vpop.f32.mrb[89].mxu1  ;;  %7218 = vmatmul.mubr.msk.f32.vlgmr.msra.gmra.mrb[94].mxu1 %vm9845_vm5, %v9264_v32  ;;  %v5681_v42 = vmul.f32 %v9307_v13, %v9264_v32  ;;  %v5712_v6 = vmul.f32 %v9313_v46, %v9264_v32 }
0x200d   :  { %7187 = vmatprep.mubr.msk.f32.mxu0 %vm9747_vm1, %v9586_v35  ;;  %7414 = vmatpush3.bf16.msk.msra.mxu0 %vm9809_vm3, %v9594_v49  ;;  %vm9848_vm3 = vmmov %vm9844_vm0 }
0x200e   :  { %7220 = vmatprep.mubr.msk.f32.mxu1 %vm9747_vm1, %v9586_v35  ;;  %7415 = vmatprep.subr.bf16.mxu0 %v9582_v28  ;;  %vm9861_vm5 = vmmov %vm9848_vm3 }
0x200f   :  { %v9278_v61 = vpop.f32.mrb[90].mxu1 }
0x2010   :  { %7188 = vmatmul.mubr.msk.f32.gmra.mrb[92].mxu0 %vm9846_vm9, %v9278_v61  ;;  %v7156_v3 = vpop.f32.mrb[91].mxu1  ;;  %7221 = vmatmul.mubr.msk.f32.gmra.mrb[96].mxu1 %vm9847_vm6, %v9278_v61  ;;  %vm9862_vm9 = vmmov %vm9848_vm3 }
0x2011   :  { %7190 = vmatprep.mubr.msk.f32.mxu0 %vm9747_vm1, %v9586_v35  ;;  %7417 = vmatpush3.bf16.msk.msra.mxu0 %vm9812_vm8, %v9594_v49  ;;  %vm9851_vm8 = vmmov %vm9844_vm0  ;;  %v5651_v49 = vstv %s6346_s16  ;;  %v5713_v3 = vmul.f32 %v9313_v46, %v9278_v61 }
0x2012   :  { %7223 = vmatprep.mubr.msk.f32.mxu1 %vm9747_vm1, %v9586_v35  ;;  %7209 = vmatprep.subr.mxu0 %v9586_v35  ;;  %v5652_v30 = vmul.f32 %v5651_v49, %v5425_v15  ;;  %v5653_v55 = vmul.f32 %v5651_v49, %v9254_v10  ;;  %v5654_v18 = vmul.f32 %v5651_v49, %v9264_v32  ;;  %vm9860_vm0 = vmmov %vm9859_vm10 }
0x2013   :  { %v9292_v28 = vpop.f32.mrb[92].mxu1  ;;  %v5655_v62 = vmul.f32 %v5651_v49, %v9278_v61  ;;  %v5682_v32 = vmul.f32 %v9307_v13, %v9278_v61  ;;  %vm9863_vm6 = vmmov %vm9848_vm3 }
0x2014   :  { %7191 = vmatmul.mubr.msk.f32.gmra.mrb[94].mxu0 %vm9848_vm3, %v9292_v28  ;;  %7224 = vmatmul.mubr.msk.f32.gmra.mrb[98].mxu1 %vm9849_vm7, %v9292_v28  ;;  %v7159_v1 = vpop.f32.mrb[93].mxu1  ;;  %vm9864_vm7 = vmmov %vm9848_vm3 }
0x2015   :  { %7210 = vmatpush3.msk.msra.mxu0 %vm9850_vm2, %v9814_v2  ;;  %7211 = vmatprep.mubr.msk.f32.mxu0 %vm9747_vm1, %v9586_v35  ;;  %v5645_v2 = vstv %s6345_s18  ;;  %vm9865_vm2 = vmmov %vm9848_vm3 }
0x2018   :  { %7212 = vmatmul.mubr.msk.f32.vlgmr.msra.gmra.mrb[96].mxu0 %vm9851_vm8, %v5425_v15  ;;  %vm9866_vm8 = vmmov %vm9865_vm2 }
0x2019   :  { %7214 = vmatprep.mubr.msk.f32.mxu0 %vm9747_vm1, %v9586_v35  ;;  %vm9853_vm1 = vcmask 1046528  }
0x201a   :  { %vm9855_vm12 = vmmov %vm9853_vm1 }
0x201b   :  { %vm9857_vm15 = vmmov %vm9853_vm1 }
0x201c   :  { %7215 = vmatmul.mubr.msk.f32.gmra.mrb[98].mxu0 %vm9852_vm14, %v9254_v10  ;;  %vm9858_vm4 = vmmov %vm9853_vm1 }
0x201d   :  { %vm9867_vm14 = vmmov %vm9865_vm2 }
0x20d7   :  { %v5530_v35 = vpop.f32.mrb[86].mxu0 }
0x20d8   :  { %v5646_v31 = vmul.f32 %v5645_v2, %v5530_v35  ;;  %v5672_v36 = vmul.f32 %v9309_v24, %v5530_v35  ;;  %v5703_v41 = vmul.f32 %v9311_v54, %v5530_v35  ;;  %v7180_v45 = vpop.f32.mrb[87].mxu0  ;;  %v5683_v35 = vmul.f32 %v9307_v13, %v9292_v28 }
0x20da   :  { %v9319_v59 = vadd.f32 %v5652_v30, %v5646_v31  ;;  %v9321_v27 = vadd.f32 %v5679_v57, %v5672_v36  ;;  %v9323_v38 = vadd.f32 %v5710_v33, %v5703_v41 }
0x20db   :  { %v5535_v22 = vpop.f32.mrb[88].mxu0 }
0x20dc   :  { %v5647_v5 = vmul.f32 %v5645_v2, %v5535_v22  ;;  %v5673_v14 = vmul.f32 %v9309_v24, %v5535_v22  ;;  %v5704_v43 = vmul.f32 %v9311_v54, %v5535_v22  ;;  %v7183_v26 = vpop.f32.mrb[89].mxu0  ;;  %v5714_v22 = vmul.f32 %v9313_v46, %v9292_v28 }
0x20de   :  { %v9334_v9 = vadd.f32 %v5653_v55, %v5647_v5  ;;  %v9336_v37 = vadd.f32 %v5680_v50, %v5673_v14  ;;  %v9338_v51 = vadd.f32 %v5711_v52, %v5704_v43 }
0x20df   :  { %v5540_v60 = vpop.f32.mrb[90].mxu0  ;;  %v5630_v47 = vpop.f32.mrb[94].mxu1 }
0x20e0   :  { %v5648_v39 = vmul.f32 %v5645_v2, %v5540_v60  ;;  %v5674_v11 = vmul.f32 %v9309_v24, %v5540_v60  ;;  %v5705_v21 = vmul.f32 %v9311_v54, %v5540_v60  ;;  %v7186_v23 = vpop.f32.mrb[91].mxu0  ;;  %v7219_v0 = vpop.f32.mrb[95].mxu1  ;;  %v5660_v56 = vmul.f32 %v9332_v63, %v5630_v47 }
0x20e1   :  { %v5688_v8 = vmul.f32 %v9340_v48, %v5630_v47  ;;  %v5719_v34 = vmul.f32 %v9345_v40, %v5630_v47 }
0x20e2   :  { %v5664_v53 = vadd.f32 %v5654_v18, %v5648_v39  ;;  %v5693_v17 = vadd.f32 %v5681_v42, %v5674_v11  ;;  %v5724_v20 = vadd.f32 %v5712_v6, %v5705_v21 }
0x20e3   :  { %v5545_v29 = vpop.f32.mrb[92].mxu0  ;;  %v5635_v44 = vpop.f32.mrb[96].mxu1 }
0x20e4   :  { %v5668_v25 = vadd.f32 %v5664_v53, %v5660_v56  ;;  %v9355_v16 = vadd.f32 %v5693_v17, %v5688_v8  ;;  %v9357_v12 = vadd.f32 %v5724_v20, %v5719_v34  ;;  %v5649_v15 = vmul.f32 %v5645_v2, %v5545_v29  ;;  %v7189_v7 = vpop.f32.mrb[93].mxu0  ;;  %v7222_v10 = vpop.f32.mrb[97].mxu1 }
0x20e5   :  { %v5675_v19 = vmul.f32 %v9309_v24, %v5545_v29  ;;  %v5706_v58 = vmul.f32 %v9311_v54, %v5545_v29  ;;  %v5661_v49 = vmul.f32 %v9332_v63, %v5635_v44  ;;  %v5689_v57 = vmul.f32 %v9340_v48, %v5635_v44 }
0x20e6   :  { %v5665_v1 = vadd.f32 %v5655_v62, %v5649_v15  ;;  %v5720_v31 = vmul.f32 %v9345_v40, %v5635_v44  ;;  %v5740_v60 = vrot.slane %v9355_v16, 1  ;;  %v5762_v18 = vrot.slane %v9357_v12, 2 }
0x20e7   :  { %v5694_v30 = vadd.f32 %v5682_v32, %v5675_v19  ;;  %v5725_v2 = vadd.f32 %v5713_v3, %v5706_v58  ;;  %v5550_v36 = vpop.f32.mrb[94].mxu0  ;;  %v5640_v41 = vpop.f32.mrb[98].mxu1  ;;  %v5777_v29 = vstv %s9370_s23  ;;  %v5783_v58 = vstv %s6355_s24 }
0x20e8   :  { %v5669_v33 = vadd.f32 %v5665_v1, %v5661_v49  ;;  %v5676_v45 = vmul.f32 %v9309_v24, %v5550_v36  ;;  %v5707_v61 = vmul.f32 %v9311_v54, %v5550_v36  ;;  %v7192_v55 = vpop.f32.mrb[95].mxu0  ;;  %v7225_v13 = vpop.f32.mrb[99].mxu1  ;;  %v5690_v52 = vmul.f32 %v9340_v48, %v5640_v41 }
0x20e9   :  { %v5699_v50 = vadd.f32 %v5694_v30, %v5689_v57  ;;  %v5730_v5 = vadd.f32 %v5725_v2, %v5720_v31  ;;  %v5721_v26 = vmul.f32 %v9345_v40, %v5640_v41 }
0x20ea   :  { %v5695_v14 = vadd.f32 %v5683_v35, %v5676_v45  ;;  %v5726_v43 = vadd.f32 %v5714_v22, %v5707_v61 }
0x20eb   :  { %v5742_v24 = vrot.slane %v5699_v50, 1  ;;  %v5764_v42 = vrot.slane %v5730_v5, 2  ;;  %v5620_v54 = vpop.f32.mrb[96].mxu0 }
0x20ec   :  { %v5700_v47 = vadd.f32 %v5695_v14, %v5690_v52  ;;  %v5731_v28 = vadd.f32 %v5726_v43, %v5721_v26  ;;  %v5658_v46 = vmul.f32 %v9332_v63, %v5620_v54  ;;  %v5686_v39 = vmul.f32 %v9340_v48, %v5620_v54  ;;  %v7213_v11 = vpop.f32.mrb[97].mxu0 }
0x20ed   :  { %v5743_v21 = vsel %vm9853_vm1, %v5740_v60, %v5742_v24  ;;  %v5765_v6 = vsel %vm9854_vm13, %v5762_v18, %v5764_v42  ;;  %v5717_v23 = vmul.f32 %v9345_v40, %v5620_v54 }
0x20ee   :  { %v5752_v0 = vadd.f32 %v5743_v21, %v5668_v25  ;;  %v5744_v56 = vrot.slane %v5700_v47, 1  ;;  %v5766_v8 = vrot.slane %v5731_v28, 2  ;;  %v5666_v53 = vadd.f32 %v9319_v59, %v5658_v46 }
0x20ef   :  { %v5696_v17 = vadd.f32 %v9321_v27, %v5686_v39  ;;  %v5727_v20 = vadd.f32 %v9323_v38, %v5717_v23  ;;  %v5625_v34 = vpop.f32.mrb[98].mxu0 }
0x20f0   :  { %v5774_v62 = vadd.f32 %v5765_v6, %v5752_v0  ;;  %v5745_v44 = vsel %vm9855_vm12, %v5742_v24, %v5744_v56  ;;  %v5767_v16 = vsel %vm9856_vm11, %v5764_v42, %v5766_v8  ;;  %v5659_v12 = vmul.f32 %v9332_v63, %v5625_v34  ;;  %v7216_v15 = vpop.f32.mrb[99].mxu0 }
0x20f1   :  { %v5753_v7 = vadd.f32 %v5745_v44, %v5669_v33  ;;  %v5687_v25 = vmul.f32 %v9340_v48, %v5625_v34  ;;  %v5718_v59 = vmul.f32 %v9345_v40, %v5625_v34  ;;  %v5737_v3 = vrot.slane %v5696_v17, 1 }
0x20f2   :  { %v5667_v10 = vadd.f32 %v9334_v9, %v5659_v12  ;;  %v5780_v19 = vmul.f32 %v5777_v29, %v5774_v62  ;;  %v5759_v35 = vrot.slane %v5727_v20, 2 }
0x20f3   :  { %v5775_v27 = vadd.f32 %v5767_v16, %v5753_v7  ;;  %v5697_v38 = vadd.f32 %v9336_v37, %v5687_v25  ;;  %v5728_v32 = vadd.f32 %v9338_v51, %v5718_v59 }
0x20f4   :  { %v5786_v2 = vadd.f32 %v5783_v58, %v5780_v19 }
0x20f5   :  { %v5738_v1 = vrot.slane %v5697_v38, 1  ;;  %v5781_v49 = vmul.f32 %v5777_v29, %v5775_v27  ;;  %v5760_v63 = vrot.slane %v5728_v32, 2 }
0x20f6   :  { %v5790_v61 = vmax.f32 %v5786_v2, 0.0 }
0x20f7   :  { %v5739_v30 = vsel %vm9857_vm15, %v5737_v3, %v5738_v1  ;;  %v5741_v48 = vsel %vm9858_vm4, %v5738_v1, %v5740_v60  ;;  %v5787_v9 = vadd.f32 %v5783_v58, %v5781_v49  ;;  %v5761_v31 = vsel %vm9859_vm10, %v5759_v35, %v5760_v63 }
0x20f8   :  { %v5750_v57 = vadd.f32 %v5739_v30, %v5666_v53  ;;  %v5751_v40 = vadd.f32 %v5741_v48, %v5667_v10  ;;  %v5763_v37 = vsel %vm9860_vm0, %v5760_v63, %v5762_v18  ;;  %v5794_v14 = vmul.f32 %v9184_v4, %v5790_v61 }
0x20f9   :  { %v5791_v41 = vmax.f32 %v5787_v9, 0.0 }
0x20fa   :  { %v5772_v36 = vadd.f32 %v5761_v31, %v5750_v57  ;;  %v5773_v51 = vadd.f32 %v5763_v37, %v5751_v40  ;;  %v5798_v24 = vsel %vm9848_vm3, %v5794_v14, -inf }
0x20fb   :  { %v5795_v13 = vmul.f32 %v9184_v4, %v5791_v41 }
0x20fc   :  { %v5778_v33 = vmul.f32 %v5777_v29, %v5772_v36  ;;  %v5779_v45 = vmul.f32 %v5777_v29, %v5773_v51 }
0x20fd   :  { %v5799_v26 = vsel %vm9861_vm5, %v5795_v13, -inf }
0x20fe   :  { %v5784_v22 = vadd.f32 %v5783_v58, %v5778_v33  ;;  %v5785_v55 = vadd.f32 %v5783_v58, %v5779_v45  ;;  %v5801_v54 = vmax.f32 %v5798_v24, %v5799_v26 }
0x2100   :  { %v5788_v50 = vmax.f32 %v5784_v22, 0.0  ;;  %v5789_v5 = vmax.f32 %v5785_v55, 0.0 }
0x2102   :  { %v5792_v43 = vmul.f32 %v9184_v4, %v5788_v50  ;;  %v5793_v52 = vmul.f32 %v9184_v4, %v5789_v5 }
0x2104   :  { %v5796_v60 = vsel %vm9862_vm9, %v5792_v43, -inf  ;;  %v5797_v18 = vsel %vm9863_vm6, %v5793_v52, -inf }
0x2105   :  { %v5800_v42 = vmax.f32 %v5796_v60, %v5797_v18 }
0x2107   :  { %v5802_v47 = vmax.f32 %v5800_v42, %v5801_v54 }
0x2109   :  { %5803 = vmax.xlane.f32.xlu0 %v5802_v47 }
0x2196   :  { %v5804_v28 = vpop.xlane.xlu0 %5803 }
0x2197   :  { %v5805_v46 = vrot.slane %v5804_v28, 4 }
0x2199   :  { %v5806_v39 = vmax.f32 %v5804_v28, %v5805_v46 }
0x219b   :  { %v5807_v11 = vrot.slane %v5806_v39, 2 }
0x219d   :  { %v5808_v21 = vmax.f32 %v5806_v39, %v5807_v11 }
0x219f   :  { %v5809_v6 = vrot.slane %v5808_v21, 1 }
0x21a1   :  { %v5810_v23 = vmax.f32 %v5808_v21, %v5809_v6 }
0x21a3   :  { %7428 = vpush %v5810_v23 }
0x21d4   :  { %s7429_s25 = spop %7428 }
0x21d5   :  { %v5812_v4 = vstv %s7429_s25 }
0x21d6   :  { %7441 = vrcp.f32 %v5812_v4 }
0x21e0   :  { %v7442_v0 = vpop.eup %7441 }
0x21e1   :  { %7430 = vpush %v7442_v0 }
0x2212   :  { %s7431_s26 = spop %7430 }
0x2213   :  { %v5815_v56 = vstv %s7431_s26 }
0x2214   :  { %v5816_v8 = vmul.f32 %v5815_v56, %v5792_v43  ;;  %v5817_v53 = vmul.f32 %v5815_v56, %v5793_v52  ;;  %v5818_v17 = vmul.f32 %v5815_v56, %v5794_v14  ;;  %v5819_v20 = vmul.f32 %v5815_v56, %v5795_v13 }
0x2216   :  { %5820 = vst.msk [vmem:[%s9428_s3] sm:$0xff] %vm9864_vm7, %v5816_v8 }
0x2217   :  { %5821 = vst.msk [vmem:[%s9428_s3 + $0x8] sm:$0xff] %vm9865_vm2, %v5817_v53 }
0x2218   :  { %5822 = vst.msk [vmem:[%s9428_s3 + $0x10] sm:$0xff] %vm9866_vm8, %v5818_v17 }
0x2219   :  { %5823 = vst.msk [vmem:[%s9428_s3 + $0x18] sm:$0xff] %vm9867_vm14, %v5819_v20 }
0x221a   :  { %5828 = vsyncpa [#allocation3], 1 }
0x221b   :  { %5829 = vsyncpa [#allocation5], 1 }

</bundles_post_ra>
